<compile_context>
chip_gen: v7x
topology: tpu7x:2x2x1
jax: 0.10.0
libtpu: 0.0.40
codegen_flags: <defaults>
</compile_context>

<pallas_src>
import jax
import jax.numpy as jnp
from jax.experimental import pallas as pl
from jax.experimental.pallas import tpu as pltpu

# ---- model hyper-parameters (small, consistent with a tiny ViT) -------------
B = 2                      # batch
C = 3                      # image channels
H = W = 16                 # spatial
P = 4                      # patch size
N = (H // P) * (W // P)    # 16 tokens per image
PD = C * P * P             # 48 patch dim
D = 32                     # embed dim
NH = 4                     # attention heads
HD = D // NH               # head dim = 8
DM = 4 * D                 # MLP hidden = 128
L = 2                      # transformer layers
NC = 10                    # classes
NCP = 128                  # lane-padded classifier width (lane-dense store)
T = B * N                  # 32 flattened tokens
G = B * NH                 # 8 merged (batch, head) groups
LN_EPS = 1e-5              # torch.nn.LayerNorm default
SCALE = 1.0 / (HD ** 0.5)
LANES = 128

# ---- packed weight-slab layout (row ranges; all sublane-aligned) -------------
WS_PATCH = 0                               # rows [0, 48)   cols [0, 32)
WS_PER_LAYER = D + D + D + DM              # qkv(32) + w_o(32) + w_m1(32) + w_m2(128) = 224


def ws_layer(l):
    return PD + l * WS_PER_LAYER           # 48, 272


WS_HEAD = PD + L * WS_PER_LAYER            # 496
WS_ROWS = WS_HEAD + D                      # 528

# ---- packed small-vector slab layout (one row per vector) --------------------
V_BPATCH = 0


def v_layer(l):
    # +0 ln1_g, +1 ln1_b, +2 b_qkv(96), +3 b_o, +4 ln2_g, +5 ln2_b, +6 b_m1(128), +7 b_m2
    return 1 + l * 8


V_LNF_G = 1 + L * 8                        # 17
V_LNF_B = V_LNF_G + 1                      # 18
V_BHEAD = V_LNF_G + 2                      # 19
V_POS = 24                                 # rows [24, 40) cols [0, 32): positional table
V_ROWS = V_POS + N                         # 40


def _layer_norm(z, g, b, eps=LN_EPS):
    mu = jnp.mean(z, axis=-1, keepdims=True)
    var = jnp.mean((z - mu) ** 2, axis=-1, keepdims=True)
    return (z - mu) * jax.lax.rsqrt(var + eps) * g + b


def vit_kernel(patches_ref, wslab_ref, vecs_ref, out_ref):
    # --- tokenizer: linear patch embedding, single [T,PD]@[PD,D] dot ----------
    w_patch = wslab_ref[WS_PATCH:WS_PATCH + PD, 0:D]
    b_patch = vecs_ref[V_BPATCH:V_BPATCH + 1, 0:D]
    x = jnp.dot(patches_ref[...], w_patch,
                preferred_element_type=jnp.float32) + b_patch          # [T, D]
    pos = vecs_ref[V_POS:V_POS + N, 0:D]                               # [N, D]
    x = x + jnp.concatenate([pos] * B, axis=0)                         # broadcast per image

    # --- transformer encoder blocks (static unroll, L=2) ----------------------
    for l in range(L):
        base = ws_layer(l)
        r = v_layer(l)
        ln1g = vecs_ref[r + 0:r + 1, 0:D]
        ln1b = vecs_ref[r + 1:r + 2, 0:D]
        w_qkv = wslab_ref[base:base + D, 0:3 * D]                      # [D, 96] fused, scaled q
        b_qkv = vecs_ref[r + 2:r + 3, 0:3 * D]                         # [1, 96]
        w_o = wslab_ref[base + D:base + 2 * D, 0:D]
        b_o = vecs_ref[r + 3:r + 4, 0:D]
        ln2g = vecs_ref[r + 4:r + 5, 0:D]
        ln2b = vecs_ref[r + 5:r + 6, 0:D]
        w_m1 = wslab_ref[base + 2 * D:base + 3 * D, 0:DM]
        b_m1 = vecs_ref[r + 6:r + 7, 0:DM]
        w_m2 = wslab_ref[base + 3 * D:base + 3 * D + DM, 0:D]
        b_m2 = vecs_ref[r + 7:r + 8, 0:D]

        # ---------- multi-head self-attention (pre-LN) ----------
        h = _layer_norm(x, ln1g, ln1b)
        # one fused MXU launch for q|k|v (head-interleaved columns, SCALE pre-folded)
        qkv = jnp.dot(h, w_qkv, preferred_element_type=jnp.float32) + b_qkv   # [T, 96]
        # ONE head-split relayout for q, k and v together
        qkvh = (qkv.reshape(B, N, NH, 3 * HD)
                   .transpose(0, 2, 1, 3)
                   .reshape(G, N, 3 * HD))
        qh = qkvh[..., 0:HD]
        kh = qkvh[..., HD:2 * HD]
        vh = qkvh[..., 2 * HD:3 * HD]

        # batched dot_general over the merged (B*NH) leading axis
        s = jnp.einsum('gqd,gkd->gqk', qh, kh,
                       preferred_element_type=jnp.float32)             # [G, N, N]
        s = s - jnp.max(s, axis=-1, keepdims=True)
        p = jnp.exp(s)
        # approx reciprocal (EUP slot); acceptable for inference, not bit-exact softmax
        p = p * pl.reciprocal(jnp.sum(p, axis=-1, keepdims=True), approx=True)
        o = jnp.einsum('gqk,gkd->gqd', p, vh,
                       preferred_element_type=jnp.float32)             # [G, N, HD]

        # single merge relayout back to [T, D], then output projection
        o = o.reshape(B, NH, N, HD).transpose(0, 2, 1, 3).reshape(T, D)
        x = x + jnp.dot(o, w_o, preferred_element_type=jnp.float32) + b_o

        # ---------- MLP (pre-LN) ----------
        h2 = _layer_norm(x, ln2g, ln2b)
        m = jnp.dot(h2, w_m1, preferred_element_type=jnp.float32) + b_m1
        # TODO(synk): PyTorch nn.GELU default is exact erf; tanh approximation used.
        m = jax.nn.gelu(m, approximate=True)
        x = x + jnp.dot(m, w_m2, preferred_element_type=jnp.float32) + b_m2

    # --- final LN, mean pool per image, classification head -------------------
    xf = _layer_norm(x, vecs_ref[V_LNF_G:V_LNF_G + 1, 0:D],
                     vecs_ref[V_LNF_B:V_LNF_B + 1, 0:D])
    pooled = jnp.mean(xf.reshape(B, N, D), axis=1)                     # [B, D]
    w_head = wslab_ref[WS_HEAD:WS_HEAD + D, 0:NCP]                     # zero-padded to 128
    b_head = vecs_ref[V_BHEAD:V_BHEAD + 1, 0:NCP]
    logits = jnp.dot(pooled, w_head, preferred_element_type=jnp.float32) + b_head
    out_ref[...] = logits.astype(out_ref.dtype)                        # [B, NCP] lane-dense


# ------------------------------ host-side helpers -----------------------------
def make_params(key):
    ks = jax.random.split(key, 8)
    s = 0.02
    return {
        'w_patch': jax.random.normal(ks[0], (PD, D), jnp.float32) * s,
        'b_patch': jnp.zeros((1, D), jnp.float32),
        'pos':     jax.random.normal(ks[1], (N, D), jnp.float32) * s,
        'ln1_g':   jnp.ones((L, 1, D), jnp.float32),
        'ln1_b':   jnp.zeros((L, 1, D), jnp.float32),
        'w_qkv':   jax.random.normal(ks[2], (L, 3, D, D), jnp.float32) * s,
        'b_qkv':   jnp.zeros((L, 3, 1, D), jnp.float32),
        'w_o':     jax.random.normal(ks[3], (L, D, D), jnp.float32) * s,
        'b_o':     jnp.zeros((L, 1, D), jnp.float32),
        'ln2_g':   jnp.ones((L, 1, D), jnp.float32),
        'ln2_b':   jnp.zeros((L, 1, D), jnp.float32),
        'w_m1':    jax.random.normal(ks[4], (L, D, DM), jnp.float32) * s,
        'b_m1':    jnp.zeros((L, 1, DM), jnp.float32),
        'w_m2':    jax.random.normal(ks[5], (L, DM, D), jnp.float32) * s,
        'b_m2':    jnp.zeros((L, 1, D), jnp.float32),
        'lnf_g':   jnp.ones((1, D), jnp.float32),
        'lnf_b':   jnp.zeros((1, D), jnp.float32),
        'w_head':  jax.random.normal(ks[6], (D, NC), jnp.float32) * s,
        'b_head':  jnp.zeros((1, NC), jnp.float32),
    }


def pack_params(params):
    """Pack all weights into two contiguous lane-padded slabs (done once, off the hot path)."""
    wslab = jnp.zeros((WS_ROWS, LANES), jnp.float32)
    vecs = jnp.zeros((V_ROWS, LANES), jnp.float32)

    wslab = wslab.at[WS_PATCH:WS_PATCH + PD, 0:D].set(params['w_patch'])
    vecs = vecs.at[V_BPATCH, 0:D].set(params['b_patch'][0])

    for l in range(L):
        base = ws_layer(l)
        r = v_layer(l)
        # fused qkv weight: head-interleaved columns [q_h | k_h | v_h] * NH,
        # 1/sqrt(HD) folded into the q columns (and q bias).
        wq = params['w_qkv'][l, 0] * SCALE
        wk = params['w_qkv'][l, 1]
        wv = params['w_qkv'][l, 2]
        bq = params['b_qkv'][l, 0, 0] * SCALE
        bk = params['b_qkv'][l, 1, 0]
        bv = params['b_qkv'][l, 2, 0]
        wblocks, bblocks = [], []
        for hh in range(NH):
            sl = slice(hh * HD, (hh + 1) * HD)
            wblocks += [wq[:, sl], wk[:, sl], wv[:, sl]]
            bblocks += [bq[sl], bk[sl], bv[sl]]
        w_qkv_f = jnp.concatenate(wblocks, axis=1)                     # [D, 96]
        b_qkv_f = jnp.concatenate(bblocks, axis=0)                     # [96]

        wslab = wslab.at[base:base + D, 0:3 * D].set(w_qkv_f)
        wslab = wslab.at[base + D:base + 2 * D, 0:D].set(params['w_o'][l])
        wslab = wslab.at[base + 2 * D:base + 3 * D, 0:DM].set(params['w_m1'][l])
        wslab = wslab.at[base + 3 * D:base + 3 * D + DM, 0:D].set(params['w_m2'][l])

        vecs = vecs.at[r + 0, 0:D].set(params['ln1_g'][l, 0])
        vecs = vecs.at[r + 1, 0:D].set(params['ln1_b'][l, 0])
        vecs = vecs.at[r + 2, 0:3 * D].set(b_qkv_f)
        vecs = vecs.at[r + 3, 0:D].set(params['b_o'][l, 0])
        vecs = vecs.at[r + 4, 0:D].set(params['ln2_g'][l, 0])
        vecs = vecs.at[r + 5, 0:D].set(params['ln2_b'][l, 0])
        vecs = vecs.at[r + 6, 0:DM].set(params['b_m1'][l, 0])
        vecs = vecs.at[r + 7, 0:D].set(params['b_m2'][l, 0])

    wslab = wslab.at[WS_HEAD:WS_HEAD + D, 0:NC].set(params['w_head'])
    vecs = vecs.at[V_LNF_G, 0:D].set(params['lnf_g'][0])
    vecs = vecs.at[V_LNF_B, 0:D].set(params['lnf_b'][0])
    vecs = vecs.at[V_BHEAD, 0:NC].set(params['b_head'][0])
    vecs = vecs.at[V_POS:V_POS + N, 0:D].set(params['pos'])
    return wslab, vecs


def patchify(x_nchw):
    # NCHW -> [T = B*N, C*P*P]  (C-major within a patch, like a conv patch embed)
    b, c, h, w = x_nchw.shape
    x = x_nchw.reshape(b, c, h // P, P, w // P, P)
    x = x.transpose(0, 2, 4, 1, 3, 5)            # [B, H/P, W/P, C, P, P]
    return x.reshape(b * (h // P) * (w // P), c * P * P)


_FLOPS = (2 * T * PD * D
          + L * (2 * T * D * (3 * D)             # fused qkv projection
                 + 2 * 2 * G * N * N * HD        # scores + attn@v
                 + 2 * T * D * D                 # output projection
                 + 2 * 2 * T * D * DM)           # MLP
          + 2 * B * D * NCP)                     # head
_TRANSCENDENTALS = L * (G * N * N + T * DM + G * N) + 5 * T
_BYTES = (T * PD + WS_ROWS * LANES + V_ROWS * LANES + B * NCP) * 4


@jax.jit
def new_model_forward(x_nchw, wslab, vecs):
    patches = patchify(x_nchw).astype(jnp.float32)          # [T, PD]
    vmem = pl.BlockSpec(memory_space=pltpu.MemorySpace.VMEM)
    logits_padded = pl.pallas_call(
        vit_kernel,
        out_shape=jax.ShapeDtypeStruct((B, NCP), jnp.float32),
        in_specs=[vmem, vmem, vmem],
        out_specs=vmem,
        cost_estimate=pl.CostEstimate(flops=_FLOPS,
                                      transcendentals=_TRANSCENDENTALS,
                                      bytes_accessed=_BYTES),
    )(patches, wslab, vecs)
    return logits_padded[:, :NC]


if __name__ == "__main__":
    key = jax.random.PRNGKey(0)
    k_x, k_p = jax.random.split(key)
    x = jax.random.normal(k_x, (B, C, H, W), jnp.float32)   # NCHW input image
    params = make_params(k_p)
    wslab, vecs = pack_params(params)                        # one-time packing

    out = new_model_forward(x, wslab, vecs)
    out = jax.block_until_ready(out)
    assert out.shape == (B, NC), out.shape
    print("KERNEL_OK")
</pallas_src>

<mosaic_0001>
module attributes {stable_mosaic.version = 11 : i64} {
  func.func @vit_kernel(%arg0: memref<32x48xf32, #tpu.memory_space<vmem>>, %arg1: memref<528x128xf32, #tpu.memory_space<vmem>>, %arg2: memref<40x128xf32, #tpu.memory_space<vmem>>, %arg3: memref<2x128xf32, #tpu.memory_space<vmem>>) attributes {dimension_semantics = [], scalar_prefetch = 0 : i64, scratch_operands = 0 : i64, tpu.core_type = #tpu.core_type<tc>} {
    %c0 = arith.constant 0 : index
    %c0_0 = arith.constant 0 : index
    %0 = vector.load %arg1[%c0, %c0_0] : memref<528x128xf32, #tpu.memory_space<vmem>>, vector<48x32xf32>
    %c0_1 = arith.constant 0 : index
    %c0_2 = arith.constant 0 : index
    %1 = vector.load %arg2[%c0_1, %c0_2] : memref<40x128xf32, #tpu.memory_space<vmem>>, vector<1x32xf32>
    %c0_3 = arith.constant 0 : index
    %c0_4 = arith.constant 0 : index
    %2 = vector.load %arg0[%c0_3, %c0_4] : memref<32x48xf32, #tpu.memory_space<vmem>>, vector<32x48xf32>
    %cst = arith.constant dense<0.000000e+00> : vector<32x32xf32>
    %3 = tpu.matmul %2, %0, %cst {dimension_numbers = #tpu.dot_dimension_numbers<[1], [0], [0], [1], [0, 0, 1, 1], [], []>} : vector<32x48xf32>, vector<48x32xf32>, vector<32x32xf32> -> vector<32x32xf32>
    %4 = vector.broadcast %1 : vector<1x32xf32> to vector<32x32xf32>
    %5 = arith.addf %3, %4 : vector<32x32xf32>
    %c24 = arith.constant 24 : index
    %c0_5 = arith.constant 0 : index
    %6 = vector.load %arg2[%c24, %c0_5] : memref<40x128xf32, #tpu.memory_space<vmem>>, vector<16x32xf32>
    %7 = tpu.concatenate %6, %6 in 0 : vector<16x32xf32>, vector<16x32xf32> -> vector<32x32xf32>
    %8 = arith.addf %5, %7 : vector<32x32xf32>
    %c1 = arith.constant 1 : index
    %c0_6 = arith.constant 0 : index
    %9 = vector.load %arg2[%c1, %c0_6] : memref<40x128xf32, #tpu.memory_space<vmem>>, vector<1x32xf32>
    %c2 = arith.constant 2 : index
    %c0_7 = arith.constant 0 : index
    %10 = vector.load %arg2[%c2, %c0_7] : memref<40x128xf32, #tpu.memory_space<vmem>>, vector<1x32xf32>
    %c48 = arith.constant 48 : index
    %c0_8 = arith.constant 0 : index
    %11 = vector.load %arg1[%c48, %c0_8] : memref<528x128xf32, #tpu.memory_space<vmem>>, vector<32x96xf32>
    %c3 = arith.constant 3 : index
    %c0_9 = arith.constant 0 : index
    %12 = vector.load %arg2[%c3, %c0_9] : memref<40x128xf32, #tpu.memory_space<vmem>>, vector<1x96xf32>
    %c80 = arith.constant 80 : index
    %c0_10 = arith.constant 0 : index
    %13 = vector.load %arg1[%c80, %c0_10] : memref<528x128xf32, #tpu.memory_space<vmem>>, vector<32x32xf32>
    %c4 = arith.constant 4 : index
    %c0_11 = arith.constant 0 : index
    %14 = vector.load %arg2[%c4, %c0_11] : memref<40x128xf32, #tpu.memory_space<vmem>>, vector<1x32xf32>
    %c5 = arith.constant 5 : index
    %c0_12 = arith.constant 0 : index
    %15 = vector.load %arg2[%c5, %c0_12] : memref<40x128xf32, #tpu.memory_space<vmem>>, vector<1x32xf32>
    %c6 = arith.constant 6 : index
    %c0_13 = arith.constant 0 : index
    %16 = vector.load %arg2[%c6, %c0_13] : memref<40x128xf32, #tpu.memory_space<vmem>>, vector<1x32xf32>
    %c112 = arith.constant 112 : index
    %c0_14 = arith.constant 0 : index
    %17 = vector.load %arg1[%c112, %c0_14] : memref<528x128xf32, #tpu.memory_space<vmem>>, vector<32x128xf32>
    %c7 = arith.constant 7 : index
    %c0_15 = arith.constant 0 : index
    %18 = vector.load %arg2[%c7, %c0_15] : memref<40x128xf32, #tpu.memory_space<vmem>>, vector<1x128xf32>
    %c144 = arith.constant 144 : index
    %c0_16 = arith.constant 0 : index
    %19 = vector.load %arg1[%c144, %c0_16] : memref<528x128xf32, #tpu.memory_space<vmem>>, vector<128x32xf32>
    %c8 = arith.constant 8 : index
    %c0_17 = arith.constant 0 : index
    %20 = vector.load %arg2[%c8, %c0_17] : memref<40x128xf32, #tpu.memory_space<vmem>>, vector<1x32xf32>
    %cst_18 = arith.constant dense<0.000000e+00> : vector<32xf32>
    %21 = vector.multi_reduction <add>, %8, %cst_18 [1] : vector<32x32xf32> to vector<32xf32>
    %22 = vector.shape_cast %21 : vector<32xf32> to vector<32x1xf32>
    %cst_19 = arith.constant 3.200000e+01 : f32
    %23 = vector.broadcast %cst_19 : f32 to vector<32x1xf32>
    %24 = arith.divf %22, %23 : vector<32x1xf32>
    %25 = vector.broadcast %24 : vector<32x1xf32> to vector<32x32xf32>
    %26 = arith.subf %8, %25 : vector<32x32xf32>
    %27 = arith.mulf %26, %26 : vector<32x32xf32>
    %cst_20 = arith.constant dense<0.000000e+00> : vector<32xf32>
    %28 = vector.multi_reduction <add>, %27, %cst_20 [1] : vector<32x32xf32> to vector<32xf32>
    %29 = vector.shape_cast %28 : vector<32xf32> to vector<32x1xf32>
    %cst_21 = arith.constant 3.200000e+01 : f32
    %30 = vector.broadcast %cst_21 : f32 to vector<32x1xf32>
    %31 = arith.divf %29, %30 : vector<32x1xf32>
    %32 = vector.broadcast %24 : vector<32x1xf32> to vector<32x32xf32>
    %33 = arith.subf %8, %32 : vector<32x32xf32>
    %cst_22 = arith.constant 9.99999974E-6 : f32
    %34 = vector.broadcast %cst_22 : f32 to vector<32x1xf32>
    %35 = arith.addf %31, %34 : vector<32x1xf32>
    %36 = math.rsqrt %35 : vector<32x1xf32>
    %37 = vector.broadcast %36 : vector<32x1xf32> to vector<32x32xf32>
    %38 = arith.mulf %33, %37 : vector<32x32xf32>
    %39 = vector.broadcast %9 : vector<1x32xf32> to vector<32x32xf32>
    %40 = arith.mulf %38, %39 : vector<32x32xf32>
    %41 = vector.broadcast %10 : vector<1x32xf32> to vector<32x32xf32>
    %42 = arith.addf %40, %41 : vector<32x32xf32>
    %cst_23 = arith.constant dense<0.000000e+00> : vector<32x96xf32>
    %43 = tpu.matmul %42, %11, %cst_23 {dimension_numbers = #tpu.dot_dimension_numbers<[1], [0], [0], [1], [0, 0, 1, 1], [], []>} : vector<32x32xf32>, vector<32x96xf32>, vector<32x96xf32> -> vector<32x96xf32>
    %44 = vector.broadcast %12 : vector<1x96xf32> to vector<32x96xf32>
    %45 = arith.addf %43, %44 : vector<32x96xf32>
    %46 = vector.shape_cast %45 : vector<32x96xf32> to vector<2x16x4x24xf32>
    %47 = tpu.transpose %46, [0, 2, 1, 3] : vector<2x16x4x24xf32> -> vector<2x4x16x24xf32>
    %48 = vector.shape_cast %47 : vector<2x4x16x24xf32> to vector<8x16x24xf32>
    %49 = vector.extract_strided_slice %48 {offsets = [0, 0, 0], sizes = [8, 16, 8], strides = [1, 1, 1]} : vector<8x16x24xf32> to vector<8x16x8xf32>
    %50 = vector.extract_strided_slice %48 {offsets = [0, 0, 8], sizes = [8, 16, 8], strides = [1, 1, 1]} : vector<8x16x24xf32> to vector<8x16x8xf32>
    %51 = vector.extract_strided_slice %48 {offsets = [0, 0, 16], sizes = [8, 16, 8], strides = [1, 1, 1]} : vector<8x16x24xf32> to vector<8x16x8xf32>
    "tpu.trace_start"() <{level = 10 : i32, message = "gqd,gkd->gqk"}> : () -> ()
    %cst_24 = arith.constant dense<0.000000e+00> : vector<8x16x16xf32>
    %52 = tpu.matmul %49, %50, %cst_24 {dimension_numbers = #tpu.dot_dimension_numbers<[2], [2], [1], [1], [0, 0, 0, 1, 1, 1], [0], [0]>} : vector<8x16x8xf32>, vector<8x16x8xf32>, vector<8x16x16xf32> -> vector<8x16x16xf32>
    "tpu.trace_stop"() : () -> ()
    %cst_25 = arith.constant dense<0xFF800000> : vector<8x16xf32>
    %53 = vector.multi_reduction <maximumf>, %52, %cst_25 [2] : vector<8x16x16xf32> to vector<8x16xf32>
    %54 = vector.shape_cast %53 : vector<8x16xf32> to vector<8x16x1xf32>
    %55 = vector.broadcast %54 : vector<8x16x1xf32> to vector<8x16x16xf32>
    %56 = arith.subf %52, %55 : vector<8x16x16xf32>
    %57 = math.exp %56 : vector<8x16x16xf32>
    %cst_26 = arith.constant dense<0.000000e+00> : vector<8x16xf32>
    %58 = vector.multi_reduction <add>, %57, %cst_26 [2] : vector<8x16x16xf32> to vector<8x16xf32>
    %59 = vector.shape_cast %58 : vector<8x16xf32> to vector<8x16x1xf32>
    %60 = tpu.reciprocal %59 {approx = true} : vector<8x16x1xf32> -> vector<8x16x1xf32>
    %61 = vector.broadcast %60 : vector<8x16x1xf32> to vector<8x16x16xf32>
    %62 = arith.mulf %57, %61 : vector<8x16x16xf32>
    "tpu.trace_start"() <{level = 10 : i32, message = "gqk,gkd->gqd"}> : () -> ()
    %cst_27 = arith.constant dense<0.000000e+00> : vector<8x16x8xf32>
    %63 = tpu.matmul %62, %51, %cst_27 {dimension_numbers = #tpu.dot_dimension_numbers<[2], [1], [1], [2], [0, 0, 0, 1, 1, 2], [0], [0]>} : vector<8x16x16xf32>, vector<8x16x8xf32>, vector<8x16x8xf32> -> vector<8x16x8xf32>
    "tpu.trace_stop"() : () -> ()
    %64 = vector.shape_cast %63 : vector<8x16x8xf32> to vector<2x4x16x8xf32>
    %65 = tpu.transpose %64, [0, 2, 1, 3] : vector<2x4x16x8xf32> -> vector<2x16x4x8xf32>
    %66 = vector.shape_cast %65 : vector<2x16x4x8xf32> to vector<32x32xf32>
    %cst_28 = arith.constant dense<0.000000e+00> : vector<32x32xf32>
    %67 = tpu.matmul %66, %13, %cst_28 {dimension_numbers = #tpu.dot_dimension_numbers<[1], [0], [0], [1], [0, 0, 1, 1], [], []>} : vector<32x32xf32>, vector<32x32xf32>, vector<32x32xf32> -> vector<32x32xf32>
    %68 = arith.addf %8, %67 : vector<32x32xf32>
    %69 = vector.broadcast %14 : vector<1x32xf32> to vector<32x32xf32>
    %70 = arith.addf %68, %69 : vector<32x32xf32>
    %cst_29 = arith.constant dense<0.000000e+00> : vector<32xf32>
    %71 = vector.multi_reduction <add>, %70, %cst_29 [1] : vector<32x32xf32> to vector<32xf32>
    %72 = vector.shape_cast %71 : vector<32xf32> to vector<32x1xf32>
    %cst_30 = arith.constant 3.200000e+01 : f32
    %73 = vector.broadcast %cst_30 : f32 to vector<32x1xf32>
    %74 = arith.divf %72, %73 : vector<32x1xf32>
    %75 = vector.broadcast %74 : vector<32x1xf32> to vector<32x32xf32>
    %76 = arith.subf %70, %75 : vector<32x32xf32>
    %77 = arith.mulf %76, %76 : vector<32x32xf32>
    %cst_31 = arith.constant dense<0.000000e+00> : vector<32xf32>
    %78 = vector.multi_reduction <add>, %77, %cst_31 [1] : vector<32x32xf32> to vector<32xf32>
    %79 = vector.shape_cast %78 : vector<32xf32> to vector<32x1xf32>
    %cst_32 = arith.constant 3.200000e+01 : f32
    %80 = vector.broadcast %cst_32 : f32 to vector<32x1xf32>
    %81 = arith.divf %79, %80 : vector<32x1xf32>
    %82 = vector.broadcast %74 : vector<32x1xf32> to vector<32x32xf32>
    %83 = arith.subf %70, %82 : vector<32x32xf32>
    %cst_33 = arith.constant 9.99999974E-6 : f32
    %84 = vector.broadcast %cst_33 : f32 to vector<32x1xf32>
    %85 = arith.addf %81, %84 : vector<32x1xf32>
    %86 = math.rsqrt %85 : vector<32x1xf32>
    %87 = vector.broadcast %86 : vector<32x1xf32> to vector<32x32xf32>
    %88 = arith.mulf %83, %87 : vector<32x32xf32>
    %89 = vector.broadcast %15 : vector<1x32xf32> to vector<32x32xf32>
    %90 = arith.mulf %88, %89 : vector<32x32xf32>
    %91 = vector.broadcast %16 : vector<1x32xf32> to vector<32x32xf32>
    %92 = arith.addf %90, %91 : vector<32x32xf32>
    %cst_34 = arith.constant dense<0.000000e+00> : vector<32x128xf32>
    %93 = tpu.matmul %92, %17, %cst_34 {dimension_numbers = #tpu.dot_dimension_numbers<[1], [0], [0], [1], [0, 0, 1, 1], [], []>} : vector<32x32xf32>, vector<32x128xf32>, vector<32x128xf32> -> vector<32x128xf32>
    %94 = vector.broadcast %18 : vector<1x128xf32> to vector<32x128xf32>
    %95 = arith.addf %93, %94 : vector<32x128xf32>
    %96 = arith.mulf %95, %95 : vector<32x128xf32>
    %97 = arith.mulf %95, %96 : vector<32x128xf32>
    %cst_35 = arith.constant 4.471500e-02 : f32
    %98 = vector.broadcast %cst_35 : f32 to vector<32x128xf32>
    %99 = arith.mulf %98, %97 : vector<32x128xf32>
    %100 = arith.addf %95, %99 : vector<32x128xf32>
    %cst_36 = arith.constant 0.797884583 : f32
    %101 = vector.broadcast %cst_36 : f32 to vector<32x128xf32>
    %102 = arith.mulf %101, %100 : vector<32x128xf32>
    %103 = math.tanh %102 : vector<32x128xf32>
    %cst_37 = arith.constant 1.000000e+00 : f32
    %104 = vector.broadcast %cst_37 : f32 to vector<32x128xf32>
    %105 = arith.addf %104, %103 : vector<32x128xf32>
    %cst_38 = arith.constant 5.000000e-01 : f32
    %106 = vector.broadcast %cst_38 : f32 to vector<32x128xf32>
    %107 = arith.mulf %106, %105 : vector<32x128xf32>
    %108 = arith.mulf %95, %107 : vector<32x128xf32>
    %cst_39 = arith.constant dense<0.000000e+00> : vector<32x32xf32>
    %109 = tpu.matmul %108, %19, %cst_39 {dimension_numbers = #tpu.dot_dimension_numbers<[1], [0], [0], [1], [0, 0, 1, 1], [], []>} : vector<32x128xf32>, vector<128x32xf32>, vector<32x32xf32> -> vector<32x32xf32>
    %110 = arith.addf %70, %109 : vector<32x32xf32>
    %111 = vector.broadcast %20 : vector<1x32xf32> to vector<32x32xf32>
    %112 = arith.addf %110, %111 : vector<32x32xf32>
    %c9 = arith.constant 9 : index
    %c0_40 = arith.constant 0 : index
    %113 = vector.load %arg2[%c9, %c0_40] : memref<40x128xf32, #tpu.memory_space<vmem>>, vector<1x32xf32>
    %c10 = arith.constant 10 : index
    %c0_41 = arith.constant 0 : index
    %114 = vector.load %arg2[%c10, %c0_41] : memref<40x128xf32, #tpu.memory_space<vmem>>, vector<1x32xf32>
    %c272 = arith.constant 272 : index
    %c0_42 = arith.constant 0 : index
    %115 = vector.load %arg1[%c272, %c0_42] : memref<528x128xf32, #tpu.memory_space<vmem>>, vector<32x96xf32>
    %c11 = arith.constant 11 : index
    %c0_43 = arith.constant 0 : index
    %116 = vector.load %arg2[%c11, %c0_43] : memref<40x128xf32, #tpu.memory_space<vmem>>, vector<1x96xf32>
    %c304 = arith.constant 304 : index
    %c0_44 = arith.constant 0 : index
    %117 = vector.load %arg1[%c304, %c0_44] : memref<528x128xf32, #tpu.memory_space<vmem>>, vector<32x32xf32>
    %c12 = arith.constant 12 : index
    %c0_45 = arith.constant 0 : index
    %118 = vector.load %arg2[%c12, %c0_45] : memref<40x128xf32, #tpu.memory_space<vmem>>, vector<1x32xf32>
    %c13 = arith.constant 13 : index
    %c0_46 = arith.constant 0 : index
    %119 = vector.load %arg2[%c13, %c0_46] : memref<40x128xf32, #tpu.memory_space<vmem>>, vector<1x32xf32>
    %c14 = arith.constant 14 : index
    %c0_47 = arith.constant 0 : index
    %120 = vector.load %arg2[%c14, %c0_47] : memref<40x128xf32, #tpu.memory_space<vmem>>, vector<1x32xf32>
    %c336 = arith.constant 336 : index
    %c0_48 = arith.constant 0 : index
    %121 = vector.load %arg1[%c336, %c0_48] : memref<528x128xf32, #tpu.memory_space<vmem>>, vector<32x128xf32>
    %c15 = arith.constant 15 : index
    %c0_49 = arith.constant 0 : index
    %122 = vector.load %arg2[%c15, %c0_49] : memref<40x128xf32, #tpu.memory_space<vmem>>, vector<1x128xf32>
    %c368 = arith.constant 368 : index
    %c0_50 = arith.constant 0 : index
    %123 = vector.load %arg1[%c368, %c0_50] : memref<528x128xf32, #tpu.memory_space<vmem>>, vector<128x32xf32>
    %c16 = arith.constant 16 : index
    %c0_51 = arith.constant 0 : index
    %124 = vector.load %arg2[%c16, %c0_51] : memref<40x128xf32, #tpu.memory_space<vmem>>, vector<1x32xf32>
    %cst_52 = arith.constant dense<0.000000e+00> : vector<32xf32>
    %125 = vector.multi_reduction <add>, %112, %cst_52 [1] : vector<32x32xf32> to vector<32xf32>
    %126 = vector.shape_cast %125 : vector<32xf32> to vector<32x1xf32>
    %cst_53 = arith.constant 3.200000e+01 : f32
    %127 = vector.broadcast %cst_53 : f32 to vector<32x1xf32>
    %128 = arith.divf %126, %127 : vector<32x1xf32>
    %129 = vector.broadcast %128 : vector<32x1xf32> to vector<32x32xf32>
    %130 = arith.subf %112, %129 : vector<32x32xf32>
    %131 = arith.mulf %130, %130 : vector<32x32xf32>
    %cst_54 = arith.constant dense<0.000000e+00> : vector<32xf32>
    %132 = vector.multi_reduction <add>, %131, %cst_54 [1] : vector<32x32xf32> to vector<32xf32>
    %133 = vector.shape_cast %132 : vector<32xf32> to vector<32x1xf32>
    %cst_55 = arith.constant 3.200000e+01 : f32
    %134 = vector.broadcast %cst_55 : f32 to vector<32x1xf32>
    %135 = arith.divf %133, %134 : vector<32x1xf32>
    %136 = vector.broadcast %128 : vector<32x1xf32> to vector<32x32xf32>
    %137 = arith.subf %112, %136 : vector<32x32xf32>
    %cst_56 = arith.constant 9.99999974E-6 : f32
    %138 = vector.broadcast %cst_56 : f32 to vector<32x1xf32>
    %139 = arith.addf %135, %138 : vector<32x1xf32>
    %140 = math.rsqrt %139 : vector<32x1xf32>
    %141 = vector.broadcast %140 : vector<32x1xf32> to vector<32x32xf32>
    %142 = arith.mulf %137, %141 : vector<32x32xf32>
    %143 = vector.broadcast %113 : vector<1x32xf32> to vector<32x32xf32>
    %144 = arith.mulf %142, %143 : vector<32x32xf32>
    %145 = vector.broadcast %114 : vector<1x32xf32> to vector<32x32xf32>
    %146 = arith.addf %144, %145 : vector<32x32xf32>
    %cst_57 = arith.constant dense<0.000000e+00> : vector<32x96xf32>
    %147 = tpu.matmul %146, %115, %cst_57 {dimension_numbers = #tpu.dot_dimension_numbers<[1], [0], [0], [1], [0, 0, 1, 1], [], []>} : vector<32x32xf32>, vector<32x96xf32>, vector<32x96xf32> -> vector<32x96xf32>
    %148 = vector.broadcast %116 : vector<1x96xf32> to vector<32x96xf32>
    %149 = arith.addf %147, %148 : vector<32x96xf32>
    %150 = vector.shape_cast %149 : vector<32x96xf32> to vector<2x16x4x24xf32>
    %151 = tpu.transpose %150, [0, 2, 1, 3] : vector<2x16x4x24xf32> -> vector<2x4x16x24xf32>
    %152 = vector.shape_cast %151 : vector<2x4x16x24xf32> to vector<8x16x24xf32>
    %153 = vector.extract_strided_slice %152 {offsets = [0, 0, 0], sizes = [8, 16, 8], strides = [1, 1, 1]} : vector<8x16x24xf32> to vector<8x16x8xf32>
    %154 = vector.extract_strided_slice %152 {offsets = [0, 0, 8], sizes = [8, 16, 8], strides = [1, 1, 1]} : vector<8x16x24xf32> to vector<8x16x8xf32>
    %155 = vector.extract_strided_slice %152 {offsets = [0, 0, 16], sizes = [8, 16, 8], strides = [1, 1, 1]} : vector<8x16x24xf32> to vector<8x16x8xf32>
    "tpu.trace_start"() <{level = 10 : i32, message = "gqd,gkd->gqk"}> : () -> ()
    %cst_58 = arith.constant dense<0.000000e+00> : vector<8x16x16xf32>
    %156 = tpu.matmul %153, %154, %cst_58 {dimension_numbers = #tpu.dot_dimension_numbers<[2], [2], [1], [1], [0, 0, 0, 1, 1, 1], [0], [0]>} : vector<8x16x8xf32>, vector<8x16x8xf32>, vector<8x16x16xf32> -> vector<8x16x16xf32>
    "tpu.trace_stop"() : () -> ()
    %cst_59 = arith.constant dense<0xFF800000> : vector<8x16xf32>
    %157 = vector.multi_reduction <maximumf>, %156, %cst_59 [2] : vector<8x16x16xf32> to vector<8x16xf32>
    %158 = vector.shape_cast %157 : vector<8x16xf32> to vector<8x16x1xf32>
    %159 = vector.broadcast %158 : vector<8x16x1xf32> to vector<8x16x16xf32>
    %160 = arith.subf %156, %159 : vector<8x16x16xf32>
    %161 = math.exp %160 : vector<8x16x16xf32>
    %cst_60 = arith.constant dense<0.000000e+00> : vector<8x16xf32>
    %162 = vector.multi_reduction <add>, %161, %cst_60 [2] : vector<8x16x16xf32> to vector<8x16xf32>
    %163 = vector.shape_cast %162 : vector<8x16xf32> to vector<8x16x1xf32>
    %164 = tpu.reciprocal %163 {approx = true} : vector<8x16x1xf32> -> vector<8x16x1xf32>
    %165 = vector.broadcast %164 : vector<8x16x1xf32> to vector<8x16x16xf32>
    %166 = arith.mulf %161, %165 : vector<8x16x16xf32>
    "tpu.trace_start"() <{level = 10 : i32, message = "gqk,gkd->gqd"}> : () -> ()
    %cst_61 = arith.constant dense<0.000000e+00> : vector<8x16x8xf32>
    %167 = tpu.matmul %166, %155, %cst_61 {dimension_numbers = #tpu.dot_dimension_numbers<[2], [1], [1], [2], [0, 0, 0, 1, 1, 2], [0], [0]>} : vector<8x16x16xf32>, vector<8x16x8xf32>, vector<8x16x8xf32> -> vector<8x16x8xf32>
    "tpu.trace_stop"() : () -> ()
    %168 = vector.shape_cast %167 : vector<8x16x8xf32> to vector<2x4x16x8xf32>
    %169 = tpu.transpose %168, [0, 2, 1, 3] : vector<2x4x16x8xf32> -> vector<2x16x4x8xf32>
    %170 = vector.shape_cast %169 : vector<2x16x4x8xf32> to vector<32x32xf32>
    %cst_62 = arith.constant dense<0.000000e+00> : vector<32x32xf32>
    %171 = tpu.matmul %170, %117, %cst_62 {dimension_numbers = #tpu.dot_dimension_numbers<[1], [0], [0], [1], [0, 0, 1, 1], [], []>} : vector<32x32xf32>, vector<32x32xf32>, vector<32x32xf32> -> vector<32x32xf32>
    %172 = arith.addf %112, %171 : vector<32x32xf32>
    %173 = vector.broadcast %118 : vector<1x32xf32> to vector<32x32xf32>
    %174 = arith.addf %172, %173 : vector<32x32xf32>
    %cst_63 = arith.constant dense<0.000000e+00> : vector<32xf32>
    %175 = vector.multi_reduction <add>, %174, %cst_63 [1] : vector<32x32xf32> to vector<32xf32>
    %176 = vector.shape_cast %175 : vector<32xf32> to vector<32x1xf32>
    %cst_64 = arith.constant 3.200000e+01 : f32
    %177 = vector.broadcast %cst_64 : f32 to vector<32x1xf32>
    %178 = arith.divf %176, %177 : vector<32x1xf32>
    %179 = vector.broadcast %178 : vector<32x1xf32> to vector<32x32xf32>
    %180 = arith.subf %174, %179 : vector<32x32xf32>
    %181 = arith.mulf %180, %180 : vector<32x32xf32>
    %cst_65 = arith.constant dense<0.000000e+00> : vector<32xf32>
    %182 = vector.multi_reduction <add>, %181, %cst_65 [1] : vector<32x32xf32> to vector<32xf32>
    %183 = vector.shape_cast %182 : vector<32xf32> to vector<32x1xf32>
    %cst_66 = arith.constant 3.200000e+01 : f32
    %184 = vector.broadcast %cst_66 : f32 to vector<32x1xf32>
    %185 = arith.divf %183, %184 : vector<32x1xf32>
    %186 = vector.broadcast %178 : vector<32x1xf32> to vector<32x32xf32>
    %187 = arith.subf %174, %186 : vector<32x32xf32>
    %cst_67 = arith.constant 9.99999974E-6 : f32
    %188 = vector.broadcast %cst_67 : f32 to vector<32x1xf32>
    %189 = arith.addf %185, %188 : vector<32x1xf32>
    %190 = math.rsqrt %189 : vector<32x1xf32>
    %191 = vector.broadcast %190 : vector<32x1xf32> to vector<32x32xf32>
    %192 = arith.mulf %187, %191 : vector<32x32xf32>
    %193 = vector.broadcast %119 : vector<1x32xf32> to vector<32x32xf32>
    %194 = arith.mulf %192, %193 : vector<32x32xf32>
    %195 = vector.broadcast %120 : vector<1x32xf32> to vector<32x32xf32>
    %196 = arith.addf %194, %195 : vector<32x32xf32>
    %cst_68 = arith.constant dense<0.000000e+00> : vector<32x128xf32>
    %197 = tpu.matmul %196, %121, %cst_68 {dimension_numbers = #tpu.dot_dimension_numbers<[1], [0], [0], [1], [0, 0, 1, 1], [], []>} : vector<32x32xf32>, vector<32x128xf32>, vector<32x128xf32> -> vector<32x128xf32>
    %198 = vector.broadcast %122 : vector<1x128xf32> to vector<32x128xf32>
    %199 = arith.addf %197, %198 : vector<32x128xf32>
    %200 = arith.mulf %199, %199 : vector<32x128xf32>
    %201 = arith.mulf %199, %200 : vector<32x128xf32>
    %cst_69 = arith.constant 4.471500e-02 : f32
    %202 = vector.broadcast %cst_69 : f32 to vector<32x128xf32>
    %203 = arith.mulf %202, %201 : vector<32x128xf32>
    %204 = arith.addf %199, %203 : vector<32x128xf32>
    %cst_70 = arith.constant 0.797884583 : f32
    %205 = vector.broadcast %cst_70 : f32 to vector<32x128xf32>
    %206 = arith.mulf %205, %204 : vector<32x128xf32>
    %207 = math.tanh %206 : vector<32x128xf32>
    %cst_71 = arith.constant 1.000000e+00 : f32
    %208 = vector.broadcast %cst_71 : f32 to vector<32x128xf32>
    %209 = arith.addf %208, %207 : vector<32x128xf32>
    %cst_72 = arith.constant 5.000000e-01 : f32
    %210 = vector.broadcast %cst_72 : f32 to vector<32x128xf32>
    %211 = arith.mulf %210, %209 : vector<32x128xf32>
    %212 = arith.mulf %199, %211 : vector<32x128xf32>
    %cst_73 = arith.constant dense<0.000000e+00> : vector<32x32xf32>
    %213 = tpu.matmul %212, %123, %cst_73 {dimension_numbers = #tpu.dot_dimension_numbers<[1], [0], [0], [1], [0, 0, 1, 1], [], []>} : vector<32x128xf32>, vector<128x32xf32>, vector<32x32xf32> -> vector<32x32xf32>
    %214 = arith.addf %174, %213 : vector<32x32xf32>
    %215 = vector.broadcast %124 : vector<1x32xf32> to vector<32x32xf32>
    %216 = arith.addf %214, %215 : vector<32x32xf32>
    %c17 = arith.constant 17 : index
    %c0_74 = arith.constant 0 : index
    %217 = vector.load %arg2[%c17, %c0_74] : memref<40x128xf32, #tpu.memory_space<vmem>>, vector<1x32xf32>
    %c18 = arith.constant 18 : index
    %c0_75 = arith.constant 0 : index
    %218 = vector.load %arg2[%c18, %c0_75] : memref<40x128xf32, #tpu.memory_space<vmem>>, vector<1x32xf32>
    %cst_76 = arith.constant dense<0.000000e+00> : vector<32xf32>
    %219 = vector.multi_reduction <add>, %216, %cst_76 [1] : vector<32x32xf32> to vector<32xf32>
    %220 = vector.shape_cast %219 : vector<32xf32> to vector<32x1xf32>
    %cst_77 = arith.constant 3.200000e+01 : f32
    %221 = vector.broadcast %cst_77 : f32 to vector<32x1xf32>
    %222 = arith.divf %220, %221 : vector<32x1xf32>
    %223 = vector.broadcast %222 : vector<32x1xf32> to vector<32x32xf32>
    %224 = arith.subf %216, %223 : vector<32x32xf32>
    %225 = arith.mulf %224, %224 : vector<32x32xf32>
    %cst_78 = arith.constant dense<0.000000e+00> : vector<32xf32>
    %226 = vector.multi_reduction <add>, %225, %cst_78 [1] : vector<32x32xf32> to vector<32xf32>
    %227 = vector.shape_cast %226 : vector<32xf32> to vector<32x1xf32>
    %cst_79 = arith.constant 3.200000e+01 : f32
    %228 = vector.broadcast %cst_79 : f32 to vector<32x1xf32>
    %229 = arith.divf %227, %228 : vector<32x1xf32>
    %230 = vector.broadcast %222 : vector<32x1xf32> to vector<32x32xf32>
    %231 = arith.subf %216, %230 : vector<32x32xf32>
    %cst_80 = arith.constant 9.99999974E-6 : f32
    %232 = vector.broadcast %cst_80 : f32 to vector<32x1xf32>
    %233 = arith.addf %229, %232 : vector<32x1xf32>
    %234 = math.rsqrt %233 : vector<32x1xf32>
    %235 = vector.broadcast %234 : vector<32x1xf32> to vector<32x32xf32>
    %236 = arith.mulf %231, %235 : vector<32x32xf32>
    %237 = vector.broadcast %217 : vector<1x32xf32> to vector<32x32xf32>
    %238 = arith.mulf %236, %237 : vector<32x32xf32>
    %239 = vector.broadcast %218 : vector<1x32xf32> to vector<32x32xf32>
    %240 = arith.addf %238, %239 : vector<32x32xf32>
    %241 = vector.shape_cast %240 : vector<32x32xf32> to vector<2x16x32xf32>
    %cst_81 = arith.constant dense<0.000000e+00> : vector<2x32xf32>
    %242 = vector.multi_reduction <add>, %241, %cst_81 [1] : vector<2x16x32xf32> to vector<2x32xf32>
    %cst_82 = arith.constant 1.600000e+01 : f32
    %243 = vector.broadcast %cst_82 : f32 to vector<2x32xf32>
    %244 = arith.divf %242, %243 : vector<2x32xf32>
    %c496 = arith.constant 496 : index
    %c0_83 = arith.constant 0 : index
    %245 = vector.load %arg1[%c496, %c0_83] : memref<528x128xf32, #tpu.memory_space<vmem>>, vector<32x128xf32>
    %c19 = arith.constant 19 : index
    %c0_84 = arith.constant 0 : index
    %246 = vector.load %arg2[%c19, %c0_84] : memref<40x128xf32, #tpu.memory_space<vmem>>, vector<1x128xf32>
    %cst_85 = arith.constant dense<0.000000e+00> : vector<2x128xf32>
    %247 = tpu.matmul %244, %245, %cst_85 {dimension_numbers = #tpu.dot_dimension_numbers<[1], [0], [0], [1], [0, 0, 1, 1], [], []>} : vector<2x32xf32>, vector<32x128xf32>, vector<2x128xf32> -> vector<2x128xf32>
    %248 = vector.broadcast %246 : vector<1x128xf32> to vector<2x128xf32>
    %249 = arith.addf %247, %248 : vector<2x128xf32>
    %c0_86 = arith.constant 0 : index
    %c0_87 = arith.constant 0 : index
    %250 = vector.load %arg3[%c0_86, %c0_87] : memref<2x128xf32, #tpu.memory_space<vmem>>, vector<2x128xf32>
    tpu.vector_store %arg3[%c0_86, %c0_87], %249 {strides = array<i32>} : memref<2x128xf32, #tpu.memory_space<vmem>>, vector<2x128xf32>,
    return
  }
}

</mosaic_0001>

<bundles_post_ra>
// kernel: new_model_forward.1
= control target key start
LH: loop header
LB: loop body
LE: loop exit
PB: predicated region body
PF: predicated region fallthrough
CT: control target
= control target key end

     0   :  { %vm30_vm0 = vcmask 392192   ;;  %s10165_s0 = inlined_call_operand.vmem [shape: f32[32,48], index: 0, kind: input, shape index: {}]   ;;  %s10166_s1 = inlined_call_operand.vmem [shape: f32[528,128], index: 1, kind: input, shape index: {}]   ;;  %s10167_s2 = inlined_call_operand.vmem [shape: f32[40,128], index: 2, kind: input, shape index: {}]   ;;  %s10168_s3 = inlined_call_operand.hbm [shape: f32[2,128], index: 3, kind: output, shape index: {}]  }
   0x1   :  { %v15_v0 = vld [vmem:[%s10166_s1] sm:$0xff]  ;;  %v16_v1 = vld [vmem:[%s10166_s1 + $0x8] sm:$0xff]  ;;  %v17_v2 = vld [vmem:[%s10166_s1 + $0x10] sm:$0xff] }
   0x2   :  { %v7927_v3 = vpack.c.bf16 %v16_v1, %v15_v0  ;;  %v18_v4 = vld [vmem:[%s10166_s1 + $0x18] sm:$0xff]  ;;  %v19_v6 = vld [vmem:[%s10166_s1 + $0x20] sm:$0xff]  ;;  %v20_v7 = vld [vmem:[%s10166_s1 + $0x28] sm:$0xff] }
   0x3   :  { %v7931_v5 = vpack.c.bf16 %v18_v4, %v17_v2  ;;  %v22_v8 = vld [vmem:[%s10165_s0] sm:$0xff] }
   0x4   :  { %7928 = vmatprep.subr.bf16.mxu0 %v7927_v3  ;;  %7526 = vmatprep.mubr.msk.f32.mxu0 %vm30_vm0, %v22_v8 }
   0x5   :  { %8 = vsyncpa [#allocation3], 0  ;;  %7930 = vmatpush3.bf16.msra.mxu0 %v7927_v3  ;;  %v7935_v9 = vpack.c.bf16 %v20_v7, %v19_v6  ;;  %v23_v10 = vld [vmem:[%s10165_s0 + $0x8] sm:$0xff]  ;;  %v24_v11 = vld [vmem:[%s10165_s0 + $0x10] sm:$0xff]  ;;  %vm170_vm1 = vcmask 261120   ;;  %s8599_s24 = smov 104  }
   0x6   :  { %7932 = vmatprep.subr.bf16.mxu0 %v7931_v5  ;;  %v25_v12 = vld [vmem:[%s10165_s0 + $0x18] sm:$0xff]  ;;  %v7106_v13 = vld [vmem:[%s10167_s2] ss:$0 sm:$0xff]  ;;  %v136_v52 = vld [vmem:[%s10166_s1 + $0x30] sm:$0xff]  ;;  %s8600_s25 = smov 80   ;;  %s8601_s26 = smov 56  }
   0x7   :  { %v128_v16 = vld [vmem:[%s10167_s2 + $0x18] sm:$0xff]  ;;  %v129_v19 = vld [vmem:[%s10167_s2 + $0x20] sm:$0xff]  ;;  %v139_v56 = vld [vmem:[%s10166_s1 + $0x48] sm:$0xff]  ;;  %vm931_vm2 = vcmask 64512   ;;  %s8604_s27 = smov 120   ;;  %vm1638_vm4 = vcmask 130048  }
   0x8   :  { %v137_v53 = vld [vmem:[%s10166_s1 + $0x38] sm:$0xff]  ;;  %v138_v55 = vld [vmem:[%s10166_s1 + $0x40] sm:$0xff]  ;;  %vm8930_vm3 = vmpackc.low %vm931_vm2, %vm931_vm2  ;;  %s8605_s28 = smov 112   ;;  %s8606_s10 = smov 8   ;;  %vm3111_vm5 = vcmask 195584   ;;  %vm8610_vm6 = vmmov 0  }
   0x9   :  { %7934 = vmatpush3.bf16.msra.mxu0 %v7931_v5  ;;  %v7939_v54 = vpack.c.bf16 %v137_v53, %v136_v52  ;;  %v7943_v57 = vpack.c.bf16 %v139_v56, %v138_v55  ;;  %v7111_v7 = vld [vmem:[%s10167_s2 + $0x1] ss:$0 sm:$0xff]  ;;  %s8607_s0 = smov 16   ;;  %s8608_s11 = smov 24   ;;  %vm7017_vm7 = vcmask 1041409  }
   0xa   :  { %7936 = vmatprep.subr.bf16.mxu0 %v7935_v9  ;;  %s8612_s23 = smov [#allocation2]  }
   0xb   :  { %s7098_s29 = sshll.u32 %s8612_s23, 4  ;;  %s7099_s29 = int_to_ptr.vmem [resolvable:$true] %s7098_s29 }
   0xc   :  { %s8575_s30 = scalar_lea.vmem %s7099_s29, 32  ;;  %p8580_p1 = scmp.lt.s32.totalorder %s7099_s29, %s7099_s29 }
   0xd   :  { %7938 = vmatpush3.bf16.msra.mxu0 %v7935_v9  ;;  %v7112_v9 = vld [vmem:[%s10167_s2 + $0x2] ss:$0 sm:$0xff]  ;;  %p8576_p0 = scmp.ne.s32.totalorder %s7099_s29, %s8575_s30  ;;  %p8581_p2 = scmp.lt.s32.totalorder %s8575_s30, %s8575_s30 }
   0xe   :  { %7940 = vmatprep.subr.bf16.mxu0 %v7939_v54 }
   0xf   :  { %p8582_p3 = por %p8581_p2, %p8580_p1 }
  0x10   :  { %7527 = vmatmul.mubr.msk.f32.vlgmr.msra.gmra.mrb[0].mxu0 %vm30_vm0, %v23_v10 }
  0x11   :  { %7529 = vmatprep.mubr.msk.f32.mxu0 %vm30_vm0, %v24_v11  ;;  %7942 = vmatpush3.bf16.msra.mxu0 %v7939_v54  ;;  %p8583_p4 = pnand %p8582_p3, %p8576_p0 }
  0x12   :  { %7944 = vmatprep.subr.bf16.mxu0 %v7943_v57 }
  0x14   :  { %7530 = vmatmul.mubr.msk.f32.gmra.mrb[2].mxu0 %vm30_vm0, %v25_v12 }
  0x15   :  { %7946 = vmatpush3.bf16.msra.mxu0 %v7943_v57 }
  0xe3   :  { %v7528_v14 = vpop.f32.mrb[0].mxu0 }
  0xe4   :  { %v109_v15 = vpop.f32.mrb[1].mxu0  ;;  %v115_v17 = vadd.f32 %v7528_v14, %v7106_v13 }
  0xe5   :  { %v110_v18 = vadd.f32 %v7106_v13, %v109_v15 }
  0xe6   :  { %v8678_v24 = vadd.f32 %v129_v19, %v115_v17 }
  0xe7   :  { %v8676_v20 = vadd.f32 %v128_v16, %v110_v18  ;;  %v7531_v21 = vpop.f32.mrb[2].mxu0 }
  0xe8   :  { %v125_v22 = vadd.f32 %v7531_v21, %v7106_v13  ;;  %v119_v23 = vpop.f32.mrb[3].mxu0  ;;  %v174_v30 = vsel %vm170_vm1, %v8678_v24, 0.0 }
  0xe9   :  { %v120_v25 = vadd.f32 %v7106_v13, %v119_v23  ;;  %v171_v26 = vsel %vm170_vm1, %v8676_v20, 0.0 }
  0xea   :  { %172 = vadd.xlane.f32.xlu0 %v171_v26  ;;  %v8682_v27 = vadd.f32 %v129_v19, %v125_v22  ;;  %v7113_v26 = vld [vmem:[%s10167_s2 + $0x3] ss:$0 sm:$0xff] }
  0xeb   :  { %v8684_v28 = vadd.f32 %v128_v16, %v120_v25 }
  0xec   :  { %v180_v31 = vsel %vm170_vm1, %v8682_v27, 0.0 }
  0xed   :  { %v177_v29 = vsel %vm170_vm1, %v8684_v28, 0.0 }
  0xee   :  { %178 = vadd.xlane.f32.xlu1 %v177_v29  ;;  %175 = vadd.xlane.f32.xlu0 %v174_v30 }
  0xf2   :  { %181 = vadd.xlane.f32.xlu1 %v180_v31 }
 0x177   :  { %v173_v32 = vpop.xlane.xlu0 %172 }
 0x178   :  { %v184_v33 = vmul.f32 0.03125, %v173_v32 }
 0x17a   :  { %v188_v34 = vsub.f32 %v8676_v20, %v184_v33 }
 0x17b   :  { %v179_v35 = vpop.xlane.xlu1 %178  ;;  %v176_v36 = vpop.xlane.xlu0 %175 }
 0x17c   :  { %v186_v37 = vmul.f32 0.03125, %v179_v35  ;;  %v185_v38 = vmul.f32 0.03125, %v176_v36  ;;  %v192_v39 = vmul.f32 %v188_v34, %v188_v34 }
 0x17e   :  { %v190_v40 = vsub.f32 %v8684_v28, %v186_v37  ;;  %v189_v41 = vsub.f32 %v8678_v24, %v185_v38  ;;  %v196_v42 = vsel %vm170_vm1, %v192_v39, 0.0  ;;  %v8602_v37 = vmov 1983009808  }
 0x17f   :  { %v182_v43 = vpop.xlane.xlu1 %181  ;;  %197 = vadd.xlane.f32.xlu0 %v196_v42  ;;  %v384_v38 = vunpack.c.l.s4 %v8602_v37  ;;  %v386_v39 = vlaneseq  ;;  %v8603_v42 = vmov 1934713408  }
 0x180   :  { %v187_v44 = vmul.f32 0.03125, %v182_v43  ;;  %v194_v45 = vmul.f32 %v190_v40, %v190_v40  ;;  %v193_v46 = vmul.f32 %v189_v41, %v189_v41  ;;  %v416_v43 = vunpack.c.l.s4 %v8603_v42 }
 0x182   :  { %v191_v47 = vsub.f32 %v8682_v27, %v187_v44  ;;  %v202_v48 = vsel %vm170_vm1, %v194_v45, 0.0  ;;  %v199_v49 = vsel %vm170_vm1, %v193_v46, 0.0  ;;  %v385_v44 = vunpack.c.0.s8 %v384_v38 }
 0x183   :  { %203 = vadd.xlane.f32.xlu0 %v202_v48  ;;  %200 = vadd.xlane.f32.xlu1 %v199_v49  ;;  %v387_v45 = vshrl.u32 %v386_v39, 7  ;;  %v417_v48 = vunpack.c.0.s8 %v416_v43 }
 0x184   :  { %v195_v50 = vmul.f32 %v191_v47, %v191_v47 }
 0x185   :  { %v8742_v49 = vsub.s32 %v385_v44, %v387_v45 }
 0x186   :  { %v205_v51 = vsel %vm170_vm1, %v195_v50, 0.0 }
 0x187   :  { %206 = vadd.xlane.f32.xlu1 %v205_v51 }
 0x20c   :  { %v198_v58 = vpop.xlane.xlu0 %197 }
 0x20d   :  { %v208_v59 = vmul.f32 0.03125, %v198_v58  ;;  %v8744_v58 = vsub.s32 %v417_v48, %v387_v45 }
 0x20f   :  { %v212_v60 = vadd.f32 1e-05, %v208_v59 }
 0x210   :  { %v201_v61 = vpop.xlane.xlu1 %200  ;;  %v204_v62 = vpop.xlane.xlu0 %203 }
 0x211   :  { %8391 = vrsqrt.f32 %v212_v60  ;;  %v209_v63 = vmul.f32 0.03125, %v201_v61  ;;  %v210_v0 = vmul.f32 0.03125, %v204_v62 }
 0x213   :  { %v213_v1 = vadd.f32 1e-05, %v209_v63  ;;  %v214_v2 = vadd.f32 1e-05, %v210_v0 }
 0x214   :  { %v207_v3 = vpop.xlane.xlu1 %206 }
 0x215   :  { %8393 = vrsqrt.f32 %v213_v1  ;;  %v211_v4 = vmul.f32 0.03125, %v207_v3 }
 0x216   :  { %8395 = vrsqrt.f32 %v214_v2 }
 0x217   :  { %v215_v5 = vadd.f32 1e-05, %v211_v4 }
 0x219   :  { %8397 = vrsqrt.f32 %v215_v5 }
 0x21b   :  { %v8392_v6 = vpop.eup %8391 }
 0x21c   :  { %v220_v8 = vmul.f32 %v8392_v6, %v188_v34 }
 0x21e   :  { %v228_v10 = vmul.f32 %v7111_v7, %v220_v8 }
 0x21f   :  { %v8394_v11 = vpop.eup %8393 }
 0x220   :  { %v8396_v12 = vpop.eup %8395  ;;  %v221_v13 = vmul.f32 %v8394_v11, %v189_v41  ;;  %v236_v14 = vadd.f32 %v7112_v9, %v228_v10 }
 0x221   :  { %v222_v15 = vmul.f32 %v8396_v12, %v190_v40 }
 0x222   :  { %v229_v16 = vmul.f32 %v7111_v7, %v221_v13  ;;  %7540 = vmatprep.mubr.msk.f32.mxu0 %vm170_vm1, %v236_v14 }
 0x223   :  { %v8398_v17 = vpop.eup %8397  ;;  %v230_v18 = vmul.f32 %v7111_v7, %v222_v15 }
 0x224   :  { %v237_v19 = vadd.f32 %v7112_v9, %v229_v16  ;;  %v223_v21 = vmul.f32 %v8398_v17, %v191_v47 }
 0x225   :  { %v238_v22 = vadd.f32 %v7112_v9, %v230_v18 }
 0x226   :  { %7541 = vmatmul.mubr.msk.f32.vlgmr.msra.gmra.mrb[4].mxu0 %vm170_vm1, %v237_v19  ;;  %v231_v23 = vmul.f32 %v7111_v7, %v223_v21 }
 0x227   :  { %7543 = vmatprep.mubr.msk.f32.mxu0 %vm170_vm1, %v238_v22 }
 0x228   :  { %v239_v25 = vadd.f32 %v7112_v9, %v231_v23 }
 0x22a   :  { %7544 = vmatmul.mubr.msk.f32.gmra.mrb[6].mxu0 %vm170_vm1, %v239_v25 }
 0x2f9   :  { %v7542_v29 = vpop.f32.mrb[4].mxu0 }
 0x2fa   :  { %v328_v30 = vadd.f32 %v7542_v29, %v7113_v26  ;;  %v322_v31 = vpop.f32.mrb[5].mxu0 }
 0x2fb   :  { %v323_v32 = vadd.f32 %v7113_v26, %v322_v31 }
 0x2fc   :  { %347 = vrot.lane.b32.xlu1 %v328_v30, %s8599_s24 }
 0x2fd   :  { %345 = vrot.lane.b32.xlu0 %v323_v32, %s8599_s24  ;;  %v7545_v33 = vpop.f32.mrb[6].mxu0 }
 0x2fe   :  { %v332_v34 = vpop.f32.mrb[7].mxu0  ;;  %v8733_v36 = vadd.f32 %v7545_v33, %v7113_v26 }
 0x2ff   :  { %v333_v35 = vadd.f32 %v7113_v26, %v332_v34 }
 0x300   :  { %359 = vrot.lane.b32.xlu1 %v328_v30, %s8600_s25 }
 0x301   :  { %369 = vrot.lane.b32.xlu0 %v323_v32, %s8601_s26 }
 0x304   :  { %357 = vrot.lane.b32.xlu1 %v323_v32, %s8600_s25 }
 0x305   :  { %349 = vrot.lane.b32.xlu0 %v333_v35, %s8599_s24 }
 0x308   :  { %371 = vrot.lane.b32.xlu1 %v328_v30, %s8601_s26 }
 0x309   :  { %361 = vrot.lane.b32.xlu0 %v333_v35, %s8600_s25 }
 0x30c   :  { %351 = vrot.lane.b32.xlu1 %v8733_v36, %s8599_s24 }
 0x30d   :  { %373 = vrot.lane.b32.xlu0 %v333_v35, %s8601_s26 }
 0x310   :  { %363 = vrot.lane.b32.xlu1 %v8733_v36, %s8600_s25 }
 0x314   :  { %375 = vrot.lane.b32.xlu1 %v8733_v36, %s8601_s26 }
 0x36e   :  { %v348_v40 = vpop.permute.xlu1 %347 }
 0x36f   :  { %v346_v41 = vpop.permute.xlu0 %345 }
 0x372   :  { %v360_v46 = vpop.permute.xlu1 %359 }
 0x373   :  { %v370_v47 = vpop.permute.xlu0 %369  ;;  %v449_v52 = vcombine.low %v328_v30, %v360_v46  ;;  %v450_v53 = vcombine.high %v328_v30, %v360_v46 }
 0x374   :  { %v397_v50 = vcombine.low %v346_v41, %v370_v47  ;;  %v398_v51 = vcombine.high %v346_v41, %v370_v47 }
 0x375   :  { %v457_v63 = vrot.slane %v449_v52, %v8742_v49  ;;  %v464_v0 = vrot.slane %v450_v53, %v8742_v49 }
 0x376   :  { %v358_v54 = vpop.permute.xlu1 %357  ;;  %v405_v59 = vrot.slane %v397_v50, %v8742_v49  ;;  %v412_v60 = vrot.slane %v398_v51, %v8742_v49 }
 0x377   :  { %v381_v55 = vcombine.low %v323_v32, %v358_v54  ;;  %v382_v56 = vcombine.high %v323_v32, %v358_v54  ;;  %v350_v57 = vpop.permute.xlu0 %349 }
 0x379   :  { %v389_v61 = vrot.slane %v381_v55, %v8742_v49  ;;  %v396_v62 = vrot.slane %v382_v56, %v8742_v49 }
 0x37a   :  { %v372_v1 = vpop.permute.xlu1 %371 }
 0x37b   :  { %v413_v2 = vcombine.low %v389_v61, %v405_v59  ;;  %v414_v3 = vcombine.high %v389_v61, %v405_v59  ;;  %v429_v4 = vcombine.low %v396_v62, %v412_v60  ;;  %v430_v5 = vcombine.high %v396_v62, %v412_v60  ;;  %v362_v6 = vpop.permute.xlu0 %361 }
 0x37c   :  { %v465_v7 = vcombine.low %v348_v40, %v372_v1  ;;  %v466_v8 = vcombine.high %v348_v40, %v372_v1  ;;  %v517_v9 = vcombine.low %v333_v35, %v362_v6  ;;  %v518_v10 = vcombine.high %v333_v35, %v362_v6 }
 0x37d   :  { %v421_v11 = vrot.slane %v413_v2, %v8744_v58  ;;  %v428_v12 = vrot.slane %v414_v3, %v8744_v58  ;;  %v437_v13 = vrot.slane %v429_v4, %v8744_v58  ;;  %v444_v14 = vrot.slane %v430_v5, %v8744_v58 }
 0x37e   :  { %v473_v15 = vrot.slane %v465_v7, %v8742_v49  ;;  %v480_v16 = vrot.slane %v466_v8, %v8742_v49  ;;  %v525_v17 = vrot.slane %v517_v9, %v8742_v49  ;;  %v532_v18 = vrot.slane %v518_v10, %v8742_v49  ;;  %v352_v19 = vpop.permute.xlu1 %351 }
 0x37f   :  { %v653_v21 = vcombine.low %v421_v11, %v428_v12  ;;  %v7118_v22 = vcombine.high %v421_v11, %v428_v12  ;;  %v669_v23 = vcombine.low %v437_v13, %v444_v14  ;;  %v7119_v25 = vcombine.high %v437_v13, %v444_v14  ;;  %v374_v26 = vpop.permute.xlu0 %373 }
 0x380   :  { %v481_v29 = vcombine.low %v457_v63, %v473_v15  ;;  %v482_v30 = vcombine.high %v457_v63, %v473_v15  ;;  %v497_v31 = vcombine.low %v464_v0, %v480_v16  ;;  %v498_v32 = vcombine.high %v464_v0, %v480_v16 }
 0x381   :  { %v533_v33 = vcombine.low %v350_v57, %v374_v26  ;;  %v534_v34 = vcombine.high %v350_v57, %v374_v26  ;;  %v8761_v35 = vrot.slane %v653_v21, %v8742_v49  ;;  %v8764_v37 = vrot.slane %v7118_v22, %v8742_v49 }
 0x382   :  { %v489_v38 = vrot.slane %v481_v29, %v8744_v58  ;;  %v496_v39 = vrot.slane %v482_v30, %v8744_v58  ;;  %v505_v40 = vrot.slane %v497_v31, %v8744_v58  ;;  %v512_v41 = vrot.slane %v498_v32, %v8744_v58  ;;  %v364_v42 = vpop.permute.xlu1 %363 }
 0x383   :  { %v541_v43 = vrot.slane %v533_v33, %v8742_v49  ;;  %v548_v44 = vrot.slane %v534_v34, %v8742_v49  ;;  %v585_v45 = vcombine.low %v8733_v36, %v364_v42  ;;  %v586_v46 = vcombine.high %v8733_v36, %v364_v42 }
 0x384   :  { %v721_v47 = vcombine.low %v489_v38, %v496_v39  ;;  %v7120_v48 = vcombine.high %v489_v38, %v496_v39  ;;  %v737_v50 = vcombine.low %v505_v40, %v512_v41  ;;  %v7121_v51 = vcombine.high %v505_v40, %v512_v41 }
 0x385   :  { %v549_v52 = vcombine.low %v525_v17, %v541_v43  ;;  %v550_v53 = vcombine.high %v525_v17, %v541_v43  ;;  %v565_v54 = vcombine.low %v532_v18, %v548_v44  ;;  %v566_v55 = vcombine.high %v532_v18, %v548_v44 }
 0x386   :  { %v8775_v56 = vrot.slane %v721_v47, %v8742_v49  ;;  %v8778_v57 = vrot.slane %v7120_v48, %v8742_v49  ;;  %v8781_v59 = vrot.slane %v737_v50, %v8742_v49  ;;  %v8784_v60 = vrot.slane %v7121_v51, %v8742_v49  ;;  %v376_v36 = vpop.permute.xlu1 %375 }
 0x387   :  { %v557_v61 = vrot.slane %v549_v52, %v8744_v58  ;;  %v564_v62 = vrot.slane %v550_v53, %v8744_v58  ;;  %v573_v63 = vrot.slane %v565_v54, %v8744_v58  ;;  %v580_v0 = vrot.slane %v566_v55, %v8744_v58 }
 0x388   :  { %v593_v1 = vrot.slane %v585_v45, %v8742_v49  ;;  %v600_v2 = vrot.slane %v586_v46, %v8742_v49  ;;  %v601_v3 = vcombine.low %v352_v19, %v376_v36  ;;  %v602_v4 = vcombine.high %v352_v19, %v376_v36 }
 0x389   :  { %v789_v5 = vcombine.low %v557_v61, %v564_v62  ;;  %v7122_v6 = vcombine.high %v557_v61, %v564_v62  ;;  %v805_v7 = vcombine.low %v573_v63, %v580_v0  ;;  %v7123_v8 = vcombine.high %v573_v63, %v580_v0 }
 0x38a   :  { %v609_v9 = vrot.slane %v601_v3, %v8742_v49  ;;  %v616_v10 = vrot.slane %v602_v4, %v8742_v49  ;;  %v676_v11 = vrot.slane %v669_v23, %v8742_v49  ;;  %v684_v12 = vrot.slane %v7119_v25, %v8742_v49 }
 0x38b   :  { %v8797_v13 = vrot.slane %v789_v5, %v8742_v49  ;;  %v8800_v14 = vrot.slane %v7122_v6, %v8742_v49  ;;  %v8803_v15 = vrot.slane %v805_v7, %v8742_v49  ;;  %v8806_v16 = vrot.slane %v7123_v8, %v8742_v49 }
 0x38c   :  { %v617_v17 = vcombine.low %v593_v1, %v609_v9  ;;  %v618_v18 = vcombine.high %v593_v1, %v609_v9  ;;  %v633_v19 = vcombine.low %v600_v2, %v616_v10  ;;  %v634_v21 = vcombine.high %v600_v2, %v616_v10 }
 0x38d   :  { %v685_v22 = vcombine.low %v8761_v35, %v8764_v37  ;;  %v686_v23 = vcombine.high %v8761_v35, %v8764_v37  ;;  %v701_v25 = vcombine.low %v676_v11, %v684_v12  ;;  %v702_v26 = vcombine.high %v676_v11, %v684_v12 }
 0x38e   :  { %v625_v29 = vrot.slane %v617_v17, %v8744_v58  ;;  %v632_v30 = vrot.slane %v618_v18, %v8744_v58  ;;  %v641_v31 = vrot.slane %v633_v19, %v8744_v58  ;;  %v648_v32 = vrot.slane %v634_v21, %v8744_v58 }
 0x38f   :  { %v693_v33 = vrot.slane %v685_v22, %v8744_v58  ;;  %v709_v34 = vrot.slane %v701_v25, %v8744_v58  ;;  %v753_v38 = vcombine.low %v8775_v56, %v8778_v57  ;;  %v769_v35 = vcombine.low %v8781_v59, %v8784_v60 }
 0x390   :  { %v857_v37 = vcombine.low %v625_v29, %v632_v30  ;;  %v7124_v39 = vcombine.high %v625_v29, %v632_v30  ;;  %v873_v40 = vcombine.low %v641_v31, %v648_v32  ;;  %v7125_v41 = vcombine.high %v641_v31, %v648_v32 }
 0x391   :  { %v717_v42 = vcombine.low %v693_v33, %v709_v34  ;;  %v718_v43 = vcombine.high %v693_v33, %v709_v34  ;;  %v761_v44 = vrot.slane %v753_v38, %v8744_v58  ;;  %v777_v45 = vrot.slane %v769_v35, %v8744_v58 }
 0x392   :  { %v864_v46 = vrot.slane %v857_v37, %v8742_v49  ;;  %v872_v47 = vrot.slane %v7124_v39, %v8742_v49  ;;  %v880_v48 = vrot.slane %v873_v40, %v8742_v49  ;;  %v888_v50 = vrot.slane %v7125_v41, %v8742_v49 }
 0x393   :  { %7550 = vmatprep.mubr.msk.f32.mxu1 %vm931_vm2, %v717_v42  ;;  %7557 = vmatprep.mubr.msk.f32.mxu0 %vm931_vm2, %v718_v43  ;;  %v8830_v51 = vcombine.high %v761_v44, %v777_v45  ;;  %v8832_v52 = vcombine.low %v761_v44, %v777_v45  ;;  %v700_v53 = vrot.slane %v686_v23, %v8744_v58 }
 0x394   :  { %v716_v54 = vrot.slane %v702_v26, %v8744_v58  ;;  %v754_v55 = vcombine.high %v8775_v56, %v8778_v57  ;;  %v770_v36 = vcombine.high %v8781_v59, %v8784_v60  ;;  %v821_v61 = vcombine.low %v8797_v13, %v8800_v14 }
 0x395   :  { %v8843_v62 = vpack.i.bf16 %v8830_v51, %v718_v43  ;;  %v8846_v63 = vpack.i.bf16 %v8832_v52, %v717_v42  ;;  %v837_v0 = vcombine.low %v8803_v15, %v8806_v16  ;;  %v889_v1 = vcombine.low %v864_v46, %v872_v47 }
 0x396   :  { %v8850_v2 = vcombine.high %v700_v53, %v716_v54  ;;  %v768_v56 = vrot.slane %v754_v55, %v8744_v58  ;;  %v784_v57 = vrot.slane %v770_v36, %v8744_v58  ;;  %v8854_v59 = vcombine.low %v700_v53, %v716_v54 }
 0x397   :  { %8237 = vrot.lane.b32.xlu1 %v8843_v62, %s8604_s27  ;;  %8232 = vrot.lane.b32.xlu0 %v8846_v63, %s8604_s27  ;;  %v829_v60 = vrot.slane %v821_v61, %v8744_v58  ;;  %v845_v3 = vrot.slane %v837_v0, %v8744_v58  ;;  %v897_v4 = vrot.slane %v889_v1, %v8744_v58 }
 0x398   :  { %v8863_v5 = vcombine.high %v768_v56, %v784_v57  ;;  %v8865_v6 = vcombine.low %v768_v56, %v784_v57  ;;  %v905_v7 = vcombine.low %v880_v48, %v888_v50  ;;  %v822_v8 = vcombine.high %v8797_v13, %v8800_v14 }
 0x399   :  { %v838_v9 = vcombine.high %v8803_v15, %v8806_v16  ;;  %v890_v10 = vcombine.high %v864_v46, %v872_v47  ;;  %v8879_v17 = vcombine.high %v829_v60, %v845_v3  ;;  %v8882_v19 = vcombine.low %v829_v60, %v845_v3 }
 0x39a   :  { %v8873_v11 = vpack.i.bf16 %v8863_v5, %v8850_v2  ;;  %v8877_v12 = vpack.i.bf16 %v8865_v6, %v8854_v59  ;;  %v913_v18 = vrot.slane %v905_v7, %v8744_v58  ;;  %v836_v13 = vrot.slane %v822_v8, %v8744_v58 }
 0x39b   :  { %v904_v14 = vrot.slane %v890_v10, %v8744_v58  ;;  %v906_v15 = vcombine.high %v880_v48, %v888_v50  ;;  %v852_v22 = vrot.slane %v838_v9, %v8744_v58 }
 0x39c   :  { %8247 = vrot.lane.b32.xlu1 %v8873_v11, %s8604_s27  ;;  %8242 = vrot.lane.b32.xlu0 %v8877_v12, %s8604_s27  ;;  %v8890_v16 = vcombine.high %v897_v4, %v913_v18  ;;  %v8892_v21 = vcombine.low %v897_v4, %v913_v18 }
 0x39d   :  { %v920_v23 = vrot.slane %v906_v15, %v8744_v58  ;;  %v8912_v31 = vcombine.high %v836_v13, %v852_v22  ;;  %v8914_v32 = vcombine.low %v836_v13, %v852_v22 }
 0x39e   :  { %v8898_v25 = vpack.i.bf16 %v8890_v16, %v8879_v17  ;;  %v8902_v26 = vpack.i.bf16 %v8892_v21, %v8882_v19 }
 0x39f   :  { %v8904_v29 = vcombine.high %v904_v14, %v920_v23  ;;  %v8906_v30 = vcombine.low %v904_v14, %v920_v23 }
 0x3a0   :  { %8257 = vrot.lane.b32.xlu1 %v8898_v25, %s8604_s27  ;;  %8252 = vrot.lane.b32.xlu0 %v8902_v26, %s8604_s27 }
 0x3a1   :  { %v8918_v33 = vpack.i.bf16 %v8904_v29, %v8912_v31  ;;  %v8922_v34 = vpack.i.bf16 %v8906_v30, %v8914_v32 }
 0x3a4   :  { %8267 = vrot.lane.b32.xlu1 %v8918_v33, %s8604_s27  ;;  %8262 = vrot.lane.b32.xlu0 %v8922_v34, %s8604_s27 }
 0x409   :  { %v8238_v38 = vpop.permute.xlu1 %8237  ;;  %v8233_v35 = vpop.permute.xlu0 %8232 }
 0x40a   :  { %v8240_v37 = vunpack.i.h.bf16 %v8238_v38  ;;  %v8239_v39 = vunpack.i.l.bf16 %v8238_v38  ;;  %v8235_v40 = vunpack.i.h.bf16 %v8233_v35  ;;  %v8234_v41 = vunpack.i.l.bf16 %v8233_v35 }
 0x40c   :  { %v7953_v43 = vpack.c.bf16 %v8240_v37, %v8239_v39  ;;  %v7947_v44 = vpack.c.bf16 %v8235_v40, %v8234_v41 }
 0x40e   :  { %v8248_v45 = vpop.permute.xlu1 %8247  ;;  %v8243_v46 = vpop.permute.xlu0 %8242  ;;  %7949 = vmatprep.subr.msk.bf16.mxu1 %vm8930_vm3, %v7947_v44  ;;  %7955 = vmatprep.subr.msk.bf16.mxu0 %vm8930_vm3, %v7953_v43 }
 0x40f   :  { %v8250_v47 = vunpack.i.h.bf16 %v8248_v45  ;;  %v8249_v48 = vunpack.i.l.bf16 %v8248_v45  ;;  %v8245_v50 = vunpack.i.h.bf16 %v8243_v46  ;;  %v8244_v53 = vunpack.i.l.bf16 %v8243_v46  ;;  %7952 = vmatpush3.bf16.xpose.msk.msra.mxu1 %vm8930_vm3, %v7947_v44  ;;  %7958 = vmatpush3.bf16.xpose.msk.msra.mxu0 %vm8930_vm3, %v7953_v43 }
 0x411   :  { %v7965_v54 = vpack.c.bf16 %v8250_v47, %v8249_v48  ;;  %v7959_v55 = vpack.c.bf16 %v8245_v50, %v8244_v53 }
 0x412   :  { %v8258_v36 = vpop.permute.xlu1 %8257  ;;  %v8253_v61 = vpop.permute.xlu0 %8252 }
 0x413   :  { %7961 = vmatprep.subr.msk.bf16.mxu1 %vm8930_vm3, %v7959_v55  ;;  %7967 = vmatprep.subr.msk.bf16.mxu0 %vm8930_vm3, %v7965_v54  ;;  %v8260_v0 = vunpack.i.h.bf16 %v8258_v36  ;;  %v8259_v1 = vunpack.i.l.bf16 %v8258_v36  ;;  %v8255_v56 = vunpack.i.h.bf16 %v8253_v61  ;;  %v8254_v57 = vunpack.i.l.bf16 %v8253_v61 }
 0x415   :  { %v7977_v60 = vpack.c.bf16 %v8260_v0, %v8259_v1  ;;  %v7971_v3 = vpack.c.bf16 %v8255_v56, %v8254_v57 }
 0x416   :  { %7551 = vmatmul.mubr.msk.f32.vlgmr.msra.gmra.mrb[0].mxu1 %vm931_vm2, %v8832_v52  ;;  %7558 = vmatmul.mubr.msk.f32.vlgmr.msra.gmra.mrb[8].mxu0 %vm931_vm2, %v8830_v51  ;;  %v8263_v4 = vpop.permute.xlu0 %8262  ;;  %v8268_v7 = vpop.permute.xlu1 %8267 }
 0x417   :  { %7964 = vmatpush3.bf16.xpose.msk.msra.mxu1 %vm8930_vm3, %v7959_v55  ;;  %7564 = vmatprep.mubr.msk.f32.mxu1 %vm931_vm2, %v8854_v59  ;;  %v8265_v51 = vunpack.i.h.bf16 %v8263_v4  ;;  %v8264_v52 = vunpack.i.l.bf16 %v8263_v4  ;;  %v8270_v8 = vunpack.i.h.bf16 %v8268_v7  ;;  %v8269_v9 = vunpack.i.l.bf16 %v8268_v7 }
 0x418   :  { %7970 = vmatpush3.bf16.xpose.msk.msra.mxu0 %vm8930_vm3, %v7965_v54  ;;  %7571 = vmatprep.mubr.msk.f32.mxu0 %vm931_vm2, %v8850_v2 }
 0x419   :  { %7973 = vmatprep.subr.msk.bf16.mxu1 %vm8930_vm3, %v7971_v3  ;;  %7979 = vmatprep.subr.msk.bf16.mxu0 %vm8930_vm3, %v7977_v60  ;;  %v7983_v59 = vpack.c.bf16 %v8265_v51, %v8264_v52  ;;  %v7989_v2 = vpack.c.bf16 %v8270_v8, %v8269_v9 }
 0x41e   :  { %7565 = vmatmul.mubr.msk.f32.vlgmr.msra.gmra.mrb[2].mxu1 %vm931_vm2, %v8865_v6 }
 0x41f   :  { %7572 = vmatmul.mubr.msk.f32.vlgmr.msra.gmra.mrb[10].mxu0 %vm931_vm2, %v8863_v5  ;;  %7976 = vmatpush3.bf16.xpose.msk.msra.mxu1 %vm8930_vm3, %v7971_v3 }
 0x420   :  { %7578 = vmatprep.mubr.msk.f32.mxu1 %vm931_vm2, %v8882_v19  ;;  %7982 = vmatpush3.bf16.xpose.msk.msra.mxu0 %vm8930_vm3, %v7977_v60 }
 0x421   :  { %7585 = vmatprep.mubr.msk.f32.mxu0 %vm931_vm2, %v8879_v17  ;;  %7985 = vmatprep.subr.msk.bf16.mxu1 %vm8930_vm3, %v7983_v59 }
 0x422   :  { %7991 = vmatprep.subr.msk.bf16.mxu0 %vm8930_vm3, %v7989_v2 }
 0x426   :  { %7579 = vmatmul.mubr.msk.f32.vlgmr.msra.gmra.mrb[4].mxu1 %vm931_vm2, %v8892_v21 }
 0x427   :  { %7586 = vmatmul.mubr.msk.f32.vlgmr.msra.gmra.mrb[12].mxu0 %vm931_vm2, %v8890_v16  ;;  %7988 = vmatpush3.bf16.xpose.msk.msra.mxu1 %vm8930_vm3, %v7983_v59 }
 0x428   :  { %7592 = vmatprep.mubr.msk.f32.mxu1 %vm931_vm2, %v8914_v32  ;;  %7994 = vmatpush3.bf16.xpose.msk.msra.mxu0 %vm8930_vm3, %v7989_v2 }
 0x429   :  { %7599 = vmatprep.mubr.msk.f32.mxu0 %vm931_vm2, %v8912_v31 }
 0x42e   :  { %7593 = vmatmul.mubr.msk.f32.vlgmr.msra.gmra.mrb[6].mxu1 %vm931_vm2, %v8906_v30 }
 0x42f   :  { %7600 = vmatmul.mubr.msk.f32.vlgmr.msra.gmra.mrb[14].mxu0 %vm931_vm2, %v8904_v29 }
 0x4e9   :  { %v7552_v5 = vpop.f32.mrb[0].mxu1  ;;  %v7559_v6 = vpop.f32.mrb[8].mxu0 }
 0x4ea   :  { %v1006_v10 = vpop.f32.mrb[1].mxu1  ;;  %v8994_v17 = vpop.f32.mrb[9].mxu0  ;;  %v1648_v18 = vsel %vm1638_vm4, %v7559_v6, -inf  ;;  %v1642_v19 = vsel %vm1638_vm4, %v7552_v5, -inf }
 0x4eb   :  { %1649 = vmax.xlane.f32.xlu0 %v1648_v18  ;;  %1643 = vmax.xlane.f32.xlu1 %v1642_v19  ;;  %v1639_v13 = vsel %vm1638_vm4, %v1006_v10, -inf  ;;  %v1645_v21 = vsel %vm1638_vm4, %v8994_v17, -inf }
 0x4ef   :  { %1640 = vmax.xlane.f32.xlu0 %v1639_v13 }
 0x4f1   :  { %v8999_v14 = vpop.f32.mrb[2].mxu1 }
 0x4f2   :  { %v7573_v15 = vpop.f32.mrb[10].mxu0  ;;  %v9001_v16 = vpop.f32.mrb[3].mxu1  ;;  %v1654_v29 = vsel %vm1638_vm4, %v8999_v14, -inf }
 0x4f3   :  { %v9005_v22 = vpop.f32.mrb[11].mxu0  ;;  %v1660_v23 = vsel %vm1638_vm4, %v7573_v15, -inf  ;;  %1646 = vmax.xlane.f32.xlu0 %v1645_v21  ;;  %v1651_v38 = vsel %vm1638_vm4, %v9001_v16, -inf }
 0x4f4   :  { %1661 = vmax.xlane.f32.xlu1 %v1660_v23  ;;  %v1657_v43 = vsel %vm1638_vm4, %v9005_v22, -inf }
 0x4f7   :  { %1655 = vmax.xlane.f32.xlu0 %v1654_v29 }
 0x4f9   :  { %v9010_v30 = vpop.f32.mrb[4].mxu1 }
 0x4fa   :  { %v9012_v31 = vpop.f32.mrb[12].mxu0  ;;  %v9014_v32 = vpop.f32.mrb[5].mxu1  ;;  %v1666_v45 = vsel %vm1638_vm4, %v9010_v30, -inf }
 0x4fb   :  { %v9018_v35 = vpop.f32.mrb[13].mxu0  ;;  %1652 = vmax.xlane.f32.xlu0 %v1651_v38  ;;  %v1672_v44 = vsel %vm1638_vm4, %v9012_v31, -inf }
 0x4fc   :  { %v1669_v46 = vsel %vm1638_vm4, %v9018_v35, -inf }
 0x501   :  { %v9020_v37 = vpop.f32.mrb[6].mxu1 }
 0x502   :  { %v9022_v39 = vpop.f32.mrb[14].mxu0  ;;  %v9024_v40 = vpop.f32.mrb[7].mxu1  ;;  %v1678_v47 = vsel %vm1638_vm4, %v9020_v37, -inf }
 0x503   :  { %v9026_v41 = vpop.f32.mrb[15].mxu0  ;;  %v1675_v50 = vsel %vm1638_vm4, %v9024_v40, -inf }
 0x504   :  { %v1681_v48 = vsel %vm1638_vm4, %v9026_v41, -inf }
 0x505   :  { %8277 = vrot.lane.b32.xlu1 %v8843_v62, %s8605_s28  ;;  %v1663_v62 = vsel %vm1638_vm4, %v9014_v32, -inf }
 0x511   :  { %8272 = vrot.lane.b32.xlu0 %v8846_v63, %s8605_s28  ;;  %v1684_v63 = vsel %vm1638_vm4, %v9022_v39, -inf }
 0x529   :  { %1658 = vmax.xlane.f32.xlu1 %v1657_v43 }
 0x52d   :  { %1673 = vmax.xlane.f32.xlu1 %v1672_v44 }
 0x530   :  { %1667 = vmax.xlane.f32.xlu0 %v1666_v45 }
 0x531   :  { %1670 = vmax.xlane.f32.xlu1 %v1669_v46 }
 0x534   :  { %1664 = vmax.xlane.f32.xlu0 %v1663_v62 }
 0x535   :  { %1685 = vmax.xlane.f32.xlu1 %v1684_v63 }
 0x538   :  { %1679 = vmax.xlane.f32.xlu0 %v1678_v47 }
 0x539   :  { %1682 = vmax.xlane.f32.xlu1 %v1681_v48 }
 0x53c   :  { %1676 = vmax.xlane.f32.xlu0 %v1675_v50 }
 0x54a   :  { %8287 = vrot.lane.b32.xlu1 %v8873_v11, %s8605_s28 }
 0x552   :  { %8282 = vrot.lane.b32.xlu0 %v8877_v12, %s8605_s28 }
 0x578   :  { %v1650_v53 = vpop.xlane.xlu0 %1649  ;;  %v1644_v54 = vpop.xlane.xlu1 %1643 }
 0x579   :  { %v1690_v55 = vsub.f32 %v7559_v6, %v1650_v53  ;;  %v1688_v36 = vsub.f32 %v7552_v5, %v1644_v54 }
 0x57b   :  { %v1705_v61 = vmul.f32 1.442695, %v1688_v36  ;;  %v1709_v0 = vmul.f32 1.442695, %v1690_v55 }
 0x57c   :  { %v1641_v1 = vpop.xlane.xlu0 %1640 }
 0x57d   :  { %v1687_v56 = vsub.f32 %v1006_v10, %v1641_v1  ;;  %8399 = vpow2.f32 %v1705_v61 }
 0x57e   :  { %8401 = vpow2.f32 %v1709_v0 }
 0x57f   :  { %v1703_v57 = vmul.f32 1.442695, %v1687_v56 }
 0x580   :  { %v1647_v60 = vpop.xlane.xlu0 %1646 }
 0x581   :  { %8403 = vpow2.f32 %v1703_v57  ;;  %v1662_v3 = vpop.xlane.xlu1 %1661  ;;  %v1689_v4 = vsub.f32 %v8994_v17, %v1647_v60 }
 0x582   :  { %v1694_v11 = vsub.f32 %v7573_v15, %v1662_v3 }
 0x583   :  { %v1707_v7 = vmul.f32 1.442695, %v1689_v4 }
 0x584   :  { %v1717_v51 = vmul.f32 1.442695, %v1694_v11  ;;  %v1656_v12 = vpop.xlane.xlu0 %1655 }
 0x585   :  { %8405 = vpow2.f32 %v1707_v7  ;;  %v1692_v52 = vsub.f32 %v8999_v14, %v1656_v12  ;;  %v8278_v2 = vpop.permute.xlu1 %8277 }
 0x586   :  { %8407 = vpow2.f32 %v1717_v51  ;;  %v8280_v19 = vunpack.i.h.bf16 %v8278_v2  ;;  %v8279_v13 = vunpack.i.l.bf16 %v8278_v2 }
 0x587   :  { %v1713_v8 = vmul.f32 1.442695, %v1692_v52  ;;  %v9056_v9 = vpop.eup %8399 }
 0x588   :  { %v1653_v59 = vpop.xlane.xlu0 %1652  ;;  %v1738_v6 = vsel %vm1638_vm4, %v9056_v9, 0.0  ;;  %v9061_v10 = vpop.eup %8401  ;;  %v9077_v46 = vpack.c.bf16 %v8280_v19, %v8279_v13 }
 0x589   :  { %8409 = vpow2.f32 %v1713_v8  ;;  %v1691_v5 = vsub.f32 %v9001_v16, %v1653_v59  ;;  %1739 = vadd.xlane.f32.xlu1 %v1738_v6  ;;  %v1744_v16 = vsel %vm1638_vm4, %v9061_v10, 0.0 }
 0x58b   :  { %v9063_v17 = vpop.eup %8403  ;;  %v1711_v18 = vmul.f32 1.442695, %v1691_v5 }
 0x58c   :  { %v8273_v14 = vpop.permute.xlu0 %8272  ;;  %v1735_v15 = vsel %vm1638_vm4, %v9063_v17, 0.0 }
 0x58d   :  { %8411 = vpow2.f32 %v1711_v18  ;;  %v8275_v21 = vunpack.i.h.bf16 %v8273_v14  ;;  %v8274_v23 = vunpack.i.l.bf16 %v8273_v14  ;;  %1736 = vadd.xlane.f32.xlu0 %v1735_v15  ;;  %1745 = vadd.xlane.f32.xlu1 %v1744_v16 }
 0x58f   :  { %v9069_v29 = vpop.eup %8405  ;;  %v7995_v38 = vpack.c.bf16 %v8275_v21, %v8274_v23 }
 0x590   :  { %v9071_v43 = vpop.eup %8407  ;;  %v1741_v44 = vsel %vm1638_vm4, %v9069_v29, 0.0 }
 0x591   :  { %v1756_v45 = vsel %vm1638_vm4, %v9071_v43, 0.0  ;;  %7996 = vmatprep.subr.bf16.mxu0 %v7995_v38  ;;  %1742 = vadd.xlane.f32.xlu0 %v1741_v44 }
 0x592   :  { %1757 = vadd.xlane.f32.xlu1 %v1756_v45  ;;  %7998 = vmatpush3.bf16.msra.mxu0 %v7995_v38 }
 0x593   :  { %v9079_v62 = vpop.eup %8409  ;;  %8000 = vmatprep.subr.bf16.mxu0 %v9077_v46 }
 0x594   :  { %v1750_v63 = vsel %vm1638_vm4, %v9079_v62, 0.0 }
 0x595   :  { %1751 = vadd.xlane.f32.xlu0 %v1750_v63 }
 0x597   :  { %v9084_v47 = vpop.eup %8411 }
 0x598   :  { %v1747_v48 = vsel %vm1638_vm4, %v9084_v47, 0.0 }
 0x599   :  { %1748 = vadd.xlane.f32.xlu0 %v1747_v48 }
 0x5b6   :  { %v1659_v50 = vpop.xlane.xlu1 %1658 }
 0x5b7   :  { %v1693_v53 = vsub.f32 %v9005_v22, %v1659_v50 }
 0x5b9   :  { %v1715_v54 = vmul.f32 1.442695, %v1693_v53 }
 0x5ba   :  { %v1674_v55 = vpop.xlane.xlu1 %1673 }
 0x5bb   :  { %8413 = vpow2.f32 %v1715_v54  ;;  %v1698_v36 = vsub.f32 %v9012_v31, %v1674_v55 }
 0x5bd   :  { %v1725_v61 = vmul.f32 1.442695, %v1698_v36  ;;  %v1668_v0 = vpop.xlane.xlu0 %1667 }
 0x5be   :  { %v1671_v1 = vpop.xlane.xlu1 %1670  ;;  %v1696_v56 = vsub.f32 %v9010_v30, %v1668_v0 }
 0x5bf   :  { %8415 = vpow2.f32 %v1725_v61  ;;  %v1697_v57 = vsub.f32 %v9018_v35, %v1671_v1 }
 0x5c0   :  { %v1721_v60 = vmul.f32 1.442695, %v1696_v56 }
 0x5c1   :  { %v1723_v3 = vmul.f32 1.442695, %v1697_v57  ;;  %v1665_v4 = vpop.xlane.xlu0 %1664 }
 0x5c2   :  { %8417 = vpow2.f32 %v1721_v60  ;;  %v1686_v11 = vpop.xlane.xlu1 %1685  ;;  %v1695_v22 = vsub.f32 %v9014_v32, %v1665_v4 }
 0x5c3   :  { %v1702_v7 = vsub.f32 %v9022_v39, %v1686_v11  ;;  %8419 = vpow2.f32 %v1723_v3 }
 0x5c4   :  { %v1719_v51 = vmul.f32 1.442695, %v1695_v22 }
 0x5c5   :  { %v9094_v31 = vpop.eup %8413  ;;  %v1733_v12 = vmul.f32 1.442695, %v1702_v7  ;;  %v1680_v52 = vpop.xlane.xlu0 %1679 }
 0x5c6   :  { %8421 = vpow2.f32 %v1719_v51  ;;  %v1683_v30 = vpop.xlane.xlu1 %1682  ;;  %v1700_v8 = vsub.f32 %v9020_v37, %v1680_v52  ;;  %v1753_v35 = vsel %vm1638_vm4, %v9094_v31, 0.0 }
 0x5c7   :  { %v1701_v59 = vsub.f32 %v9026_v41, %v1683_v30  ;;  %1754 = vadd.xlane.f32.xlu1 %v1753_v35  ;;  %8423 = vpow2.f32 %v1733_v12 }
 0x5c8   :  { %v1729_v32 = vmul.f32 1.442695, %v1700_v8 }
 0x5c9   :  { %v9100_v2 = vpop.eup %8415  ;;  %v1731_v39 = vmul.f32 1.442695, %v1701_v59  ;;  %v1677_v5 = vpop.xlane.xlu0 %1676 }
 0x5ca   :  { %8425 = vpow2.f32 %v1729_v32  ;;  %v1699_v6 = vsub.f32 %v9024_v40, %v1677_v5  ;;  %v1768_v18 = vsel %vm1638_vm4, %v9100_v2, 0.0  ;;  %v8288_v36 = vpop.permute.xlu1 %8287 }
 0x5cb   :  { %1769 = vadd.xlane.f32.xlu1 %v1768_v18  ;;  %8427 = vpow2.f32 %v1731_v39  ;;  %v8290_v3 = vunpack.i.h.bf16 %v8288_v36 }
 0x5cc   :  { %v9105_v37 = vpop.eup %8417  ;;  %v1727_v19 = vmul.f32 1.442695, %v1699_v6 }
 0x5cd   :  { %v8283_v13 = vpop.permute.xlu0 %8282  ;;  %v1762_v41 = vsel %vm1638_vm4, %v9105_v37, 0.0  ;;  %v9109_v14 = vpop.eup %8419 }
 0x5ce   :  { %8429 = vpow2.f32 %v1727_v19  ;;  %v8285_v15 = vunpack.i.h.bf16 %v8283_v13  ;;  %v8284_v21 = vunpack.i.l.bf16 %v8283_v13  ;;  %1763 = vadd.xlane.f32.xlu0 %v1762_v41  ;;  %v1765_v38 = vsel %vm1638_vm4, %v9109_v14, 0.0 }
 0x5d0   :  { %v9111_v23 = vpop.eup %8421  ;;  %v8003_v40 = vpack.c.bf16 %v8285_v15, %v8284_v21 }
 0x5d1   :  { %v1759_v16 = vsel %vm1638_vm4, %v9111_v23, 0.0  ;;  %v9117_v44 = vpop.eup %8423 }
 0x5d2   :  { %1760 = vadd.xlane.f32.xlu1 %v1759_v16  ;;  %1766 = vadd.xlane.f32.xlu0 %v1765_v38  ;;  %v1780_v63 = vsel %vm1638_vm4, %v9117_v44, 0.0 }
 0x5d3   :  { %8004 = vmatprep.subr.bf16.mxu1 %v8003_v40 }
 0x5d4   :  { %v9119_v45 = vpop.eup %8425  ;;  %8006 = vmatpush3.bf16.msra.mxu1 %v8003_v40 }
 0x5d5   :  { %v1774_v48 = vsel %vm1638_vm4, %v9119_v45, 0.0  ;;  %v9125_v50 = vpop.eup %8427 }
 0x5d6   :  { %1781 = vadd.xlane.f32.xlu1 %v1780_v63  ;;  %1775 = vadd.xlane.f32.xlu0 %v1774_v48  ;;  %v1777_v54 = vsel %vm1638_vm4, %v9125_v50, 0.0 }
 0x5d8   :  { %v9127_v53 = vpop.eup %8429 }
 0x5d9   :  { %v1771_v55 = vsel %vm1638_vm4, %v9127_v53, 0.0 }
 0x5da   :  { %1778 = vadd.xlane.f32.xlu0 %v1777_v54  ;;  %1772 = vadd.xlane.f32.xlu1 %v1771_v55 }
 0x5eb   :  { %8297 = vrot.lane.b32.xlu1 %v8898_v25, %s8605_s28 }
 0x5ef   :  { %8302 = vrot.lane.b32.xlu1 %v8922_v34, %s8605_s28  ;;  %v8289_v34 = vunpack.i.l.bf16 %v8288_v36 }
 0x5f0   :  { %8292 = vrot.lane.b32.xlu0 %v8902_v26, %s8605_s28 }
 0x5f1   :  { %v8007_v7 = vpack.c.bf16 %v8290_v3, %v8289_v34 }
 0x5f3   :  { %8307 = vrot.lane.b32.xlu1 %v8918_v33, %s8605_s28 }
 0x616   :  { %v1740_v61 = vpop.xlane.xlu1 %1739 }
 0x617   :  { %8431 = vrcp.f32 %v1740_v61 }
 0x61a   :  { %v1737_v0 = vpop.xlane.xlu0 %1736  ;;  %v1746_v1 = vpop.xlane.xlu1 %1745 }
 0x61b   :  { %8433 = vrcp.f32 %v1737_v0 }
 0x61c   :  { %8435 = vrcp.f32 %v1746_v1 }
 0x61e   :  { %v1743_v56 = vpop.xlane.xlu0 %1742 }
 0x61f   :  { %8437 = vrcp.f32 %v1743_v56 }
 0x621   :  { %v8432_v25 = vpop.eup %8431 }
 0x622   :  { %v1752_v57 = vpop.xlane.xlu0 %1751  ;;  %v1800_v33 = vmul.f32 %v8432_v25, %v9056_v9 }
 0x623   :  { %8439 = vrcp.f32 %v1752_v57 }
 0x625   :  { %v8434_v60 = vpop.eup %8433 }
 0x626   :  { %v1749_v4 = vpop.xlane.xlu0 %1748  ;;  %v1799_v26 = vmul.f32 %v8434_v60, %v9063_v17  ;;  %v8436_v11 = vpop.eup %8435 }
 0x627   :  { %8441 = vrcp.f32 %v1749_v4  ;;  %v1802_v12 = vmul.f32 %v8436_v11, %v9061_v10 }
 0x628   :  { %7606 = vmatprep.mubr.msk.f32.mxu0 %vm1638_vm4, %v1799_v26 }
 0x629   :  { %v8438_v22 = vpop.eup %8437  ;;  %7607 = vmatmul.mubr.msk.f32.vlgmr.msra.gmra.mrb[16].mxu0 %vm1638_vm4, %v1800_v33 }
 0x62a   :  { %8002 = vmatpush3.bf16.msra.mxu0 %v9077_v46  ;;  %v1801_v51 = vmul.f32 %v8438_v22, %v9069_v29  ;;  %v1758_v46 = vpop.xlane.xlu1 %1757 }
 0x62b   :  { %8008 = vmatprep.subr.bf16.mxu0 %v8007_v7  ;;  %8443 = vrcp.f32 %v1758_v46 }
 0x62c   :  { %7613 = vmatprep.mubr.msk.f32.mxu0 %vm1638_vm4, %v1801_v51 }
 0x62d   :  { %7614 = vmatmul.mubr.msk.f32.vlgmr.msra.gmra.mrb[18].mxu0 %vm1638_vm4, %v1802_v12  ;;  %v8440_v9 = vpop.eup %8439 }
 0x62e   :  { %8010 = vmatpush3.bf16.msra.mxu0 %v8007_v7  ;;  %v1804_v30 = vmul.f32 %v8440_v9, %v9079_v62 }
 0x631   :  { %v8442_v17 = vpop.eup %8441 }
 0x632   :  { %v1803_v52 = vmul.f32 %v8442_v17, %v9084_v47 }
 0x634   :  { %7620 = vmatprep.mubr.msk.f32.mxu1 %vm1638_vm4, %v1803_v52 }
 0x635   :  { %7621 = vmatmul.mubr.msk.f32.vlgmr.msra.gmra.mrb[8].mxu1 %vm1638_vm4, %v1804_v30  ;;  %v8444_v35 = vpop.eup %8443 }
 0x636   :  { %v1806_v62 = vmul.f32 %v8444_v35, %v9071_v43 }
 0x654   :  { %v1755_v29 = vpop.xlane.xlu1 %1754 }
 0x655   :  { %8445 = vrcp.f32 %v1755_v29 }
 0x658   :  { %v1770_v10 = vpop.xlane.xlu1 %1769 }
 0x65b   :  { %v1764_v8 = vpop.xlane.xlu0 %1763 }
 0x65f   :  { %v8446_v59 = vpop.eup %8445  ;;  %v1761_v32 = vpop.xlane.xlu1 %1760 }
 0x660   :  { %v1767_v39 = vpop.xlane.xlu0 %1766  ;;  %8447 = vrcp.f32 %v1761_v32  ;;  %v1805_v5 = vmul.f32 %v8446_v59, %v9094_v31 }
 0x661   :  { %8449 = vrcp.f32 %v1767_v39 }
 0x662   :  { %7627 = vmatprep.mubr.msk.f32.mxu0 %vm1638_vm4, %v1805_v5  ;;  %8451 = vrcp.f32 %v1770_v10 }
 0x663   :  { %7628 = vmatmul.mubr.msk.f32.vlgmr.msra.gmra.mrb[20].mxu0 %vm1638_vm4, %v1806_v62  ;;  %v1782_v47 = vpop.xlane.xlu1 %1781  ;;  %8453 = vrcp.f32 %v1764_v8 }
 0x664   :  { %v1776_v6 = vpop.xlane.xlu0 %1775 }
 0x667   :  { %v1773_v18 = vpop.xlane.xlu1 %1772 }
 0x668   :  { %v1779_v19 = vpop.xlane.xlu0 %1778  ;;  %8455 = vrcp.f32 %v1773_v18 }
 0x669   :  { %8457 = vrcp.f32 %v1779_v19 }
 0x66a   :  { %v8448_v13 = vpop.eup %8447  ;;  %8459 = vrcp.f32 %v1776_v6 }
 0x66b   :  { %v8450_v41 = vpop.eup %8449  ;;  %v8298_v15 = vpop.permute.xlu1 %8297  ;;  %v1807_v21 = vmul.f32 %v8448_v13, %v9111_v23  ;;  %8461 = vrcp.f32 %v1782_v47 }
 0x66c   :  { %v8293_v31 = vpop.permute.xlu0 %8292  ;;  %v8300_v43 = vunpack.i.h.bf16 %v8298_v15  ;;  %v8299_v40 = vunpack.i.l.bf16 %v8298_v15  ;;  %v1809_v63 = vmul.f32 %v8450_v41, %v9109_v14  ;;  %v8452_v48 = vpop.eup %8451 }
 0x66d   :  { %v8295_v16 = vunpack.i.h.bf16 %v8293_v31  ;;  %v8294_v38 = vunpack.i.l.bf16 %v8293_v31  ;;  %7634 = vmatprep.mubr.msk.f32.mxu1 %vm1638_vm4, %v1807_v21  ;;  %v8454_v36 = vpop.eup %8453  ;;  %v1810_v57 = vmul.f32 %v8452_v48, %v9100_v2 }
 0x66e   :  { %v8015_v55 = vpack.c.bf16 %v8300_v43, %v8299_v40  ;;  %7641 = vmatprep.mubr.msk.f32.mxu0 %vm1638_vm4, %v1809_v63  ;;  %v1808_v56 = vmul.f32 %v8454_v36, %v9105_v37 }
 0x66f   :  { %v8011_v54 = vpack.c.bf16 %v8295_v16, %v8294_v38  ;;  %v8303_v61 = vpop.permute.xlu1 %8302 }
 0x670   :  { %v8305_v0 = vunpack.i.h.bf16 %v8303_v61  ;;  %v8304_v1 = vunpack.i.l.bf16 %v8303_v61  ;;  %8016 = vmatprep.subr.bf16.mxu0 %v8015_v55 }
 0x671   :  { %8012 = vmatprep.subr.bf16.mxu1 %v8011_v54  ;;  %8018 = vmatpush3.bf16.msra.mxu0 %v8015_v55 }
 0x672   :  { %8014 = vmatpush3.bf16.msra.mxu1 %v8011_v54  ;;  %v8456_v23 = vpop.eup %8455  ;;  %v8019_v25 = vpack.c.bf16 %v8305_v0, %v8304_v1 }
 0x673   :  { %v8458_v14 = vpop.eup %8457  ;;  %v8308_v60 = vpop.permute.xlu1 %8307  ;;  %v1811_v3 = vmul.f32 %v8456_v23, %v9127_v53 }
 0x674   :  { %v8460_v34 = vpop.eup %8459  ;;  %v8310_v4 = vunpack.i.h.bf16 %v8308_v60  ;;  %v8309_v26 = vunpack.i.l.bf16 %v8308_v60  ;;  %7642 = vmatmul.mubr.msk.f32.vlgmr.msra.gmra.mrb[22].mxu0 %vm1638_vm4, %v1810_v57  ;;  %v1813_v33 = vmul.f32 %v8458_v14, %v9125_v50  ;;  %8020 = vmatprep.subr.bf16.mxu1 %v8019_v25 }
 0x675   :  { %7635 = vmatmul.mubr.msk.f32.vlgmr.msra.gmra.mrb[10].mxu1 %vm1638_vm4, %v1808_v56  ;;  %v8462_v37 = vpop.eup %8461  ;;  %v1812_v11 = vmul.f32 %v8460_v34, %v9119_v45 }
 0x676   :  { %7648 = vmatprep.mubr.msk.f32.mxu1 %vm1638_vm4, %v1811_v3  ;;  %8022 = vmatpush3.bf16.msra.mxu1 %v8019_v25  ;;  %v8023_v2 = vpack.c.bf16 %v8310_v4, %v8309_v26  ;;  %v1814_v53 = vmul.f32 %v8462_v37, %v9117_v44 }
 0x677   :  { %7655 = vmatprep.mubr.msk.f32.mxu0 %vm1638_vm4, %v1813_v33 }
 0x678   :  { %8024 = vmatprep.subr.bf16.mxu0 %v8023_v2 }
 0x679   :  { %7649 = vmatmul.mubr.msk.f32.vlgmr.msra.gmra.mrb[12].mxu1 %vm1638_vm4, %v1812_v11  ;;  %8026 = vmatpush3.bf16.msra.mxu0 %v8023_v2 }
 0x67c   :  { %7656 = vmatmul.mubr.msk.f32.vlgmr.msra.gmra.mrb[24].mxu0 %vm1638_vm4, %v1814_v53 }
 0x6fc   :  { %v7608_v22 = vpop.f32.mrb[16].mxu0 }
 0x6fd   :  { %v1893_v50 = vpop.f32.mrb[17].mxu0 }
 0x700   :  { %v7615_v7 = vpop.f32.mrb[18].mxu0 }
 0x701   :  { %v1980_v51 = vpop.f32.mrb[19].mxu0 }
 0x708   :  { %v7622_v12 = vpop.f32.mrb[8].mxu1 }
 0x709   :  { %v2579_v9 = vcombine.low %v7608_v22, %v7622_v12  ;;  %v2580_v17 = vcombine.high %v7608_v22, %v7622_v12  ;;  %v2067_v52 = vpop.f32.mrb[9].mxu1 }
 0x70a   :  { %v2511_v30 = vcombine.low %v1893_v50, %v2067_v52  ;;  %v2512_v46 = vcombine.high %v1893_v50, %v2067_v52 }
 0x70b   :  { %v2587_v44 = vrot.slane %v2579_v9, %v8742_v49  ;;  %v2594_v32 = vrot.slane %v2580_v17, %v8742_v49 }
 0x70c   :  { %v2519_v62 = vrot.slane %v2511_v30, %v8742_v49  ;;  %v2526_v47 = vrot.slane %v2512_v46, %v8742_v49 }
 0x736   :  { %v7629_v29 = vpop.f32.mrb[20].mxu0 }
 0x737   :  { %v2595_v45 = vcombine.low %v7615_v7, %v7629_v29  ;;  %v2596_v10 = vcombine.high %v7615_v7, %v7629_v29  ;;  %v2154_v8 = vpop.f32.mrb[21].mxu0 }
 0x738   :  { %v2527_v35 = vcombine.low %v1980_v51, %v2154_v8  ;;  %v2528_v59 = vcombine.high %v1980_v51, %v2154_v8 }
 0x739   :  { %v2603_v39 = vrot.slane %v2595_v45, %v8742_v49  ;;  %v2610_v5 = vrot.slane %v2596_v10, %v8742_v49  ;;  %v141_v45 = vld [vmem:[%s10166_s1 + $0x50] sm:$0xff] }
 0x73a   :  { %v2535_v6 = vrot.slane %v2527_v35, %v8742_v49  ;;  %v2542_v18 = vrot.slane %v2528_v59, %v8742_v49 }
 0x73b   :  { %v2611_v19 = vcombine.low %v2587_v44, %v2603_v39  ;;  %v2612_v13 = vcombine.high %v2587_v44, %v2603_v39  ;;  %v2627_v41 = vcombine.low %v2594_v32, %v2610_v5  ;;  %v2628_v15 = vcombine.high %v2594_v32, %v2610_v5  ;;  %v142_v44 = vld [vmem:[%s10166_s1 + $0x58] sm:$0xff]  ;;  %v143_v32 = vld [vmem:[%s10166_s1 + $0x60] sm:$0xff]  ;;  %v144_v39 = vld [vmem:[%s10166_s1 + $0x68] sm:$0xff] }
 0x73c   :  { %v2543_v31 = vcombine.low %v2519_v62, %v2535_v6  ;;  %v2544_v21 = vcombine.high %v2519_v62, %v2535_v6  ;;  %v2559_v43 = vcombine.low %v2526_v47, %v2542_v18  ;;  %v2560_v40 = vcombine.high %v2526_v47, %v2542_v18 }
 0x73d   :  { %v2619_v16 = vrot.slane %v2611_v19, %v8744_v58  ;;  %v2626_v38 = vrot.slane %v2612_v13, %v8744_v58  ;;  %v2635_v63 = vrot.slane %v2627_v41, %v8744_v58  ;;  %v2642_v48 = vrot.slane %v2628_v15, %v8744_v58 }
 0x73e   :  { %v2551_v54 = vrot.slane %v2543_v31, %v8744_v58  ;;  %v2558_v55 = vrot.slane %v2544_v21, %v8744_v58  ;;  %v2567_v36 = vrot.slane %v2559_v43, %v8744_v58  ;;  %v2574_v61 = vrot.slane %v2560_v40, %v8744_v58 }
 0x73f   :  { %v2851_v0 = vcombine.low %v2619_v16, %v2626_v38  ;;  %v7176_v1 = vcombine.high %v2619_v16, %v2626_v38  ;;  %v2867_v23 = vcombine.low %v2635_v63, %v2642_v48  ;;  %v7177_v56 = vcombine.high %v2635_v63, %v2642_v48 }
 0x740   :  { %v2783_v57 = vcombine.low %v2551_v54, %v2558_v55  ;;  %v7174_v25 = vcombine.high %v2551_v54, %v2558_v55  ;;  %v2799_v14 = vcombine.low %v2567_v36, %v2574_v61  ;;  %v7175_v60 = vcombine.high %v2567_v36, %v2574_v61 }
 0x741   :  { %v2858_v3 = vrot.slane %v2851_v0, %v8742_v49  ;;  %v2866_v34 = vrot.slane %v7176_v1, %v8742_v49  ;;  %v2874_v4 = vrot.slane %v2867_v23, %v8742_v49  ;;  %v2882_v26 = vrot.slane %v7177_v56, %v8742_v49 }
 0x742   :  { %v2790_v33 = vrot.slane %v2783_v57, %v8742_v49  ;;  %v2798_v2 = vrot.slane %v7174_v25, %v8742_v49  ;;  %v2806_v37 = vrot.slane %v2799_v14, %v8742_v49  ;;  %v2814_v11 = vrot.slane %v7175_v60, %v8742_v49 }
 0x743   :  { %v2883_v53 = vcombine.low %v2858_v3, %v2866_v34  ;;  %v2899_v22 = vcombine.low %v2874_v4, %v2882_v26  ;;  %v2884_v50 = vcombine.high %v2858_v3, %v2866_v34  ;;  %v2900_v7 = vcombine.high %v2874_v4, %v2882_v26 }
 0x744   :  { %v2815_v51 = vcombine.low %v2790_v33, %v2798_v2  ;;  %v2831_v12 = vcombine.low %v2806_v37, %v2814_v11  ;;  %v2816_v9 = vcombine.high %v2790_v33, %v2798_v2  ;;  %v2832_v17 = vcombine.high %v2806_v37, %v2814_v11 }
 0x745   :  { %v9199_v52 = vrot.slane %v2883_v53, %v8744_v58  ;;  %v9202_v30 = vrot.slane %v2899_v22, %v8744_v58  ;;  %v2898_v46 = vrot.slane %v2884_v50, %v8744_v58  ;;  %v2914_v29 = vrot.slane %v2900_v7, %v8744_v58 }
 0x746   :  { %v9210_v10 = vrot.slane %v2815_v51, %v8744_v58  ;;  %v9213_v8 = vrot.slane %v2831_v12, %v8744_v58  ;;  %v2830_v35 = vrot.slane %v2816_v9, %v8744_v58  ;;  %v2846_v59 = vrot.slane %v2832_v17, %v8744_v58 }
 0x747   :  { %v7643_v62 = vpop.f32.mrb[22].mxu0  ;;  %v2916_v47 = vcombine.high %v9199_v52, %v9202_v30  ;;  %v2917_v6 = vcombine.low %v2898_v46, %v2914_v29  ;;  %v2918_v18 = vcombine.high %v2898_v46, %v2914_v29  ;;  %v2915_v19 = vcombine.low %v9199_v52, %v9202_v30 }
 0x748   :  { %v7636_v5 = vpop.f32.mrb[10].mxu1  ;;  %v2328_v13 = vpop.f32.mrb[23].mxu0  ;;  %v2848_v15 = vcombine.high %v9210_v10, %v9213_v8  ;;  %v2849_v31 = vcombine.low %v2830_v35, %v2846_v59  ;;  %v2850_v21 = vcombine.high %v2830_v35, %v2846_v59  ;;  %v2847_v43 = vcombine.low %v9210_v10, %v9213_v8 }
 0x749   :  { %v2241_v41 = vpop.f32.mrb[11].mxu1  ;;  %3061 = vrot.lane.b32.xlu1 %v2916_v47, %s8606_s10  ;;  %v8027_v40 = vpack.c.bf16 %v142_v44, %v141_v45  ;;  %v8031_v16 = vpack.c.bf16 %v144_v39, %v143_v32 }
 0x74a   :  { %3059 = vrot.lane.b32.xlu0 %v2848_v15, %s8606_s10 }
 0x74b   :  { %8028 = vmatprep.subr.bf16.mxu1 %v8027_v40 }
 0x74c   :  { %v7650_v38 = vpop.f32.mrb[12].mxu1  ;;  %8030 = vmatpush3.bf16.msra.mxu1 %v8027_v40 }
 0x74d   :  { %v2715_v63 = vcombine.low %v7636_v5, %v7650_v38  ;;  %v2716_v48 = vcombine.high %v7636_v5, %v7650_v38  ;;  %3077 = vrot.lane.b32.xlu1 %v2917_v6, %s8607_s0  ;;  %v2415_v54 = vpop.f32.mrb[13].mxu1  ;;  %8032 = vmatprep.subr.bf16.mxu1 %v8031_v16 }
 0x74e   :  { %v2647_v55 = vcombine.low %v2241_v41, %v2415_v54  ;;  %v2648_v36 = vcombine.high %v2241_v41, %v2415_v54  ;;  %3075 = vrot.lane.b32.xlu0 %v2849_v31, %s8607_s0 }
 0x74f   :  { %v7657_v61 = vpop.f32.mrb[24].mxu0  ;;  %v2723_v25 = vrot.slane %v2715_v63, %v8742_v49  ;;  %v2730_v14 = vrot.slane %v2716_v48, %v8742_v49 }
 0x750   :  { %v2731_v0 = vcombine.low %v7643_v62, %v7657_v61  ;;  %v2732_v1 = vcombine.high %v7643_v62, %v7657_v61  ;;  %v2502_v23 = vpop.f32.mrb[25].mxu0  ;;  %8034 = vmatpush3.bf16.msra.mxu1 %v8031_v16  ;;  %v2655_v34 = vrot.slane %v2647_v55, %v8742_v49  ;;  %v2662_v4 = vrot.slane %v2648_v36, %v8742_v49 }
 0x751   :  { %v2663_v56 = vcombine.low %v2328_v13, %v2502_v23  ;;  %v2664_v57 = vcombine.high %v2328_v13, %v2502_v23  ;;  %3093 = vrot.lane.b32.xlu1 %v2918_v18, %s8608_s11 }
 0x752   :  { %v2739_v60 = vrot.slane %v2731_v0, %v8742_v49  ;;  %v2746_v3 = vrot.slane %v2732_v1, %v8742_v49  ;;  %3091 = vrot.lane.b32.xlu0 %v2850_v21, %s8608_s11 }
 0x753   :  { %v2671_v26 = vrot.slane %v2663_v56, %v8742_v49  ;;  %v2678_v33 = vrot.slane %v2664_v57, %v8742_v49 }
 0x754   :  { %v2747_v2 = vcombine.low %v2723_v25, %v2739_v60  ;;  %v2748_v37 = vcombine.high %v2723_v25, %v2739_v60  ;;  %v2763_v11 = vcombine.low %v2730_v14, %v2746_v3  ;;  %v2764_v53 = vcombine.high %v2730_v14, %v2746_v3 }
 0x755   :  { %v2679_v22 = vcombine.low %v2655_v34, %v2671_v26  ;;  %v2680_v50 = vcombine.high %v2655_v34, %v2671_v26  ;;  %v2695_v7 = vcombine.low %v2662_v4, %v2678_v33  ;;  %v2696_v51 = vcombine.high %v2662_v4, %v2678_v33 }
 0x756   :  { %v2755_v12 = vrot.slane %v2747_v2, %v8744_v58  ;;  %v2762_v9 = vrot.slane %v2748_v37, %v8744_v58  ;;  %v2771_v17 = vrot.slane %v2763_v11, %v8744_v58  ;;  %v2778_v46 = vrot.slane %v2764_v53, %v8744_v58 }
 0x757   :  { %v2687_v29 = vrot.slane %v2679_v22, %v8744_v58  ;;  %v2694_v45 = vrot.slane %v2680_v50, %v8744_v58  ;;  %v2703_v35 = vrot.slane %v2695_v7, %v8744_v58  ;;  %v2710_v59 = vrot.slane %v2696_v51, %v8744_v58 }
 0x758   :  { %v2987_v44 = vcombine.low %v2755_v12, %v2762_v9  ;;  %v7180_v32 = vcombine.high %v2755_v12, %v2762_v9  ;;  %v3003_v39 = vcombine.low %v2771_v17, %v2778_v46  ;;  %v7181_v5 = vcombine.high %v2771_v17, %v2778_v46 }
 0x759   :  { %v2919_v62 = vcombine.low %v2687_v29, %v2694_v45  ;;  %v7178_v47 = vcombine.high %v2687_v29, %v2694_v45  ;;  %v2935_v6 = vcombine.low %v2703_v35, %v2710_v59  ;;  %v7179_v18 = vcombine.high %v2703_v35, %v2710_v59 }
 0x75a   :  { %v2994_v13 = vrot.slane %v2987_v44, %v8742_v49  ;;  %v3002_v41 = vrot.slane %v7180_v32, %v8742_v49  ;;  %v3010_v15 = vrot.slane %v3003_v39, %v8742_v49  ;;  %v3018_v31 = vrot.slane %v7181_v5, %v8742_v49 }
 0x75b   :  { %v2926_v21 = vrot.slane %v2919_v62, %v8742_v49  ;;  %v2934_v40 = vrot.slane %v7178_v47, %v8742_v49  ;;  %v2942_v16 = vrot.slane %v2935_v6, %v8742_v49  ;;  %v2950_v38 = vrot.slane %v7179_v18, %v8742_v49  ;;  %v7186_v18 = vld [vmem:[%s10167_s2 + $0x4] ss:$0 sm:$0xff] }
 0x75c   :  { %v3019_v63 = vcombine.low %v2994_v13, %v3002_v41  ;;  %v3035_v48 = vcombine.low %v3010_v15, %v3018_v31  ;;  %v3020_v54 = vcombine.high %v2994_v13, %v3002_v41  ;;  %v3036_v55 = vcombine.high %v3010_v15, %v3018_v31 }
 0x75d   :  { %v2951_v36 = vcombine.low %v2926_v21, %v2934_v40  ;;  %v2967_v61 = vcombine.low %v2942_v16, %v2950_v38  ;;  %v2952_v0 = vcombine.high %v2926_v21, %v2934_v40  ;;  %v2968_v1 = vcombine.high %v2942_v16, %v2950_v38 }
 0x75e   :  { %v3027_v23 = vrot.slane %v3019_v63, %v8744_v58  ;;  %v3043_v56 = vrot.slane %v3035_v48, %v8744_v58  ;;  %v3034_v57 = vrot.slane %v3020_v54, %v8744_v58  ;;  %v3050_v25 = vrot.slane %v3036_v55, %v8744_v58 }
 0x75f   :  { %v2959_v14 = vrot.slane %v2951_v36, %v8744_v58  ;;  %v2975_v60 = vrot.slane %v2967_v61, %v8744_v58  ;;  %v2966_v3 = vrot.slane %v2952_v0, %v8744_v58  ;;  %v2982_v34 = vrot.slane %v2968_v1, %v8744_v58 }
 0x760   :  { %v3052_v4 = vcombine.high %v3027_v23, %v3043_v56  ;;  %v3053_v26 = vcombine.low %v3034_v57, %v3050_v25  ;;  %v3054_v33 = vcombine.high %v3034_v57, %v3050_v25  ;;  %v3051_v2 = vcombine.low %v3027_v23, %v3043_v56 }
 0x761   :  { %v2984_v37 = vcombine.high %v2959_v14, %v2975_v60  ;;  %v2985_v11 = vcombine.low %v2966_v3, %v2982_v34  ;;  %v2986_v53 = vcombine.high %v2966_v3, %v2982_v34  ;;  %v2983_v22 = vcombine.low %v2959_v14, %v2975_v60 }
 0x762   :  { %3065 = vrot.lane.b32.xlu1 %v3052_v4, %s8606_s10 }
 0x763   :  { %3063 = vrot.lane.b32.xlu0 %v2984_v37, %s8606_s10 }
 0x766   :  { %3081 = vrot.lane.b32.xlu1 %v3053_v26, %s8607_s0 }
 0x767   :  { %3079 = vrot.lane.b32.xlu0 %v2985_v11, %s8607_s0 }
 0x76a   :  { %3097 = vrot.lane.b32.xlu1 %v3054_v33, %s8608_s11 }
 0x76b   :  { %3095 = vrot.lane.b32.xlu0 %v2986_v53, %s8608_s11 }
 0x7bb   :  { %v3062_v50 = vpop.permute.xlu1 %3061 }
 0x7bc   :  { %v3060_v7 = vpop.permute.xlu0 %3059  ;;  %v3104_v46 = vsel %vm931_vm2, %v2915_v19, %v3062_v50  ;;  %v148_v50 = vld [vmem:[%s10166_s1 + $0x70] sm:$0xff] }
 0x7bd   :  { %v3103_v9 = vsel %vm931_vm2, %v2847_v43, %v3060_v7  ;;  %v149_v7 = vld [vmem:[%s10166_s1 + $0x78] sm:$0xff] }
 0x7bf   :  { %v3078_v51 = vpop.permute.xlu1 %3077 }
 0x7c0   :  { %v3076_v12 = vpop.permute.xlu0 %3075  ;;  %v3108_v35 = vsel %vm1638_vm4, %v3104_v46, %v3078_v51  ;;  %v150_v51 = vld [vmem:[%s10166_s1 + $0x80] sm:$0xff] }
 0x7c1   :  { %v3107_v29 = vsel %vm1638_vm4, %v3103_v9, %v3076_v12  ;;  %v8035_v12 = vpack.c.bf16 %v149_v7, %v148_v50  ;;  %v151_v9 = vld [vmem:[%s10166_s1 + $0x88] sm:$0xff] }
 0x7c2   :  { %v168_v7 = vld [vmem:[%s10166_s1 + $0x108] sm:$0xff] }
 0x7c3   :  { %v3094_v17 = vpop.permute.xlu1 %3093  ;;  %8036 = vmatprep.subr.bf16.mxu0 %v8035_v12 }
 0x7c4   :  { %v3092_v45 = vpop.permute.xlu0 %3091  ;;  %v3113_v44 = vsel %vm3111_vm5, %v3108_v35, %v3094_v17  ;;  %v8039_v17 = vpack.c.bf16 %v151_v9, %v150_v51  ;;  %8038 = vmatpush3.bf16.msra.mxu0 %v8035_v12  ;;  %v7189_v12 = vld [vmem:[%s10167_s2 + $0x7] ss:$0 sm:$0xff] }
 0x7c5   :  { %v3112_v59 = vsel %vm3111_vm5, %v3107_v29, %v3092_v45 }
 0x7c6   :  { %7666 = vmatprep.mubr.msk.f32.mxu1 %vm170_vm1, %v3112_v59  ;;  %8040 = vmatprep.subr.bf16.mxu0 %v8039_v17 }
 0x7c7   :  { %7667 = vmatmul.mubr.msk.f32.vlgmr.msra.gmra.mrb[14].mxu1 %vm170_vm1, %v3113_v44 }
 0x7c8   :  { %8042 = vmatpush3.bf16.msra.mxu0 %v8039_v17 }
 0x7d4   :  { %v3066_v10 = vpop.permute.xlu1 %3065 }
 0x7d5   :  { %v3064_v8 = vpop.permute.xlu0 %3063  ;;  %v3106_v19 = vsel %vm931_vm2, %v3051_v2, %v3066_v10 }
 0x7d6   :  { %v3105_v52 = vsel %vm931_vm2, %v2983_v22, %v3064_v8  ;;  %v7187_v8 = vld [vmem:[%s10167_s2 + $0x5] ss:$0 sm:$0xff] }
 0x7d8   :  { %v3082_v43 = vpop.permute.xlu1 %3081 }
 0x7d9   :  { %v3080_v32 = vpop.permute.xlu0 %3079  ;;  %v3110_v62 = vsel %vm1638_vm4, %v3106_v19, %v3082_v43 }
 0x7da   :  { %v3109_v39 = vsel %vm1638_vm4, %v3105_v52, %v3080_v32 }
 0x7dc   :  { %v3098_v30 = vpop.permute.xlu1 %3097 }
 0x7dd   :  { %v3096_v5 = vpop.permute.xlu0 %3095  ;;  %v3115_v6 = vsel %vm3111_vm5, %v3110_v62, %v3098_v30  ;;  %v7188_v30 = vld [vmem:[%s10167_s2 + $0x6] ss:$0 sm:$0xff] }
 0x7de   :  { %v3114_v47 = vsel %vm3111_vm5, %v3109_v39, %v3096_v5 }
 0x7df   :  { %7669 = vmatprep.mubr.msk.f32.mxu1 %vm170_vm1, %v3114_v47 }
 0x7e0   :  { %7670 = vmatmul.mubr.msk.f32.gmra.mrb[16].mxu1 %vm170_vm1, %v3115_v6 }
 0x89a   :  { %v7668_v13 = vpop.f32.mrb[14].mxu1 }
 0x89b   :  { %v3214_v41 = vadd.f32 %v7668_v13, %v8678_v24  ;;  %v3194_v15 = vpop.f32.mrb[15].mxu1 }
 0x89c   :  { %v3213_v31 = vadd.f32 %v3194_v15, %v8676_v20 }
 0x89d   :  { %v9305_v21 = vadd.f32 %v7186_v18, %v3214_v41 }
 0x89e   :  { %v9307_v40 = vadd.f32 %v7186_v18, %v3213_v31 }
 0x89f   :  { %v3228_v16 = vsel %vm170_vm1, %v9305_v21, 0.0 }
 0x8a0   :  { %3229 = vadd.xlane.f32.xlu1 %v3228_v16  ;;  %v3225_v38 = vsel %vm170_vm1, %v9307_v40, 0.0 }
 0x8a1   :  { %3226 = vadd.xlane.f32.xlu0 %v3225_v38 }
 0x8b3   :  { %v7671_v63 = vpop.f32.mrb[16].mxu1 }
 0x8b4   :  { %v3204_v48 = vpop.f32.mrb[17].mxu1  ;;  %v3216_v54 = vadd.f32 %v7671_v63, %v8682_v27 }
 0x8b5   :  { %v3215_v24 = vadd.f32 %v3204_v48, %v8684_v28 }
 0x8b6   :  { %v9317_v20 = vadd.f32 %v7186_v18, %v3216_v54 }
 0x8b7   :  { %v9315_v55 = vadd.f32 %v7186_v18, %v3215_v24 }
 0x8b8   :  { %v3234_v61 = vsel %vm170_vm1, %v9317_v20, 0.0 }
 0x8b9   :  { %v3231_v36 = vsel %vm170_vm1, %v9315_v55, 0.0 }
 0x8ba   :  { %3232 = vadd.xlane.f32.xlu0 %v3231_v36 }
 0x8be   :  { %3235 = vadd.xlane.f32.xlu0 %v3234_v61  ;;  %v153_v61 = vld [vmem:[%s10166_s1 + $0x90] sm:$0xff] }
 0x92d   :  { %v3230_v0 = vpop.xlane.xlu1 %3229 }
 0x92e   :  { %v3238_v1 = vmul.f32 0.03125, %v3230_v0  ;;  %v3227_v23 = vpop.xlane.xlu0 %3226  ;;  %v154_v0 = vld [vmem:[%s10166_s1 + $0x98] sm:$0xff] }
 0x92f   :  { %v3237_v56 = vmul.f32 0.03125, %v3227_v23  ;;  %v155_v23 = vld [vmem:[%s10166_s1 + $0xa0] sm:$0xff] }
 0x930   :  { %v3242_v27 = vsub.f32 %v9305_v21, %v3238_v1  ;;  %v8043_v1 = vpack.c.bf16 %v154_v0, %v153_v61 }
 0x931   :  { %v3241_v28 = vsub.f32 %v9307_v40, %v3237_v56  ;;  %v156_v56 = vld [vmem:[%s10166_s1 + $0xa8] sm:$0xff] }
 0x932   :  { %v3246_v57 = vmul.f32 %v3242_v27, %v3242_v27  ;;  %8044 = vmatprep.subr.bf16.mxu1 %v8043_v1 }
 0x933   :  { %v3245_v25 = vmul.f32 %v3241_v28, %v3241_v28  ;;  %8046 = vmatpush3.bf16.msra.mxu1 %v8043_v1 }
 0x934   :  { %v3252_v14 = vsel %vm170_vm1, %v3246_v57, 0.0  ;;  %v158_v57 = vld [vmem:[%s10166_s1 + $0xb8] sm:$0xff] }
 0x935   :  { %3253 = vadd.xlane.f32.xlu1 %v3252_v14  ;;  %v3249_v60 = vsel %vm170_vm1, %v3245_v25, 0.0  ;;  %v159_v14 = vld [vmem:[%s10166_s1 + $0xc0] sm:$0xff] }
 0x936   :  { %3250 = vadd.xlane.f32.xlu0 %v3249_v60  ;;  %v160_v60 = vld [vmem:[%s10166_s1 + $0xc8] sm:$0xff] }
 0x947   :  { %v3233_v3 = vpop.xlane.xlu0 %3232 }
 0x948   :  { %v3239_v34 = vmul.f32 0.03125, %v3233_v3  ;;  %v8055_v3 = vpack.c.bf16 %v160_v60, %v159_v14 }
 0x94a   :  { %v3243_v4 = vsub.f32 %v9315_v55, %v3239_v34  ;;  %v161_v34 = vld [vmem:[%s10166_s1 + $0xd0] sm:$0xff] }
 0x94b   :  { %v3236_v26 = vpop.xlane.xlu0 %3235 }
 0x94c   :  { %v3240_v33 = vmul.f32 0.03125, %v3236_v26  ;;  %v3247_v2 = vmul.f32 %v3243_v4, %v3243_v4 }
 0x94e   :  { %v3244_v37 = vsub.f32 %v9317_v20, %v3240_v33  ;;  %v3255_v11 = vsel %vm170_vm1, %v3247_v2, 0.0  ;;  %v163_v33 = vld [vmem:[%s10166_s1 + $0xe0] sm:$0xff]  ;;  %v164_v2 = vld [vmem:[%s10166_s1 + $0xe8] sm:$0xff] }
 0x94f   :  { %3256 = vadd.xlane.f32.xlu0 %v3255_v11  ;;  %v165_v11 = vld [vmem:[%s10166_s1 + $0xf0] sm:$0xff] }
 0x950   :  { %v3248_v53 = vmul.f32 %v3244_v37, %v3244_v37 }
 0x952   :  { %v3258_v22 = vsel %vm170_vm1, %v3248_v53, 0.0  ;;  %v166_v53 = vld [vmem:[%s10166_s1 + $0xf8] sm:$0xff] }
 0x953   :  { %3259 = vadd.xlane.f32.xlu1 %v3258_v22  ;;  %v167_v22 = vld [vmem:[%s10166_s1 + $0x100] sm:$0xff]  ;;  %v8067_v50 = vpack.c.bf16 %v166_v53, %v165_v11 }
 0x954   :  { %v8071_v51 = vpack.c.bf16 %v168_v7, %v167_v22 }
 0x9c2   :  { %v3254_v46 = vpop.xlane.xlu1 %3253 }
 0x9c3   :  { %v3262_v29 = vmul.f32 0.03125, %v3254_v46  ;;  %v3251_v45 = vpop.xlane.xlu0 %3250 }
 0x9c4   :  { %v3261_v35 = vmul.f32 0.03125, %v3251_v45 }
 0x9c5   :  { %v3266_v59 = vadd.f32 1e-05, %v3262_v29 }
 0x9c6   :  { %v3265_v44 = vadd.f32 1e-05, %v3261_v35 }
 0x9c7   :  { %8463 = vrsqrt.f32 %v3266_v59 }
 0x9c8   :  { %8465 = vrsqrt.f32 %v3265_v44 }
 0x9d1   :  { %v8464_v10 = vpop.eup %8463 }
 0x9d2   :  { %v8466_v43 = vpop.eup %8465  ;;  %v3274_v32 = vmul.f32 %v8464_v10, %v3242_v27  ;;  %v8047_v27 = vpack.c.bf16 %v156_v56, %v155_v23 }
 0x9d3   :  { %v3273_v52 = vmul.f32 %v8466_v43, %v3241_v28  ;;  %v157_v28 = vld [vmem:[%s10166_s1 + $0xb0] sm:$0xff] }
 0x9d4   :  { %v3282_v19 = vmul.f32 %v7187_v8, %v3274_v32  ;;  %8048 = vmatprep.subr.bf16.mxu1 %v8047_v27  ;;  %v8051_v25 = vpack.c.bf16 %v158_v57, %v157_v28 }
 0x9d5   :  { %v3281_v39 = vmul.f32 %v7187_v8, %v3273_v52  ;;  %8050 = vmatpush3.bf16.msra.mxu1 %v8047_v27 }
 0x9d6   :  { %v3290_v62 = vadd.f32 %v7188_v30, %v3282_v19  ;;  %8052 = vmatprep.subr.bf16.mxu1 %v8051_v25 }
 0x9d7   :  { %v3289_v5 = vadd.f32 %v7188_v30, %v3281_v39 }
 0x9d9   :  { %7680 = vmatprep.mubr.msk.f32.mxu0 %vm170_vm1, %v3289_v5  ;;  %8054 = vmatpush3.bf16.msra.mxu1 %v8051_v25 }
 0x9da   :  { %7681 = vmatmul.mubr.msk.f32.vlgmr.msra.gmra.mrb[26].mxu0 %vm170_vm1, %v3290_v62  ;;  %8056 = vmatprep.subr.bf16.mxu1 %v8055_v3 }
 0x9dc   :  { %v3257_v47 = vpop.xlane.xlu0 %3256 }
 0x9dd   :  { %v3263_v6 = vmul.f32 0.03125, %v3257_v47  ;;  %8058 = vmatpush3.bf16.msra.mxu1 %v8055_v3 }
 0x9df   :  { %v3267_v18 = vadd.f32 1e-05, %v3263_v6 }
 0x9e0   :  { %v3260_v13 = vpop.xlane.xlu1 %3259 }
 0x9e1   :  { %8467 = vrsqrt.f32 %v3267_v18  ;;  %v3264_v41 = vmul.f32 0.03125, %v3260_v13 }
 0x9e3   :  { %v3268_v15 = vadd.f32 1e-05, %v3264_v41 }
 0x9e5   :  { %8469 = vrsqrt.f32 %v3268_v15 }
 0x9eb   :  { %v8468_v31 = vpop.eup %8467 }
 0x9ec   :  { %v3275_v16 = vmul.f32 %v8468_v31, %v3243_v4  ;;  %v162_v4 = vld [vmem:[%s10166_s1 + $0xd8] sm:$0xff] }
 0x9ed   :  { %v8059_v26 = vpack.c.bf16 %v162_v4, %v161_v34  ;;  %v7194_v34 = vld [vmem:[%s10167_s2 + $0x8] ss:$0 sm:$0xff] }
 0x9ee   :  { %v3283_v38 = vmul.f32 %v7187_v8, %v3275_v16 }
 0x9ef   :  { %v8470_v63 = vpop.eup %8469  ;;  %8060 = vmatprep.subr.bf16.mxu1 %v8059_v26 }
 0x9f0   :  { %v3291_v48 = vadd.f32 %v7188_v30, %v3283_v38  ;;  %v3276_v54 = vmul.f32 %v8470_v63, %v3244_v37  ;;  %8062 = vmatpush3.bf16.msra.mxu1 %v8059_v26  ;;  %v8063_v37 = vpack.c.bf16 %v164_v2, %v163_v33 }
 0x9f2   :  { %7683 = vmatprep.mubr.msk.f32.mxu0 %vm170_vm1, %v3291_v48  ;;  %v3284_v24 = vmul.f32 %v7187_v8, %v3276_v54  ;;  %8064 = vmatprep.subr.bf16.mxu1 %v8063_v37 }
 0x9f4   :  { %v3292_v36 = vadd.f32 %v7188_v30, %v3284_v24  ;;  %8066 = vmatpush3.bf16.msra.mxu1 %v8063_v37 }
 0x9f5   :  { %8068 = vmatprep.subr.bf16.mxu1 %v8067_v50 }
 0x9f6   :  { %7684 = vmatmul.mubr.msk.f32.gmra.mrb[28].mxu0 %vm170_vm1, %v3292_v36 }
 0x9f8   :  { %8070 = vmatpush3.bf16.msra.mxu1 %v8067_v50 }
 0x9f9   :  { %8072 = vmatprep.subr.bf16.mxu1 %v8071_v51 }
 0x9fc   :  { %8074 = vmatpush3.bf16.msra.mxu1 %v8071_v51 }
 0xaad   :  { %v7682_v9 = vpop.f32.mrb[26].mxu0 }
 0xaae   :  { %v3381_v17 = vadd.f32 %v7682_v9, %v7189_v12  ;;  %v3375_v46 = vpop.f32.mrb[27].mxu0 }
 0xaaf   :  { %v3376_v29 = vadd.f32 %v7189_v12, %v3375_v46 }
 0xab0   :  { %v3395_v45 = vmul.f32 %v3381_v17, %v3381_v17 }
 0xab1   :  { %v3394_v35 = vmul.f32 %v3376_v29, %v3376_v29 }
 0xab2   :  { %v3399_v59 = vmul.f32 %v3395_v45, %v3381_v17 }
 0xab3   :  { %v3398_v44 = vmul.f32 %v3394_v35, %v3376_v29 }
 0xab4   :  { %v3403_v10 = vmul.f32 0.044715, %v3399_v59 }
 0xab5   :  { %v3402_v8 = vmul.f32 0.044715, %v3398_v44 }
 0xab6   :  { %v3407_v43 = vadd.f32 %v3403_v10, %v3381_v17 }
 0xab7   :  { %v3406_v32 = vadd.f32 %v3402_v8, %v3376_v29 }
 0xab8   :  { %v3411_v52 = vmul.f32 0.7978846, %v3407_v43 }
 0xab9   :  { %v3410_v30 = vmul.f32 0.7978846, %v3406_v32 }
 0xaba   :  { %8471 = vtanh.f32 %v3411_v52 }
 0xabb   :  { %8473 = vtanh.f32 %v3410_v30 }
 0xac4   :  { %v8472_v19 = vpop.eup %8471 }
 0xac5   :  { %v8474_v39 = vpop.eup %8473  ;;  %v3419_v5 = vadd.f32 1.0, %v8472_v19 }
 0xac6   :  { %v3418_v62 = vadd.f32 1.0, %v8474_v39 }
 0xac7   :  { %v3423_v47 = vmul.f32 0.5, %v3419_v5 }
 0xac8   :  { %v3422_v6 = vmul.f32 0.5, %v3418_v62 }
 0xac9   :  { %v7685_v18 = vpop.f32.mrb[28].mxu0  ;;  %v3427_v31 = vmul.f32 %v3423_v47, %v3381_v17 }
 0xaca   :  { %v3391_v13 = vadd.f32 %v7685_v18, %v7189_v12  ;;  %v3385_v41 = vpop.f32.mrb[29].mxu0  ;;  %v3426_v15 = vmul.f32 %v3422_v6, %v3376_v29  ;;  %v3529_v18 = vld [vmem:[%s10166_s1 + $0x110] sm:$0xff] }
 0xacb   :  { %v3386_v16 = vadd.f32 %v7189_v12, %v3385_v41  ;;  %v3531_v41 = vld [vmem:[%s10166_s1 + $0x120] sm:$0xff] }
 0xacc   :  { %v3397_v38 = vmul.f32 %v3391_v13, %v3391_v13  ;;  %7718 = vmatprep.mubr.f32.mxu1 %v3426_v15 }
 0xacd   :  { %v3396_v63 = vmul.f32 %v3386_v16, %v3386_v16  ;;  %7719 = vmatmul.mubr.f32.vlgmr.msra.gmra.mrb[18].mxu1 %v3427_v31  ;;  %v3532_v31 = vld [vmem:[%s10166_s1 + $0x128] sm:$0xff] }
 0xace   :  { %v3401_v48 = vmul.f32 %v3397_v38, %v3391_v13 }
 0xacf   :  { %v3400_v54 = vmul.f32 %v3396_v63, %v3386_v16 }
 0xad0   :  { %v3405_v24 = vmul.f32 0.044715, %v3401_v48 }
 0xad1   :  { %v3404_v36 = vmul.f32 0.044715, %v3400_v54 }
 0xad2   :  { %v3409_v61 = vadd.f32 %v3405_v24, %v3391_v13 }
 0xad3   :  { %v3408_v0 = vadd.f32 %v3404_v36, %v3386_v16 }
 0xad4   :  { %v3413_v1 = vmul.f32 0.7978846, %v3409_v61 }
 0xad5   :  { %v3412_v23 = vmul.f32 0.7978846, %v3408_v0  ;;  %v7195_v0 = vld [vmem:[%s10167_s2 + $0x9] ss:$0 sm:$0xff] }
 0xad6   :  { %8475 = vtanh.f32 %v3413_v1 }
 0xad7   :  { %8477 = vtanh.f32 %v3412_v23 }
 0xae0   :  { %v8476_v56 = vpop.eup %8475 }
 0xae1   :  { %v8478_v27 = vpop.eup %8477  ;;  %v3421_v28 = vadd.f32 1.0, %v8476_v56 }
 0xae2   :  { %v3420_v57 = vadd.f32 1.0, %v8478_v27  ;;  %v7196_v27 = vld [vmem:[%s10167_s2 + $0xa] ss:$0 sm:$0xff] }
 0xae3   :  { %v3425_v25 = vmul.f32 0.5, %v3421_v28 }
 0xae4   :  { %v3424_v14 = vmul.f32 0.5, %v3420_v57 }
 0xae5   :  { %v3429_v3 = vmul.f32 %v3425_v25, %v3391_v13  ;;  %v3530_v13 = vld [vmem:[%s10166_s1 + $0x118] sm:$0xff] }
 0xae6   :  { %v3428_v60 = vmul.f32 %v3424_v14, %v3386_v16  ;;  %v8075_v15 = vpack.c.bf16 %v3530_v13, %v3529_v18  ;;  %v8079_v16 = vpack.c.bf16 %v3532_v31, %v3531_v41 }
 0xae8   :  { %7721 = vmatprep.mubr.f32.mxu1 %v3428_v60  ;;  %8076 = vmatprep.subr.bf16.mxu0 %v8075_v15 }
 0xae9   :  { %7722 = vmatmul.mubr.f32.gmra.mrb[20].mxu1 %v3429_v3  ;;  %8078 = vmatpush3.bf16.msra.mxu0 %v8075_v15 }
 0xaea   :  { %8080 = vmatprep.subr.bf16.mxu0 %v8079_v16 }
 0xaed   :  { %8082 = vmatpush3.bf16.msra.mxu0 %v8079_v16 }
 0xba0   :  { %v7720_v4 = vpop.f32.mrb[18].mxu1 }
 0xba1   :  { %v3516_v26 = vadd.f32 %v7720_v4, %v9305_v21  ;;  %v3496_v33 = vpop.f32.mrb[19].mxu1 }
 0xba2   :  { %v3515_v2 = vadd.f32 %v3496_v33, %v9307_v40 }
 0xba3   :  { %v9409_v37 = vadd.f32 %v7194_v34, %v3516_v26 }
 0xba4   :  { %v9411_v11 = vadd.f32 %v7194_v34, %v3515_v2 }
 0xba5   :  { %v3566_v53 = vsel %vm170_vm1, %v9409_v37, 0.0 }
 0xba6   :  { %3567 = vadd.xlane.f32.xlu1 %v3566_v53  ;;  %v3563_v22 = vsel %vm170_vm1, %v9411_v11, 0.0 }
 0xba7   :  { %3564 = vadd.xlane.f32.xlu0 %v3563_v22 }
 0xbbc   :  { %v7723_v50 = vpop.f32.mrb[20].mxu1 }
 0xbbd   :  { %v3518_v7 = vadd.f32 %v7723_v50, %v9317_v20  ;;  %v3506_v51 = vpop.f32.mrb[21].mxu1 }
 0xbbe   :  { %v3517_v21 = vadd.f32 %v3506_v51, %v9315_v55 }
 0xbbf   :  { %v9419_v12 = vadd.f32 %v7194_v34, %v3518_v7 }
 0xbc0   :  { %v9421_v40 = vadd.f32 %v7194_v34, %v3517_v21 }
 0xbc1   :  { %v3572_v9 = vsel %vm170_vm1, %v9419_v12, 0.0 }
 0xbc2   :  { %3573 = vadd.xlane.f32.xlu1 %v3572_v9  ;;  %v3569_v17 = vsel %vm170_vm1, %v9421_v40, 0.0 }
 0xbc3   :  { %3570 = vadd.xlane.f32.xlu0 %v3569_v17  ;;  %v7197_v17 = vld [vmem:[%s10167_s2 + $0xb] ss:$0 sm:$0xff] }
 0xc33   :  { %v3568_v46 = vpop.xlane.xlu1 %3567 }
 0xc34   :  { %v3576_v29 = vmul.f32 0.03125, %v3568_v46  ;;  %v3565_v45 = vpop.xlane.xlu0 %3564 }
 0xc35   :  { %v3575_v35 = vmul.f32 0.03125, %v3565_v45 }
 0xc36   :  { %v3580_v20 = vsub.f32 %v9409_v37, %v3576_v29 }
 0xc37   :  { %v3579_v55 = vsub.f32 %v9411_v11, %v3575_v35 }
 0xc38   :  { %v3584_v59 = vmul.f32 %v3580_v20, %v3580_v20 }
 0xc39   :  { %v3583_v44 = vmul.f32 %v3579_v55, %v3579_v55 }
 0xc3a   :  { %v3590_v10 = vsel %vm170_vm1, %v3584_v59, 0.0 }
 0xc3b   :  { %3591 = vadd.xlane.f32.xlu1 %v3590_v10  ;;  %v3587_v8 = vsel %vm170_vm1, %v3583_v44, 0.0 }
 0xc3c   :  { %3588 = vadd.xlane.f32.xlu0 %v3587_v8 }
 0xc4f   :  { %v3574_v43 = vpop.xlane.xlu1 %3573 }
 0xc50   :  { %v3578_v32 = vmul.f32 0.03125, %v3574_v43  ;;  %v3571_v52 = vpop.xlane.xlu0 %3570 }
 0xc51   :  { %v3577_v30 = vmul.f32 0.03125, %v3571_v52 }
 0xc52   :  { %v3582_v19 = vsub.f32 %v9419_v12, %v3578_v32 }
 0xc53   :  { %v3581_v39 = vsub.f32 %v9421_v40, %v3577_v30 }
 0xc54   :  { %v3586_v5 = vmul.f32 %v3582_v19, %v3582_v19 }
 0xc55   :  { %v3585_v62 = vmul.f32 %v3581_v39, %v3581_v39 }
 0xc56   :  { %v3596_v47 = vsel %vm170_vm1, %v3586_v5, 0.0 }
 0xc57   :  { %3597 = vadd.xlane.f32.xlu1 %v3596_v47  ;;  %v3593_v6 = vsel %vm170_vm1, %v3585_v62, 0.0 }
 0xc58   :  { %3594 = vadd.xlane.f32.xlu0 %v3593_v6 }
 0xcc8   :  { %v3592_v38 = vpop.xlane.xlu1 %3591 }
 0xcc9   :  { %v3600_v63 = vmul.f32 0.03125, %v3592_v38  ;;  %v3589_v48 = vpop.xlane.xlu0 %3588 }
 0xcca   :  { %v3599_v54 = vmul.f32 0.03125, %v3589_v48 }
 0xccb   :  { %v3604_v24 = vadd.f32 1e-05, %v3600_v63 }
 0xccc   :  { %v3603_v36 = vadd.f32 1e-05, %v3599_v54 }
 0xccd   :  { %8479 = vrsqrt.f32 %v3604_v24 }
 0xcce   :  { %8481 = vrsqrt.f32 %v3603_v36 }
 0xcd7   :  { %v8480_v61 = vpop.eup %8479 }
 0xcd8   :  { %v8482_v1 = vpop.eup %8481  ;;  %v3612_v23 = vmul.f32 %v8480_v61, %v3580_v20 }
 0xcd9   :  { %v3611_v56 = vmul.f32 %v8482_v1, %v3579_v55 }
 0xcda   :  { %v3620_v28 = vmul.f32 %v7195_v0, %v3612_v23 }
 0xcdb   :  { %v3619_v57 = vmul.f32 %v7195_v0, %v3611_v56 }
 0xcdc   :  { %v3628_v14 = vadd.f32 %v7196_v27, %v3620_v28 }
 0xcdd   :  { %v3627_v25 = vadd.f32 %v7196_v27, %v3619_v57 }
 0xcdf   :  { %7732 = vmatprep.mubr.msk.f32.mxu0 %vm170_vm1, %v3627_v25 }
 0xce0   :  { %7733 = vmatmul.mubr.msk.f32.vlgmr.msra.gmra.mrb[30].mxu0 %vm170_vm1, %v3628_v14 }
 0xce4   :  { %v3598_v60 = vpop.xlane.xlu1 %3597 }
 0xce5   :  { %v3602_v3 = vmul.f32 0.03125, %v3598_v60  ;;  %v3595_v34 = vpop.xlane.xlu0 %3594 }
 0xce6   :  { %v3601_v4 = vmul.f32 0.03125, %v3595_v34 }
 0xce7   :  { %v3606_v26 = vadd.f32 1e-05, %v3602_v3 }
 0xce8   :  { %v3605_v33 = vadd.f32 1e-05, %v3601_v4 }
 0xce9   :  { %8483 = vrsqrt.f32 %v3606_v26 }
 0xcea   :  { %8485 = vrsqrt.f32 %v3605_v33 }
 0xcf3   :  { %v8484_v2 = vpop.eup %8483 }
 0xcf4   :  { %v8486_v53 = vpop.eup %8485  ;;  %v3614_v22 = vmul.f32 %v8484_v2, %v3582_v19 }
 0xcf5   :  { %v3613_v50 = vmul.f32 %v8486_v53, %v3581_v39 }
 0xcf6   :  { %v3622_v7 = vmul.f32 %v7195_v0, %v3614_v22 }
 0xcf7   :  { %v3621_v51 = vmul.f32 %v7195_v0, %v3613_v50 }
 0xcf8   :  { %v3630_v9 = vadd.f32 %v7196_v27, %v3622_v7 }
 0xcf9   :  { %v3629_v21 = vadd.f32 %v7196_v27, %v3621_v51 }
 0xcfb   :  { %7735 = vmatprep.mubr.msk.f32.mxu0 %vm170_vm1, %v3629_v21 }
 0xcfc   :  { %7736 = vmatmul.mubr.msk.f32.gmra.mrb[32].mxu0 %vm170_vm1, %v3630_v9 }
 0xdb3   :  { %v7734_v46 = vpop.f32.mrb[30].mxu0 }
 0xdb4   :  { %v3719_v29 = vadd.f32 %v7734_v46, %v7197_v17  ;;  %v3713_v45 = vpop.f32.mrb[31].mxu0 }
 0xdb5   :  { %v3714_v35 = vadd.f32 %v7197_v17, %v3713_v45 }
 0xdb6   :  { %3738 = vrot.lane.b32.xlu1 %v3719_v29, %s8599_s24 }
 0xdb7   :  { %3736 = vrot.lane.b32.xlu0 %v3714_v35, %s8599_s24 }
 0xdba   :  { %3750 = vrot.lane.b32.xlu1 %v3719_v29, %s8600_s25 }
 0xdbb   :  { %3760 = vrot.lane.b32.xlu0 %v3714_v35, %s8601_s26 }
 0xdbe   :  { %3748 = vrot.lane.b32.xlu1 %v3714_v35, %s8600_s25 }
 0xdc2   :  { %3762 = vrot.lane.b32.xlu1 %v3719_v29, %s8601_s26 }
 0xdcf   :  { %v7737_v20 = vpop.f32.mrb[32].mxu0 }
 0xdd0   :  { %v9466_v55 = vadd.f32 %v7737_v20, %v7197_v17  ;;  %v3723_v59 = vpop.f32.mrb[33].mxu0 }
 0xdd1   :  { %v9468_v44 = vadd.f32 %v7197_v17, %v3723_v59 }
 0xdd2   :  { %3742 = vrot.lane.b32.xlu1 %v9466_v55, %s8599_s24 }
 0xdd3   :  { %3740 = vrot.lane.b32.xlu0 %v9468_v44, %s8599_s24 }
 0xdd6   :  { %3754 = vrot.lane.b32.xlu1 %v9466_v55, %s8600_s25 }
 0xdd7   :  { %3752 = vrot.lane.b32.xlu0 %v9468_v44, %s8600_s25 }
 0xdda   :  { %3766 = vrot.lane.b32.xlu1 %v9466_v55, %s8601_s26 }
 0xddb   :  { %3764 = vrot.lane.b32.xlu0 %v9468_v44, %s8601_s26 }
 0xe28   :  { %v3739_v10 = vpop.permute.xlu1 %3738 }
 0xe29   :  { %v3737_v8 = vpop.permute.xlu0 %3736 }
 0xe2c   :  { %v3751_v43 = vpop.permute.xlu1 %3750 }
 0xe2d   :  { %v3761_v32 = vpop.permute.xlu0 %3760  ;;  %v3840_v13 = vcombine.low %v3719_v29, %v3751_v43  ;;  %v3841_v41 = vcombine.high %v3719_v29, %v3751_v43 }
 0xe2e   :  { %v3788_v52 = vcombine.low %v3737_v8, %v3761_v32  ;;  %v3789_v30 = vcombine.high %v3737_v8, %v3761_v32 }
 0xe2f   :  { %v3848_v1 = vrot.slane %v3840_v13, %v8742_v49  ;;  %v3855_v23 = vrot.slane %v3841_v41, %v8742_v49 }
 0xe30   :  { %v3749_v19 = vpop.permute.xlu1 %3748  ;;  %v3796_v62 = vrot.slane %v3788_v52, %v8742_v49  ;;  %v3803_v47 = vrot.slane %v3789_v30, %v8742_v49 }
 0xe31   :  { %v3772_v39 = vcombine.low %v3714_v35, %v3749_v19  ;;  %v3773_v5 = vcombine.high %v3714_v35, %v3749_v19 }
 0xe33   :  { %v3780_v6 = vrot.slane %v3772_v39, %v8742_v49  ;;  %v3787_v18 = vrot.slane %v3773_v5, %v8742_v49 }
 0xe34   :  { %v3763_v15 = vpop.permute.xlu1 %3762 }
 0xe35   :  { %v3804_v31 = vcombine.low %v3780_v6, %v3796_v62  ;;  %v3805_v16 = vcombine.high %v3780_v6, %v3796_v62  ;;  %v3820_v38 = vcombine.low %v3787_v18, %v3803_v47  ;;  %v3821_v63 = vcombine.high %v3787_v18, %v3803_v47 }
 0xe36   :  { %v3856_v48 = vcombine.low %v3739_v10, %v3763_v15  ;;  %v3857_v54 = vcombine.high %v3739_v10, %v3763_v15 }
 0xe37   :  { %v3812_v24 = vrot.slane %v3804_v31, %v8744_v58  ;;  %v3819_v36 = vrot.slane %v3805_v16, %v8744_v58  ;;  %v3828_v61 = vrot.slane %v3820_v38, %v8744_v58  ;;  %v3835_v0 = vrot.slane %v3821_v63, %v8744_v58 }
 0xe38   :  { %v3864_v56 = vrot.slane %v3856_v48, %v8742_v49  ;;  %v3871_v27 = vrot.slane %v3857_v54, %v8742_v49 }
 0xe39   :  { %v4044_v28 = vcombine.low %v3812_v24, %v3819_v36  ;;  %v7202_v57 = vcombine.high %v3812_v24, %v3819_v36  ;;  %v4060_v25 = vcombine.low %v3828_v61, %v3835_v0  ;;  %v7203_v14 = vcombine.high %v3828_v61, %v3835_v0 }
 0xe3a   :  { %v3872_v60 = vcombine.low %v3848_v1, %v3864_v56  ;;  %v3873_v3 = vcombine.high %v3848_v1, %v3864_v56  ;;  %v3888_v34 = vcombine.low %v3855_v23, %v3871_v27  ;;  %v3889_v4 = vcombine.high %v3855_v23, %v3871_v27 }
 0xe3b   :  { %v4051_v26 = vrot.slane %v4044_v28, %v8742_v49  ;;  %v4059_v33 = vrot.slane %v7202_v57, %v8742_v49  ;;  %v4067_v2 = vrot.slane %v4060_v25, %v8742_v49  ;;  %v4075_v53 = vrot.slane %v7203_v14, %v8742_v49 }
 0xe3c   :  { %v3880_v22 = vrot.slane %v3872_v60, %v8744_v58  ;;  %v3887_v50 = vrot.slane %v3873_v3, %v8744_v58  ;;  %v3896_v7 = vrot.slane %v3888_v34, %v8744_v58  ;;  %v3903_v51 = vrot.slane %v3889_v4, %v8744_v58 }
 0xe3d   :  { %v4076_v21 = vcombine.low %v4051_v26, %v4059_v33  ;;  %v4092_v9 = vcombine.low %v4067_v2, %v4075_v53  ;;  %v4077_v17 = vcombine.high %v4051_v26, %v4059_v33  ;;  %v4093_v46 = vcombine.high %v4067_v2, %v4075_v53 }
 0xe3e   :  { %v4112_v29 = vcombine.low %v3880_v22, %v3887_v50  ;;  %v7204_v45 = vcombine.high %v3880_v22, %v3887_v50  ;;  %v4128_v35 = vcombine.low %v3896_v7, %v3903_v51  ;;  %v7205_v20 = vcombine.high %v3896_v7, %v3903_v51 }
 0xe3f   :  { %v4084_v59 = vrot.slane %v4076_v21, %v8744_v58  ;;  %v4100_v10 = vrot.slane %v4092_v9, %v8744_v58  ;;  %v4091_v8 = vrot.slane %v4077_v17, %v8744_v58  ;;  %v4107_v43 = vrot.slane %v4093_v46, %v8744_v58 }
 0xe40   :  { %v4119_v32 = vrot.slane %v4112_v29, %v8742_v49  ;;  %v4127_v52 = vrot.slane %v7204_v45, %v8742_v49  ;;  %v4135_v30 = vrot.slane %v4128_v35, %v8742_v49  ;;  %v4143_v19 = vrot.slane %v7205_v20, %v8742_v49 }
 0xe41   :  { %v4108_v39 = vcombine.low %v4084_v59, %v4100_v10  ;;  %v4111_v5 = vcombine.high %v4091_v8, %v4107_v43  ;;  %v9516_v63 = vcombine.high %v4084_v59, %v4100_v10  ;;  %v9533_v56 = vcombine.low %v4091_v8, %v4107_v43 }
 0xe42   :  { %v4144_v62 = vcombine.low %v4119_v32, %v4127_v52  ;;  %v4145_v47 = vcombine.high %v4119_v32, %v4127_v52  ;;  %v4160_v6 = vcombine.low %v4135_v30, %v4143_v19  ;;  %v4161_v18 = vcombine.high %v4135_v30, %v4143_v19 }
 0xe43   :  { %7742 = vmatprep.mubr.msk.f32.mxu0 %vm931_vm2, %v4108_v39  ;;  %7763 = vmatprep.mubr.msk.f32.mxu1 %vm931_vm2, %v4111_v5 }
 0xe44   :  { %v3743_v13 = vpop.permute.xlu1 %3742  ;;  %v4152_v41 = vrot.slane %v4144_v62, %v8744_v58  ;;  %v4168_v15 = vrot.slane %v4160_v6, %v8744_v58  ;;  %v4159_v31 = vrot.slane %v4145_v47, %v8744_v58  ;;  %v4175_v16 = vrot.slane %v4161_v18, %v8744_v58 }
 0xe45   :  { %v3741_v38 = vpop.permute.xlu0 %3740 }
 0xe46   :  { %v9518_v48 = vcombine.high %v4152_v41, %v4168_v15  ;;  %v9520_v54 = vcombine.low %v4152_v41, %v4168_v15  ;;  %v9529_v0 = vcombine.high %v4159_v31, %v4175_v16  ;;  %v9531_v1 = vcombine.low %v4159_v31, %v4175_v16 }
 0xe48   :  { %v3755_v24 = vpop.permute.xlu1 %3754  ;;  %v9524_v36 = vpack.i.bf16 %v9518_v48, %v9516_v63  ;;  %v9527_v61 = vpack.i.bf16 %v9520_v54, %v4108_v39  ;;  %v9544_v60 = vpack.i.bf16 %v9529_v0, %v4111_v5  ;;  %v9548_v3 = vpack.i.bf16 %v9531_v1, %v9533_v56 }
 0xe49   :  { %v3753_v23 = vpop.permute.xlu0 %3752  ;;  %v3976_v27 = vcombine.low %v9466_v55, %v3755_v24  ;;  %v3977_v28 = vcombine.high %v9466_v55, %v3755_v24 }
 0xe4a   :  { %8317 = vrot.lane.b32.xlu1 %v9524_v36, %s8604_s27  ;;  %8312 = vrot.lane.b32.xlu0 %v9527_v61, %s8604_s27  ;;  %v3908_v57 = vcombine.low %v9468_v44, %v3753_v23  ;;  %v3909_v25 = vcombine.high %v9468_v44, %v3753_v23 }
 0xe4b   :  { %v3984_v44 = vrot.slane %v3976_v27, %v8742_v49  ;;  %v3991_v2 = vrot.slane %v3977_v28, %v8742_v49 }
 0xe4c   :  { %v3767_v14 = vpop.permute.xlu1 %3766  ;;  %v3916_v50 = vrot.slane %v3908_v57, %v8742_v49  ;;  %v3923_v7 = vrot.slane %v3909_v25, %v8742_v49 }
 0xe4d   :  { %v3992_v34 = vcombine.low %v3743_v13, %v3767_v14  ;;  %v3993_v4 = vcombine.high %v3743_v13, %v3767_v14  ;;  %v3765_v26 = vpop.permute.xlu0 %3764 }
 0xe4e   :  { %8327 = vrot.lane.b32.xlu1 %v9544_v60, %s8604_s27  ;;  %8322 = vrot.lane.b32.xlu0 %v9548_v3, %s8604_s27  ;;  %v3924_v55 = vcombine.low %v3741_v38, %v3765_v26  ;;  %v3925_v33 = vcombine.high %v3741_v38, %v3765_v26 }
 0xe4f   :  { %v4000_v53 = vrot.slane %v3992_v34, %v8742_v49  ;;  %v4007_v22 = vrot.slane %v3993_v4, %v8742_v49 }
 0xe50   :  { %v3932_v51 = vrot.slane %v3924_v55, %v8742_v49  ;;  %v3939_v21 = vrot.slane %v3925_v33, %v8742_v49 }
 0xe51   :  { %v4008_v9 = vcombine.low %v3984_v44, %v4000_v53  ;;  %v4009_v17 = vcombine.high %v3984_v44, %v4000_v53  ;;  %v4024_v46 = vcombine.low %v3991_v2, %v4007_v22  ;;  %v4025_v29 = vcombine.high %v3991_v2, %v4007_v22 }
 0xe52   :  { %v3940_v45 = vcombine.low %v3916_v50, %v3932_v51  ;;  %v3941_v35 = vcombine.high %v3916_v50, %v3932_v51  ;;  %v3956_v20 = vcombine.low %v3923_v7, %v3939_v21  ;;  %v3957_v59 = vcombine.high %v3923_v7, %v3939_v21 }
 0xe53   :  { %v4016_v10 = vrot.slane %v4008_v9, %v8744_v58  ;;  %v4023_v8 = vrot.slane %v4009_v17, %v8744_v58  ;;  %v4032_v43 = vrot.slane %v4024_v46, %v8744_v58  ;;  %v4039_v32 = vrot.slane %v4025_v29, %v8744_v58 }
 0xe54   :  { %v3948_v52 = vrot.slane %v3940_v45, %v8744_v58  ;;  %v3955_v30 = vrot.slane %v3941_v35, %v8744_v58  ;;  %v3964_v19 = vrot.slane %v3956_v20, %v8744_v58  ;;  %v3971_v39 = vrot.slane %v3957_v59, %v8744_v58 }
 0xe55   :  { %v4248_v5 = vcombine.low %v4016_v10, %v4023_v8  ;;  %v7208_v62 = vcombine.high %v4016_v10, %v4023_v8  ;;  %v4264_v47 = vcombine.low %v4032_v43, %v4039_v32  ;;  %v7209_v6 = vcombine.high %v4032_v43, %v4039_v32 }
 0xe56   :  { %v4180_v18 = vcombine.low %v3948_v52, %v3955_v30  ;;  %v7206_v13 = vcombine.high %v3948_v52, %v3955_v30  ;;  %v4196_v41 = vcombine.low %v3964_v19, %v3971_v39  ;;  %v7207_v15 = vcombine.high %v3964_v19, %v3971_v39 }
 0xe57   :  { %v4255_v31 = vrot.slane %v4248_v5, %v8742_v49  ;;  %v4263_v16 = vrot.slane %v7208_v62, %v8742_v49  ;;  %v4271_v38 = vrot.slane %v4264_v47, %v8742_v49  ;;  %v4279_v24 = vrot.slane %v7209_v6, %v8742_v49 }
 0xe58   :  { %v4187_v23 = vrot.slane %v4180_v18, %v8742_v49  ;;  %v4195_v27 = vrot.slane %v7206_v13, %v8742_v49  ;;  %v4203_v28 = vrot.slane %v4196_v41, %v8742_v49  ;;  %v4211_v57 = vrot.slane %v7207_v15, %v8742_v49 }
 0xe59   :  { %v4280_v25 = vcombine.low %v4255_v31, %v4263_v16  ;;  %v4281_v14 = vcombine.high %v4255_v31, %v4263_v16  ;;  %v4296_v34 = vcombine.low %v4271_v38, %v4279_v24  ;;  %v4297_v4 = vcombine.high %v4271_v38, %v4279_v24 }
 0xe5a   :  { %v4212_v26 = vcombine.low %v4187_v23, %v4195_v27  ;;  %v4213_v55 = vcombine.high %v4187_v23, %v4195_v27  ;;  %v4228_v33 = vcombine.low %v4203_v28, %v4211_v57  ;;  %v4229_v44 = vcombine.high %v4203_v28, %v4211_v57 }
 0xe5b   :  { %v4288_v2 = vrot.slane %v4280_v25, %v8744_v58  ;;  %v4304_v53 = vrot.slane %v4296_v34, %v8744_v58  ;;  %v4295_v22 = vrot.slane %v4281_v14, %v8744_v58  ;;  %v4311_v50 = vrot.slane %v4297_v4, %v8744_v58 }
 0xe5c   :  { %v4220_v7 = vrot.slane %v4212_v26, %v8744_v58  ;;  %v4236_v51 = vrot.slane %v4228_v33, %v8744_v58  ;;  %v4227_v21 = vrot.slane %v4213_v55, %v8744_v58  ;;  %v4243_v9 = vrot.slane %v4229_v44, %v8744_v58 }
 0xe5d   :  { %v9586_v17 = vcombine.high %v4288_v2, %v4304_v53  ;;  %v9588_v46 = vcombine.low %v4288_v2, %v4304_v53  ;;  %v9592_v35 = vcombine.high %v4295_v22, %v4311_v50  ;;  %v9594_v20 = vcombine.low %v4295_v22, %v4311_v50 }
 0xe5e   :  { %v4245_v29 = vcombine.high %v4220_v7, %v4236_v51  ;;  %v9590_v45 = vcombine.low %v4220_v7, %v4236_v51  ;;  %v9603_v8 = vcombine.high %v4227_v21, %v4243_v9  ;;  %v9605_v43 = vcombine.low %v4227_v21, %v4243_v9 }
 0xe60   :  { %v9597_v59 = vpack.i.bf16 %v9586_v17, %v4245_v29  ;;  %v9601_v10 = vpack.i.bf16 %v9588_v46, %v9590_v45  ;;  %v9613_v32 = vpack.i.bf16 %v9592_v35, %v9603_v8  ;;  %v9617_v52 = vpack.i.bf16 %v9594_v20, %v9605_v43 }
 0xe62   :  { %8337 = vrot.lane.b32.xlu1 %v9597_v59, %s8604_s27  ;;  %8332 = vrot.lane.b32.xlu0 %v9601_v10, %s8604_s27 }
 0xe66   :  { %8347 = vrot.lane.b32.xlu1 %v9613_v32, %s8604_s27  ;;  %8342 = vrot.lane.b32.xlu0 %v9617_v52, %s8604_s27 }
 0xe6a   :  { %8357 = vrot.lane.b32.xlu1 %v9524_v36, %s8605_s28  ;;  %8352 = vrot.lane.b32.xlu0 %v9527_v61, %s8605_s28 }
 0xe6e   :  { %8362 = vrot.lane.b32.xlu1 %v9548_v3, %s8605_s28 }
 0xe72   :  { %8367 = vrot.lane.b32.xlu1 %v9544_v60, %s8605_s28 }
 0xebc   :  { %v8318_v30 = vpop.permute.xlu1 %8317  ;;  %v8313_v19 = vpop.permute.xlu0 %8312 }
 0xebd   :  { %v8320_v39 = vunpack.i.h.bf16 %v8318_v30  ;;  %v8319_v5 = vunpack.i.l.bf16 %v8318_v30  ;;  %v8315_v62 = vunpack.i.h.bf16 %v8313_v19  ;;  %v8314_v47 = vunpack.i.l.bf16 %v8313_v19 }
 0xebf   :  { %v8083_v6 = vpack.c.bf16 %v8315_v62, %v8314_v47  ;;  %v8089_v13 = vpack.c.bf16 %v8320_v39, %v8319_v5 }
 0xec0   :  { %v8328_v18 = vpop.permute.xlu1 %8327  ;;  %v8323_v61 = vpop.permute.xlu0 %8322 }
 0xec1   :  { %v8330_v41 = vunpack.i.h.bf16 %v8328_v18  ;;  %v8329_v36 = vunpack.i.l.bf16 %v8328_v18  ;;  %8085 = vmatprep.subr.msk.bf16.mxu0 %vm8930_vm3, %v8083_v6  ;;  %v8325_v60 = vunpack.i.h.bf16 %v8323_v61  ;;  %v8324_v15 = vunpack.i.l.bf16 %v8323_v61 }
 0xec2   :  { %8088 = vmatpush3.bf16.xpose.msk.msra.mxu0 %vm8930_vm3, %v8083_v6 }
 0xec3   :  { %v8101_v3 = vpack.c.bf16 %v8330_v41, %v8329_v36  ;;  %8091 = vmatprep.subr.msk.bf16.mxu0 %vm8930_vm3, %v8089_v13  ;;  %v8095_v31 = vpack.c.bf16 %v8325_v60, %v8324_v15 }
 0xec5   :  { %8103 = vmatprep.subr.msk.bf16.mxu1 %vm8930_vm3, %v8101_v3 }
 0xec6   :  { %8106 = vmatpush3.bf16.xpose.msk.msra.mxu1 %vm8930_vm3, %v8101_v3 }
 0xec9   :  { %7743 = vmatmul.mubr.msk.f32.vlgmr.msra.gmra.mrb[34].mxu0 %vm931_vm2, %v9520_v54 }
 0xeca   :  { %8094 = vmatpush3.bf16.xpose.msk.msra.mxu0 %vm8930_vm3, %v8089_v13  ;;  %7749 = vmatprep.mubr.msk.f32.mxu0 %vm931_vm2, %v9516_v63 }
 0xecb   :  { %8097 = vmatprep.subr.msk.bf16.mxu0 %vm8930_vm3, %v8095_v31 }
 0xecd   :  { %7764 = vmatmul.mubr.msk.f32.vlgmr.msra.gmra.mrb[22].mxu1 %vm931_vm2, %v9529_v0 }
 0xece   :  { %7777 = vmatprep.mubr.msk.f32.mxu1 %vm931_vm2, %v4245_v29 }
 0xed1   :  { %7750 = vmatmul.mubr.msk.f32.vlgmr.msra.gmra.mrb[36].mxu0 %vm931_vm2, %v9518_v48 }
 0xed2   :  { %8100 = vmatpush3.bf16.xpose.msk.msra.mxu0 %vm8930_vm3, %v8095_v31  ;;  %7756 = vmatprep.mubr.msk.f32.mxu0 %vm931_vm2, %v9533_v56 }
 0xed4   :  { %v8338_v54 = vpop.permute.xlu1 %8337  ;;  %v8333_v16 = vpop.permute.xlu0 %8332 }
 0xed5   :  { %v8340_v63 = vunpack.i.h.bf16 %v8338_v54  ;;  %v8339_v38 = vunpack.i.l.bf16 %v8338_v54  ;;  %v8335_v24 = vunpack.i.h.bf16 %v8333_v16  ;;  %v8334_v23 = vunpack.i.l.bf16 %v8333_v16 }
 0xed7   :  { %v8113_v27 = vpack.c.bf16 %v8340_v63, %v8339_v38  ;;  %v8107_v28 = vpack.c.bf16 %v8335_v24, %v8334_v23 }
 0xed8   :  { %v8348_v0 = vpop.permute.xlu1 %8347  ;;  %v8343_v57 = vpop.permute.xlu0 %8342 }
 0xed9   :  { %7757 = vmatmul.mubr.msk.f32.vlgmr.msra.gmra.mrb[38].mxu0 %vm931_vm2, %v9531_v1  ;;  %v8350_v48 = vunpack.i.h.bf16 %v8348_v0  ;;  %v8349_v25 = vunpack.i.l.bf16 %v8348_v0  ;;  %v8345_v14 = vunpack.i.h.bf16 %v8343_v57  ;;  %v8344_v34 = vunpack.i.l.bf16 %v8343_v57  ;;  %8109 = vmatprep.subr.msk.bf16.mxu0 %vm8930_vm3, %v8107_v28 }
 0xeda   :  { %7770 = vmatprep.mubr.msk.f32.mxu0 %vm931_vm2, %v9590_v45  ;;  %8115 = vmatprep.subr.msk.bf16.mxu1 %vm8930_vm3, %v8113_v27 }
 0xedb   :  { %v8125_v56 = vpack.c.bf16 %v8350_v48, %v8349_v25  ;;  %v8119_v4 = vpack.c.bf16 %v8345_v14, %v8344_v34  ;;  %8112 = vmatpush3.bf16.xpose.msk.msra.mxu0 %vm8930_vm3, %v8107_v28  ;;  %8118 = vmatpush3.bf16.xpose.msk.msra.mxu1 %vm8930_vm3, %v8113_v27 }
 0xedc   :  { %v8358_v1 = vpop.permute.xlu1 %8357  ;;  %v8353_v26 = vpop.permute.xlu0 %8352 }
 0xedd   :  { %8121 = vmatprep.subr.msk.bf16.mxu0 %vm8930_vm3, %v8119_v4  ;;  %8127 = vmatprep.subr.msk.bf16.mxu1 %vm8930_vm3, %v8125_v56  ;;  %v8355_v55 = vunpack.i.h.bf16 %v8353_v26  ;;  %v8354_v33 = vunpack.i.l.bf16 %v8353_v26  ;;  %v8360_v7 = vunpack.i.h.bf16 %v8358_v1  ;;  %v8359_v51 = vunpack.i.l.bf16 %v8358_v1 }
 0xedf   :  { %v8131_v22 = vpack.c.bf16 %v8355_v55, %v8354_v33  ;;  %v9686_v21 = vpack.c.bf16 %v8360_v7, %v8359_v51 }
 0xee0   :  { %v8363_v44 = vpop.permute.xlu1 %8362 }
 0xee1   :  { %v8365_v2 = vunpack.i.h.bf16 %v8363_v44  ;;  %v8364_v53 = vunpack.i.l.bf16 %v8363_v44 }
 0xee2   :  { %7771 = vmatmul.mubr.msk.f32.vlgmr.msra.gmra.mrb[40].mxu0 %vm931_vm2, %v9588_v46  ;;  %7778 = vmatmul.mubr.msk.f32.vlgmr.msra.gmra.mrb[24].mxu1 %vm931_vm2, %v9586_v17 }
 0xee3   :  { %v8139_v50 = vpack.c.bf16 %v8365_v2, %v8364_v53  ;;  %8124 = vmatpush3.bf16.xpose.msk.msra.mxu0 %vm8930_vm3, %v8119_v4  ;;  %7784 = vmatprep.mubr.msk.f32.mxu0 %vm931_vm2, %v9605_v43 }
 0xee4   :  { %8130 = vmatpush3.bf16.xpose.msk.msra.mxu1 %vm8930_vm3, %v8125_v56  ;;  %7791 = vmatprep.mubr.msk.f32.mxu1 %vm931_vm2, %v9603_v8  ;;  %v9746_v27 = vpop.permute.xlu1 %8367 }
 0xee5   :  { %8132 = vmatprep.subr.bf16.mxu0 %v8131_v22  ;;  %8140 = vmatprep.subr.bf16.mxu1 %v8139_v50 }
 0xeea   :  { %7785 = vmatmul.mubr.msk.f32.vlgmr.msra.gmra.mrb[42].mxu0 %vm931_vm2, %v9594_v20 }
 0xeeb   :  { %7792 = vmatmul.mubr.msk.f32.vlgmr.msra.gmra.mrb[26].mxu1 %vm931_vm2, %v9592_v35  ;;  %8134 = vmatpush3.bf16.msra.mxu0 %v8131_v22 }
 0xeec   :  { %8142 = vmatpush3.bf16.msra.mxu1 %v8139_v50  ;;  %8136 = vmatprep.subr.bf16.mxu0 %v9686_v21 }
 0xf9c   :  { %v7744_v42 = vpop.f32.mrb[34].mxu0 }
 0xf9d   :  { %v4396_v9 = vpop.f32.mrb[35].mxu0  ;;  %v5031_v17 = vsel %vm1638_vm4, %v7744_v42, -inf }
 0xf9e   :  { %5032 = vmax.xlane.f32.xlu1 %v5031_v17  ;;  %v5028_v46 = vsel %vm1638_vm4, %v4396_v9, -inf }
 0xf9f   :  { %5029 = vmax.xlane.f32.xlu0 %v5028_v46 }
 0xfa0   :  { %v7765_v29 = vpop.f32.mrb[22].mxu1 }
 0xfa1   :  { %v4663_v45 = vpop.f32.mrb[23].mxu1  ;;  %v5049_v8 = vsel %vm1638_vm4, %v7765_v29, -inf }
 0xfa2   :  { %5050 = vmax.xlane.f32.xlu1 %v5049_v8  ;;  %v5046_v35 = vsel %vm1638_vm4, %v4663_v45, -inf }
 0xfa4   :  { %v7751_v20 = vpop.f32.mrb[36].mxu0 }
 0xfa5   :  { %v9696_v43 = vpop.f32.mrb[37].mxu0  ;;  %v5037_v30 = vsel %vm1638_vm4, %v7751_v20, -inf }
 0xfa6   :  { %5047 = vmax.xlane.f32.xlu1 %v5046_v35  ;;  %5038 = vmax.xlane.f32.xlu0 %v5037_v30  ;;  %v5034_v19 = vsel %vm1638_vm4, %v9696_v43, -inf }
 0xfaa   :  { %5035 = vmax.xlane.f32.xlu0 %v5034_v19 }
 0xfac   :  { %v9702_v39 = vpop.f32.mrb[38].mxu0 }
 0xfad   :  { %v9704_v5 = vpop.f32.mrb[39].mxu0  ;;  %v5043_v62 = vsel %vm1638_vm4, %v9702_v39, -inf }
 0xfae   :  { %5044 = vmax.xlane.f32.xlu0 %v5043_v62  ;;  %v5040_v47 = vsel %vm1638_vm4, %v9704_v5, -inf }
 0xfb2   :  { %5041 = vmax.xlane.f32.xlu0 %v5040_v47 }
 0xfb5   :  { %v9710_v6 = vpop.f32.mrb[40].mxu0  ;;  %v9712_v18 = vpop.f32.mrb[24].mxu1 }
 0xfb6   :  { %v9714_v13 = vpop.f32.mrb[41].mxu0  ;;  %v9716_v41 = vpop.f32.mrb[25].mxu1  ;;  %v5061_v36 = vsel %vm1638_vm4, %v9712_v18, -inf  ;;  %v5055_v61 = vsel %vm1638_vm4, %v9710_v6, -inf }
 0xfb7   :  { %5062 = vmax.xlane.f32.xlu1 %v5061_v36  ;;  %5056 = vmax.xlane.f32.xlu0 %v5055_v61  ;;  %v5058_v3 = vsel %vm1638_vm4, %v9716_v41, -inf  ;;  %v5052_v60 = vsel %vm1638_vm4, %v9714_v13, -inf }
 0xfbb   :  { %5059 = vmax.xlane.f32.xlu1 %v5058_v3  ;;  %5053 = vmax.xlane.f32.xlu0 %v5052_v60 }
 0xfbd   :  { %v9726_v15 = vpop.f32.mrb[42].mxu0 }
 0xfbe   :  { %v9728_v31 = vpop.f32.mrb[26].mxu1  ;;  %v9730_v54 = vpop.f32.mrb[43].mxu0  ;;  %v5067_v16 = vsel %vm1638_vm4, %v9726_v15, -inf }
 0xfbf   :  { %v9734_v63 = vpop.f32.mrb[27].mxu1  ;;  %v5073_v38 = vsel %vm1638_vm4, %v9728_v31, -inf  ;;  %5068 = vmax.xlane.f32.xlu0 %v5067_v16  ;;  %v5064_v24 = vsel %vm1638_vm4, %v9730_v54, -inf }
 0xfc0   :  { %5074 = vmax.xlane.f32.xlu1 %v5073_v38  ;;  %v5070_v23 = vsel %vm1638_vm4, %v9734_v63, -inf }
 0xfc3   :  { %5065 = vmax.xlane.f32.xlu0 %v5064_v24 }
 0xfc4   :  { %5071 = vmax.xlane.f32.xlu1 %v5070_v23 }
 0xfd5   :  { %8377 = vrot.lane.b32.xlu1 %v9597_v59, %s8605_s28 }
 0xfd9   :  { %8372 = vrot.lane.b32.xlu0 %v9601_v10, %s8605_s28 }
0x102b   :  { %v5033_v28 = vpop.xlane.xlu1 %5032 }
0x102c   :  { %v5077_v0 = vsub.f32 %v7744_v42, %v5033_v28  ;;  %v5030_v57 = vpop.xlane.xlu0 %5029 }
0x102d   :  { %v5076_v48 = vsub.f32 %v4396_v9, %v5030_v57 }
0x102e   :  { %v5094_v25 = vmul.f32 1.442695, %v5077_v0 }
0x102f   :  { %v5092_v14 = vmul.f32 1.442695, %v5076_v48  ;;  %v5051_v34 = vpop.xlane.xlu1 %5050 }
0x1030   :  { %8487 = vpow2.f32 %v5094_v25  ;;  %v5083_v56 = vsub.f32 %v7765_v29, %v5051_v34 }
0x1031   :  { %8489 = vpow2.f32 %v5092_v14 }
0x1032   :  { %v5106_v4 = vmul.f32 1.442695, %v5083_v56 }
0x1033   :  { %v5048_v1 = vpop.xlane.xlu1 %5047  ;;  %v5039_v26 = vpop.xlane.xlu0 %5038 }
0x1034   :  { %8491 = vpow2.f32 %v5106_v4  ;;  %v5082_v59 = vsub.f32 %v4663_v45, %v5048_v1  ;;  %v5079_v55 = vsub.f32 %v7751_v20, %v5039_v26 }
0x1036   :  { %v5104_v33 = vmul.f32 1.442695, %v5082_v59  ;;  %v5098_v10 = vmul.f32 1.442695, %v5079_v55 }
0x1037   :  { %v5036_v44 = vpop.xlane.xlu0 %5035 }
0x1038   :  { %8493 = vpow2.f32 %v5104_v33  ;;  %v5078_v2 = vsub.f32 %v9696_v43, %v5036_v44 }
0x1039   :  { %8495 = vpow2.f32 %v5098_v10 }
0x103a   :  { %v9749_v53 = vpop.eup %8487  ;;  %v5096_v22 = vmul.f32 1.442695, %v5078_v2 }
0x103b   :  { %v9751_v50 = vpop.eup %8489  ;;  %v5045_v7 = vpop.xlane.xlu0 %5044  ;;  %v5127_v51 = vsel %vm1638_vm4, %v9749_v53, 0.0 }
0x103c   :  { %8497 = vpow2.f32 %v5096_v22  ;;  %v5081_v42 = vsub.f32 %v9702_v39, %v5045_v7  ;;  %5128 = vadd.xlane.f32.xlu1 %v5127_v51  ;;  %v5124_v9 = vsel %vm1638_vm4, %v9751_v50, 0.0 }
0x103d   :  { %5125 = vadd.xlane.f32.xlu0 %v5124_v9 }
0x103e   :  { %v9758_v17 = vpop.eup %8491  ;;  %v5102_v46 = vmul.f32 1.442695, %v5081_v42 }
0x103f   :  { %v5042_v29 = vpop.xlane.xlu0 %5041  ;;  %v5145_v45 = vsel %vm1638_vm4, %v9758_v17, 0.0 }
0x1040   :  { %8499 = vpow2.f32 %v5102_v46  ;;  %v5080_v8 = vsub.f32 %v9704_v5, %v5042_v29  ;;  %5146 = vadd.xlane.f32.xlu1 %v5145_v45 }
0x1042   :  { %v9763_v20 = vpop.eup %8493  ;;  %v5100_v43 = vmul.f32 1.442695, %v5080_v8 }
0x1043   :  { %v5142_v35 = vsel %vm1638_vm4, %v9763_v20, 0.0  ;;  %v9767_v30 = vpop.eup %8495 }
0x1044   :  { %8501 = vpow2.f32 %v5100_v43  ;;  %5143 = vadd.xlane.f32.xlu1 %v5142_v35  ;;  %v5063_v19 = vpop.xlane.xlu1 %5062  ;;  %v5057_v39 = vpop.xlane.xlu0 %5056  ;;  %v5133_v3 = vsel %vm1638_vm4, %v9767_v30, 0.0 }
0x1045   :  { %v5087_v62 = vsub.f32 %v9712_v18, %v5063_v19  ;;  %v5085_v47 = vsub.f32 %v9710_v6, %v5057_v39 }
0x1046   :  { %v9771_v36 = vpop.eup %8497 }
0x1047   :  { %v5114_v5 = vmul.f32 1.442695, %v5087_v62  ;;  %v5110_v61 = vmul.f32 1.442695, %v5085_v47  ;;  %v5130_v60 = vsel %vm1638_vm4, %v9771_v36, 0.0 }
0x1048   :  { %5134 = vadd.xlane.f32.xlu1 %v5133_v3  ;;  %5131 = vadd.xlane.f32.xlu0 %v5130_v60  ;;  %v5060_v16 = vpop.xlane.xlu1 %5059  ;;  %v5054_v38 = vpop.xlane.xlu0 %5053 }
0x1049   :  { %8503 = vpow2.f32 %v5114_v5  ;;  %v5086_v24 = vsub.f32 %v9716_v41, %v5060_v16  ;;  %v5084_v18 = vsub.f32 %v9714_v13, %v5054_v38  ;;  %v8370_v38 = vunpack.i.h.bf16 %v9746_v27 }
0x104a   :  { %v9779_v6 = vpop.eup %8499  ;;  %8505 = vpow2.f32 %v5110_v61 }
0x104b   :  { %v5112_v23 = vmul.f32 1.442695, %v5086_v24  ;;  %v5108_v28 = vmul.f32 1.442695, %v5084_v18  ;;  %v5139_v0 = vsel %vm1638_vm4, %v9779_v6, 0.0  ;;  %v8369_v24 = vunpack.i.l.bf16 %v9746_v27 }
0x104c   :  { %5140 = vadd.xlane.f32.xlu0 %v5139_v0  ;;  %v5069_v57 = vpop.xlane.xlu0 %5068 }
0x104d   :  { %8507 = vpow2.f32 %v5112_v23  ;;  %v5075_v48 = vpop.xlane.xlu1 %5074  ;;  %v5089_v25 = vsub.f32 %v9726_v15, %v5069_v57 }
0x104e   :  { %v9784_v14 = vpop.eup %8501  ;;  %8509 = vpow2.f32 %v5108_v28  ;;  %v5091_v41 = vsub.f32 %v9728_v31, %v5075_v48  ;;  %v8143_v28 = vpack.c.bf16 %v8370_v38, %v8369_v24 }
0x104f   :  { %v5118_v13 = vmul.f32 1.442695, %v5089_v25  ;;  %v5136_v34 = vsel %vm1638_vm4, %v9784_v14, 0.0 }
0x1050   :  { %v5122_v56 = vmul.f32 1.442695, %v5091_v41  ;;  %5137 = vadd.xlane.f32.xlu0 %v5136_v34  ;;  %v5066_v4 = vpop.xlane.xlu0 %5065 }
0x1051   :  { %8511 = vpow2.f32 %v5118_v13  ;;  %v5072_v1 = vpop.xlane.xlu1 %5071  ;;  %v5088_v26 = vsub.f32 %v9730_v54, %v5066_v4 }
0x1052   :  { %8513 = vpow2.f32 %v5122_v56  ;;  %v5090_v59 = vsub.f32 %v9734_v63, %v5072_v1 }
0x1053   :  { %v9791_v15 = vpop.eup %8503  ;;  %v5116_v55 = vmul.f32 1.442695, %v5088_v26 }
0x1054   :  { %v9793_v33 = vpop.eup %8505  ;;  %v5120_v31 = vmul.f32 1.442695, %v5090_v59  ;;  %v8373_v10 = vpop.permute.xlu0 %8372  ;;  %v5157_v44 = vsel %vm1638_vm4, %v9791_v15, 0.0 }
0x1055   :  { %8515 = vpow2.f32 %v5116_v55  ;;  %v8375_v2 = vunpack.i.h.bf16 %v8373_v10  ;;  %v8374_v22 = vunpack.i.l.bf16 %v8373_v10  ;;  %5158 = vadd.xlane.f32.xlu1 %v5157_v44  ;;  %v5151_v54 = vsel %vm1638_vm4, %v9793_v33, 0.0  ;;  %v8378_v62 = vpop.permute.xlu1 %8377 }
0x1056   :  { %8517 = vpow2.f32 %v5120_v31  ;;  %5152 = vadd.xlane.f32.xlu0 %v5151_v54  ;;  %v8379_v41 = vunpack.i.l.bf16 %v8378_v62 }
0x1057   :  { %v9799_v63 = vpop.eup %8507  ;;  %v9801_v7 = vpack.c.bf16 %v8375_v2, %v8374_v22 }
0x1058   :  { %v9803_v51 = vpop.eup %8509  ;;  %v5154_v42 = vsel %vm1638_vm4, %v9799_v63, 0.0 }
0x1059   :  { %5155 = vadd.xlane.f32.xlu1 %v5154_v42  ;;  %v5148_v9 = vsel %vm1638_vm4, %v9803_v51, 0.0  ;;  %8148 = vmatprep.subr.bf16.mxu1 %v9801_v7 }
0x105a   :  { %5149 = vadd.xlane.f32.xlu0 %v5148_v9 }
0x105b   :  { %v9810_v46 = vpop.eup %8511 }
0x105c   :  { %v9812_v29 = vpop.eup %8513  ;;  %v5163_v45 = vsel %vm1638_vm4, %v9810_v46, 0.0 }
0x105d   :  { %v5169_v8 = vsel %vm1638_vm4, %v9812_v29, 0.0 }
0x105e   :  { %5170 = vadd.xlane.f32.xlu1 %v5169_v8  ;;  %5164 = vadd.xlane.f32.xlu0 %v5163_v45 }
0x105f   :  { %v9818_v43 = vpop.eup %8515 }
0x1060   :  { %v9820_v35 = vpop.eup %8517  ;;  %v5160_v19 = vsel %vm1638_vm4, %v9818_v43, 0.0 }
0x1061   :  { %v5166_v39 = vsel %vm1638_vm4, %v9820_v35, 0.0 }
0x1062   :  { %5167 = vadd.xlane.f32.xlu1 %v5166_v39  ;;  %5161 = vadd.xlane.f32.xlu0 %v5160_v19 }
0x1073   :  { %8387 = vrot.lane.b32.xlu1 %v9613_v32, %s8605_s28 }
0x1078   :  { %8382 = vrot.lane.b32.xlu0 %v9617_v52, %s8605_s28 }
0x10c9   :  { %v5129_v47 = vpop.xlane.xlu1 %5128 }
0x10ca   :  { %8519 = vrcp.f32 %v5129_v47  ;;  %v5126_v5 = vpop.xlane.xlu0 %5125 }
0x10cb   :  { %8521 = vrcp.f32 %v5126_v5 }
0x10cd   :  { %v5147_v61 = vpop.xlane.xlu1 %5146 }
0x10d1   :  { %v5144_v3 = vpop.xlane.xlu1 %5143 }
0x10d2   :  { %8523 = vrcp.f32 %v5144_v3 }
0x10d4   :  { %v8520_v60 = vpop.eup %8519 }
0x10d5   :  { %v8522_v16 = vpop.eup %8521  ;;  %v5135_v18 = vpop.xlane.xlu1 %5134  ;;  %v5189_v52 = vmul.f32 %v8520_v60, %v9749_v53 }
0x10d6   :  { %v5132_v23 = vpop.xlane.xlu0 %5131  ;;  %8525 = vrcp.f32 %v5135_v18  ;;  %v5188_v32 = vmul.f32 %v8522_v16, %v9751_v50  ;;  %v8380_v50 = vunpack.i.h.bf16 %v8378_v62 }
0x10d7   :  { %8527 = vrcp.f32 %v5132_v23 }
0x10d8   :  { %7798 = vmatprep.mubr.msk.f32.mxu0 %vm1638_vm4, %v5188_v32  ;;  %8529 = vrcp.f32 %v5147_v61  ;;  %v8151_v1 = vpack.c.bf16 %v8380_v50, %v8379_v41 }
0x10d9   :  { %7799 = vmatmul.mubr.msk.f32.vlgmr.msra.gmra.mrb[44].mxu0 %vm1638_vm4, %v5189_v52 }
0x10da   :  { %v5141_v0 = vpop.xlane.xlu0 %5140  ;;  %8138 = vmatpush3.bf16.msra.mxu0 %v9686_v21 }
0x10db   :  { %8144 = vmatprep.subr.bf16.mxu0 %v8143_v28  ;;  %8531 = vrcp.f32 %v5141_v0 }
0x10dc   :  { %v8524_v57 = vpop.eup %8523 }
0x10dd   :  { %v5194_v21 = vmul.f32 %v8524_v57, %v9763_v20 }
0x10de   :  { %v5138_v27 = vpop.xlane.xlu0 %5137 }
0x10df   :  { %8533 = vrcp.f32 %v5138_v27 }
0x10e0   :  { %v8526_v48 = vpop.eup %8525 }
0x10e1   :  { %v8528_v25 = vpop.eup %8527  ;;  %v5191_v53 = vmul.f32 %v8526_v48, %v9767_v30 }
0x10e2   :  { %v5159_v13 = vpop.xlane.xlu1 %5158  ;;  %v5190_v34 = vmul.f32 %v8528_v25, %v9771_v36  ;;  %v8530_v4 = vpop.eup %8529 }
0x10e3   :  { %v5153_v56 = vpop.xlane.xlu0 %5152  ;;  %8535 = vrcp.f32 %v5159_v13  ;;  %v5195_v30 = vmul.f32 %v8530_v4, %v9758_v17 }
0x10e4   :  { %7805 = vmatprep.mubr.msk.f32.mxu0 %vm1638_vm4, %v5190_v34  ;;  %8537 = vrcp.f32 %v5153_v56 }
0x10e5   :  { %7806 = vmatmul.mubr.msk.f32.vlgmr.msra.gmra.mrb[46].mxu0 %vm1638_vm4, %v5191_v53  ;;  %v8532_v59 = vpop.eup %8531 }
0x10e6   :  { %8146 = vmatpush3.bf16.msra.mxu0 %v8143_v28  ;;  %7819 = vmatprep.mubr.msk.f32.mxu0 %vm1638_vm4, %v5194_v21  ;;  %v5156_v26 = vpop.xlane.xlu1 %5155  ;;  %v5193_v31 = vmul.f32 %v8532_v59, %v9779_v6 }
0x10e7   :  { %8152 = vmatprep.subr.bf16.mxu0 %v8151_v1  ;;  %8539 = vrcp.f32 %v5156_v26  ;;  %v5150_v36 = vpop.xlane.xlu0 %5149 }
0x10e8   :  { %8541 = vrcp.f32 %v5150_v36 }
0x10e9   :  { %v8534_v55 = vpop.eup %8533  ;;  %7820 = vmatmul.mubr.msk.f32.vlgmr.msra.gmra.mrb[48].mxu0 %vm1638_vm4, %v5195_v30 }
0x10ea   :  { %v5192_v20 = vmul.f32 %v8534_v55, %v9784_v14  ;;  %8154 = vmatpush3.bf16.msra.mxu0 %v8151_v1 }
0x10eb   :  { %v5171_v10 = vpop.xlane.xlu1 %5170  ;;  %v5165_v44 = vpop.xlane.xlu0 %5164 }
0x10ec   :  { %7812 = vmatprep.mubr.msk.f32.mxu1 %vm1638_vm4, %v5192_v20  ;;  %8543 = vrcp.f32 %v5171_v10 }
0x10ed   :  { %7813 = vmatmul.mubr.msk.f32.vlgmr.msra.gmra.mrb[28].mxu1 %vm1638_vm4, %v5193_v31  ;;  %v8536_v17 = vpop.eup %8535  ;;  %8545 = vrcp.f32 %v5165_v44 }
0x10ee   :  { %8150 = vmatpush3.bf16.msra.mxu1 %v9801_v7  ;;  %v8538_v54 = vpop.eup %8537  ;;  %v5199_v9 = vmul.f32 %v8536_v17, %v9791_v15 }
0x10ef   :  { %v5168_v2 = vpop.xlane.xlu1 %5167  ;;  %v5162_v22 = vpop.xlane.xlu0 %5161  ;;  %v5197_v45 = vmul.f32 %v8538_v54, %v9793_v33 }
0x10f0   :  { %8547 = vrcp.f32 %v5168_v2 }
0x10f1   :  { %v8540_v42 = vpop.eup %8539  ;;  %8549 = vrcp.f32 %v5162_v22 }
0x10f2   :  { %v8542_v14 = vpop.eup %8541  ;;  %v5198_v6 = vmul.f32 %v8540_v42, %v9799_v63 }
0x10f3   :  { %v8388_v8 = vpop.permute.xlu1 %8387  ;;  %v8383_v19 = vpop.permute.xlu0 %8382  ;;  %v5196_v7 = vmul.f32 %v8542_v14, %v9803_v51 }
0x10f4   :  { %v8390_v39 = vunpack.i.h.bf16 %v8388_v8  ;;  %v8389_v62 = vunpack.i.l.bf16 %v8388_v8  ;;  %v8385_v47 = vunpack.i.h.bf16 %v8383_v19  ;;  %v8384_v5 = vunpack.i.l.bf16 %v8383_v19  ;;  %7833 = vmatprep.mubr.msk.f32.mxu0 %vm1638_vm4, %v5198_v6 }
0x10f5   :  { %7826 = vmatprep.mubr.msk.f32.mxu1 %vm1638_vm4, %v5196_v7  ;;  %7834 = vmatmul.mubr.msk.f32.vlgmr.msra.gmra.mrb[50].mxu0 %vm1638_vm4, %v5199_v9 }
0x10f6   :  { %v8159_v61 = vpack.c.bf16 %v8390_v39, %v8389_v62  ;;  %v8155_v63 = vpack.c.bf16 %v8385_v47, %v8384_v5  ;;  %7827 = vmatmul.mubr.msk.f32.vlgmr.msra.gmra.mrb[30].mxu1 %vm1638_vm4, %v5197_v45  ;;  %v8544_v15 = vpop.eup %8543 }
0x10f7   :  { %v8546_v33 = vpop.eup %8545  ;;  %v5203_v16 = vmul.f32 %v8544_v15, %v9812_v29 }
0x10f8   :  { %8156 = vmatprep.subr.bf16.mxu1 %v8155_v63  ;;  %8160 = vmatprep.subr.bf16.mxu0 %v8159_v61  ;;  %v5201_v24 = vmul.f32 %v8546_v33, %v9810_v46 }
0x10f9   :  { %8158 = vmatpush3.bf16.msra.mxu1 %v8155_v63  ;;  %8162 = vmatpush3.bf16.msra.mxu0 %v8159_v61 }
0x10fa   :  { %v8548_v51 = vpop.eup %8547 }
0x10fb   :  { %v8550_v3 = vpop.eup %8549  ;;  %v5202_v60 = vmul.f32 %v8548_v51, %v9820_v35 }
0x10fc   :  { %v5200_v38 = vmul.f32 %v8550_v3, %v9818_v43 }
0x10fd   :  { %7847 = vmatprep.mubr.msk.f32.mxu0 %vm1638_vm4, %v5202_v60 }
0x10fe   :  { %7840 = vmatprep.mubr.msk.f32.mxu1 %vm1638_vm4, %v5200_v38  ;;  %7848 = vmatmul.mubr.msk.f32.vlgmr.msra.gmra.mrb[52].mxu0 %vm1638_vm4, %v5203_v16 }
0x10ff   :  { %7841 = vmatmul.mubr.msk.f32.vlgmr.msra.gmra.mrb[32].mxu1 %vm1638_vm4, %v5201_v24 }
0x11ac   :  { %v7800_v18 = vpop.f32.mrb[44].mxu0 }
0x11ad   :  { %v5282_v23 = vpop.f32.mrb[45].mxu0 }
0x11b8   :  { %v7807_v32 = vpop.f32.mrb[46].mxu0 }
0x11b9   :  { %v5369_v52 = vpop.f32.mrb[47].mxu0 }
0x11bc   :  { %v7821_v28 = vpop.f32.mrb[48].mxu0 }
0x11bd   :  { %v5984_v35 = vcombine.low %v7807_v32, %v7821_v28  ;;  %v5985_v0 = vcombine.high %v7807_v32, %v7821_v28  ;;  %v5543_v29 = vpop.f32.mrb[49].mxu0 }
0x11be   :  { %v5916_v27 = vcombine.low %v5369_v52, %v5543_v29  ;;  %v5917_v43 = vcombine.high %v5369_v52, %v5543_v29 }
0x11bf   :  { %v5992_v53 = vrot.slane %v5984_v35, %v8742_v49  ;;  %v5999_v13 = vrot.slane %v5985_v0, %v8742_v49 }
0x11c0   :  { %v7814_v57 = vpop.f32.mrb[28].mxu1  ;;  %v5924_v4 = vrot.slane %v5916_v27, %v8742_v49  ;;  %v5931_v21 = vrot.slane %v5917_v43, %v8742_v49 }
0x11c1   :  { %v5968_v46 = vcombine.low %v7800_v18, %v7814_v57  ;;  %v5969_v48 = vcombine.high %v7800_v18, %v7814_v57  ;;  %v5456_v25 = vpop.f32.mrb[29].mxu1 }
0x11c2   :  { %v5900_v50 = vcombine.low %v5282_v23, %v5456_v25  ;;  %v5901_v41 = vcombine.high %v5282_v23, %v5456_v25 }
0x11c3   :  { %v5976_v34 = vrot.slane %v5968_v46, %v8742_v49  ;;  %v5983_v56 = vrot.slane %v5969_v48, %v8742_v49 }
0x11c4   :  { %v5908_v1 = vrot.slane %v5900_v50, %v8742_v49  ;;  %v5915_v26 = vrot.slane %v5901_v41, %v8742_v49  ;;  %v3534_v50 = vld [vmem:[%s10166_s1 + $0x130] sm:$0xff] }
0x11c5   :  { %v6000_v59 = vcombine.low %v5976_v34, %v5992_v53  ;;  %v6001_v30 = vcombine.high %v5976_v34, %v5992_v53  ;;  %v6016_v36 = vcombine.low %v5983_v56, %v5999_v13  ;;  %v6017_v55 = vcombine.high %v5983_v56, %v5999_v13  ;;  %v3535_v56 = vld [vmem:[%s10166_s1 + $0x138] sm:$0xff] }
0x11c6   :  { %v5932_v20 = vcombine.low %v5908_v1, %v5924_v4  ;;  %v5933_v31 = vcombine.high %v5908_v1, %v5924_v4  ;;  %v5948_v10 = vcombine.low %v5915_v26, %v5931_v21  ;;  %v5949_v44 = vcombine.high %v5915_v26, %v5931_v21  ;;  %v3536_v4 = vld [vmem:[%s10166_s1 + $0x140] sm:$0xff]  ;;  %v3537_v21 = vld [vmem:[%s10166_s1 + $0x148] sm:$0xff] }
0x11c7   :  { %v6008_v17 = vrot.slane %v6000_v59, %v8744_v58  ;;  %v6015_v2 = vrot.slane %v6001_v30, %v8744_v58  ;;  %v6024_v22 = vrot.slane %v6016_v36, %v8744_v58  ;;  %v6031_v54 = vrot.slane %v6017_v55, %v8744_v58 }
0x11c8   :  { %v5940_v42 = vrot.slane %v5932_v20, %v8744_v58  ;;  %v5947_v14 = vrot.slane %v5933_v31, %v8744_v58  ;;  %v5956_v6 = vrot.slane %v5948_v10, %v8744_v58  ;;  %v5963_v9 = vrot.slane %v5949_v44, %v8744_v58  ;;  %v7835_v39 = vpop.f32.mrb[50].mxu0 }
0x11c9   :  { %v6240_v45 = vcombine.low %v6008_v17, %v6015_v2  ;;  %v7260_v8 = vcombine.high %v6008_v17, %v6015_v2  ;;  %v6256_v19 = vcombine.low %v6024_v22, %v6031_v54  ;;  %v7261_v7 = vcombine.high %v6024_v22, %v6031_v54  ;;  %v7828_v63 = vpop.f32.mrb[30].mxu1  ;;  %v5717_v15 = vpop.f32.mrb[51].mxu0 }
0x11ca   :  { %v6172_v62 = vcombine.low %v5940_v42, %v5947_v14  ;;  %v7258_v47 = vcombine.high %v5940_v42, %v5947_v14  ;;  %v6188_v5 = vcombine.low %v5956_v6, %v5963_v9  ;;  %v7259_v61 = vcombine.high %v5956_v6, %v5963_v9  ;;  %v5630_v16 = vpop.f32.mrb[31].mxu1 }
0x11cb   :  { %v6247_v33 = vrot.slane %v6240_v45, %v8742_v49  ;;  %v6255_v51 = vrot.slane %v7260_v8, %v8742_v49  ;;  %v6263_v3 = vrot.slane %v6256_v19, %v8742_v49  ;;  %v6271_v60 = vrot.slane %v7261_v7, %v8742_v49 }
0x11cc   :  { %v6179_v38 = vrot.slane %v6172_v62, %v8742_v49  ;;  %v6187_v24 = vrot.slane %v7258_v47, %v8742_v49  ;;  %v6195_v18 = vrot.slane %v6188_v5, %v8742_v49  ;;  %v6203_v23 = vrot.slane %v7259_v61, %v8742_v49 }
0x11cd   :  { %v6272_v32 = vcombine.low %v6247_v33, %v6255_v51  ;;  %v6288_v52 = vcombine.low %v6263_v3, %v6271_v60  ;;  %v6273_v28 = vcombine.high %v6247_v33, %v6255_v51  ;;  %v6289_v35 = vcombine.high %v6263_v3, %v6271_v60 }
0x11ce   :  { %v6204_v0 = vcombine.low %v6179_v38, %v6187_v24  ;;  %v6220_v29 = vcombine.low %v6195_v18, %v6203_v23  ;;  %v6205_v27 = vcombine.high %v6179_v38, %v6187_v24  ;;  %v6221_v43 = vcombine.high %v6195_v18, %v6203_v23 }
0x11cf   :  { %v9891_v57 = vrot.slane %v6272_v32, %v8744_v58  ;;  %v9894_v46 = vrot.slane %v6288_v52, %v8744_v58  ;;  %v9897_v48 = vrot.slane %v6273_v28, %v8744_v58  ;;  %v9900_v25 = vrot.slane %v6289_v35, %v8744_v58 }
0x11d0   :  { %v9906_v41 = vrot.slane %v6204_v0, %v8744_v58  ;;  %v9909_v53 = vrot.slane %v6220_v29, %v8744_v58  ;;  %v9912_v13 = vrot.slane %v6205_v27, %v8744_v58  ;;  %v9915_v34 = vrot.slane %v6221_v43, %v8744_v58 }
0x11d1   :  { %v6305_v1 = vcombine.high %v9891_v57, %v9894_v46  ;;  %v6306_v26 = vcombine.low %v9897_v48, %v9900_v25  ;;  %v6307_v59 = vcombine.high %v9897_v48, %v9900_v25  ;;  %v6304_v30 = vcombine.low %v9891_v57, %v9894_v46  ;;  %v7849_v36 = vpop.f32.mrb[52].mxu0 }
0x11d2   :  { %v6237_v55 = vcombine.high %v9906_v41, %v9909_v53  ;;  %v6238_v20 = vcombine.low %v9912_v13, %v9915_v34  ;;  %v6239_v31 = vcombine.high %v9912_v13, %v9915_v34  ;;  %v6236_v10 = vcombine.low %v9906_v41, %v9909_v53  ;;  %v7842_v44 = vpop.f32.mrb[32].mxu1  ;;  %v5891_v22 = vpop.f32.mrb[53].mxu0 }
0x11d3   :  { %v6120_v17 = vcombine.low %v7835_v39, %v7849_v36  ;;  %v6121_v2 = vcombine.high %v7835_v39, %v7849_v36  ;;  %6450 = vrot.lane.b32.xlu1 %v6305_v1, %s8606_s10  ;;  %v8163_v54 = vpack.c.bf16 %v3535_v56, %v3534_v50  ;;  %v8167_v42 = vpack.c.bf16 %v3537_v21, %v3536_v4  ;;  %v5804_v8 = vpop.f32.mrb[33].mxu1 }
0x11d4   :  { %v6104_v14 = vcombine.low %v7828_v63, %v7842_v44  ;;  %v6105_v6 = vcombine.high %v7828_v63, %v7842_v44  ;;  %v6052_v9 = vcombine.low %v5717_v15, %v5891_v22  ;;  %v6053_v45 = vcombine.high %v5717_v15, %v5891_v22  ;;  %6448 = vrot.lane.b32.xlu0 %v6237_v55, %s8606_s10 }
0x11d5   :  { %v6128_v19 = vrot.slane %v6120_v17, %v8742_v49  ;;  %v6135_v7 = vrot.slane %v6121_v2, %v8742_v49  ;;  %v6036_v62 = vcombine.low %v5630_v16, %v5804_v8  ;;  %v6037_v47 = vcombine.high %v5630_v16, %v5804_v8  ;;  %8164 = vmatprep.subr.bf16.mxu1 %v8163_v54 }
0x11d6   :  { %v6112_v39 = vrot.slane %v6104_v14, %v8742_v49  ;;  %v6119_v5 = vrot.slane %v6105_v6, %v8742_v49  ;;  %v6060_v61 = vrot.slane %v6052_v9, %v8742_v49  ;;  %v6067_v63 = vrot.slane %v6053_v45, %v8742_v49  ;;  %8166 = vmatpush3.bf16.msra.mxu1 %v8163_v54 }
0x11d7   :  { %v6044_v15 = vrot.slane %v6036_v62, %v8742_v49  ;;  %v6051_v33 = vrot.slane %v6037_v47, %v8742_v49  ;;  %6466 = vrot.lane.b32.xlu1 %v6306_v26, %s8607_s0  ;;  %8168 = vmatprep.subr.bf16.mxu1 %v8167_v42 }
0x11d8   :  { %v6136_v51 = vcombine.low %v6112_v39, %v6128_v19  ;;  %v6137_v3 = vcombine.high %v6112_v39, %v6128_v19  ;;  %v6152_v60 = vcombine.low %v6119_v5, %v6135_v7  ;;  %v6153_v16 = vcombine.high %v6119_v5, %v6135_v7  ;;  %6464 = vrot.lane.b32.xlu0 %v6238_v20, %s8607_s0 }
0x11d9   :  { %v6068_v38 = vcombine.low %v6044_v15, %v6060_v61  ;;  %v6069_v24 = vcombine.high %v6044_v15, %v6060_v61  ;;  %v6084_v18 = vcombine.low %v6051_v33, %v6067_v63  ;;  %v6085_v23 = vcombine.high %v6051_v33, %v6067_v63 }
0x11da   :  { %v6144_v32 = vrot.slane %v6136_v51, %v8744_v58  ;;  %v6151_v52 = vrot.slane %v6137_v3, %v8744_v58  ;;  %v6160_v28 = vrot.slane %v6152_v60, %v8744_v58  ;;  %v6167_v35 = vrot.slane %v6153_v16, %v8744_v58  ;;  %8170 = vmatpush3.bf16.msra.mxu1 %v8167_v42 }
0x11db   :  { %v6076_v0 = vrot.slane %v6068_v38, %v8744_v58  ;;  %v6083_v29 = vrot.slane %v6069_v24, %v8744_v58  ;;  %v6092_v27 = vrot.slane %v6084_v18, %v8744_v58  ;;  %v6099_v43 = vrot.slane %v6085_v23, %v8744_v58  ;;  %6482 = vrot.lane.b32.xlu1 %v6307_v59, %s8608_s11 }
0x11dc   :  { %v6376_v48 = vcombine.low %v6144_v32, %v6151_v52  ;;  %v7264_v25 = vcombine.high %v6144_v32, %v6151_v52  ;;  %v6392_v50 = vcombine.low %v6160_v28, %v6167_v35  ;;  %v7265_v13 = vcombine.high %v6160_v28, %v6167_v35  ;;  %6480 = vrot.lane.b32.xlu0 %v6239_v31, %s8608_s11 }
0x11dd   :  { %v6308_v34 = vcombine.low %v6076_v0, %v6083_v29  ;;  %v7262_v56 = vcombine.high %v6076_v0, %v6083_v29  ;;  %v6324_v4 = vcombine.low %v6092_v27, %v6099_v43  ;;  %v7263_v21 = vcombine.high %v6092_v27, %v6099_v43 }
0x11de   :  { %v6383_v1 = vrot.slane %v6376_v48, %v8742_v49  ;;  %v6391_v26 = vrot.slane %v7264_v25, %v8742_v49  ;;  %v6399_v36 = vrot.slane %v6392_v50, %v8742_v49  ;;  %v6407_v55 = vrot.slane %v7265_v13, %v8742_v49 }
0x11df   :  { %v6315_v59 = vrot.slane %v6308_v34, %v8742_v49  ;;  %v6323_v20 = vrot.slane %v7262_v56, %v8742_v49  ;;  %v6331_v44 = vrot.slane %v6324_v4, %v8742_v49  ;;  %v6339_v31 = vrot.slane %v7263_v21, %v8742_v49  ;;  %v7270_v34 = vld [vmem:[%s10167_s2 + $0xc] ss:$0 sm:$0xff] }
0x11e0   :  { %v6408_v17 = vcombine.low %v6383_v1, %v6391_v26  ;;  %v6424_v2 = vcombine.low %v6399_v36, %v6407_v55  ;;  %v6409_v22 = vcombine.high %v6383_v1, %v6391_v26  ;;  %v6425_v54 = vcombine.high %v6399_v36, %v6407_v55 }
0x11e1   :  { %v6340_v42 = vcombine.low %v6315_v59, %v6323_v20  ;;  %v6356_v14 = vcombine.low %v6331_v44, %v6339_v31  ;;  %v6341_v6 = vcombine.high %v6315_v59, %v6323_v20  ;;  %v6357_v9 = vcombine.high %v6331_v44, %v6339_v31 }
0x11e2   :  { %v6416_v45 = vrot.slane %v6408_v17, %v8744_v58  ;;  %v6432_v8 = vrot.slane %v6424_v2, %v8744_v58  ;;  %v6423_v19 = vrot.slane %v6409_v22, %v8744_v58  ;;  %v6439_v7 = vrot.slane %v6425_v54, %v8744_v58 }
0x11e3   :  { %v6348_v62 = vrot.slane %v6340_v42, %v8744_v58  ;;  %v6364_v49 = vrot.slane %v6356_v14, %v8744_v58  ;;  %v6355_v47 = vrot.slane %v6341_v6, %v8744_v58  ;;  %v6371_v39 = vrot.slane %v6357_v9, %v8744_v58 }
0x11e4   :  { %v6441_v5 = vcombine.high %v6416_v45, %v6432_v8  ;;  %v6442_v61 = vcombine.low %v6423_v19, %v6439_v7  ;;  %v6443_v63 = vcombine.high %v6423_v19, %v6439_v7  ;;  %v6440_v15 = vcombine.low %v6416_v45, %v6432_v8 }
0x11e5   :  { %v6373_v33 = vcombine.high %v6348_v62, %v6364_v49  ;;  %v6374_v51 = vcombine.low %v6355_v47, %v6371_v39  ;;  %v6375_v3 = vcombine.high %v6355_v47, %v6371_v39  ;;  %v6372_v60 = vcombine.low %v6348_v62, %v6364_v49 }
0x11e6   :  { %6454 = vrot.lane.b32.xlu1 %v6441_v5, %s8606_s10 }
0x11e7   :  { %6452 = vrot.lane.b32.xlu0 %v6373_v33, %s8606_s10 }
0x11ea   :  { %6470 = vrot.lane.b32.xlu1 %v6442_v61, %s8607_s0 }
0x11eb   :  { %6468 = vrot.lane.b32.xlu0 %v6374_v51, %s8607_s0  ;;  %v3541_v51 = vld [vmem:[%s10166_s1 + $0x150] sm:$0xff] }
0x11ee   :  { %6486 = vrot.lane.b32.xlu1 %v6443_v63, %s8608_s11 }
0x11ef   :  { %6484 = vrot.lane.b32.xlu0 %v6375_v3, %s8608_s11  ;;  %v3542_v3 = vld [vmem:[%s10166_s1 + $0x158] sm:$0xff] }
0x1245   :  { %v6451_v58 = vpop.permute.xlu1 %6450 }
0x1246   :  { %v6449_v16 = vpop.permute.xlu0 %6448  ;;  %v6493_v32 = vsel %vm931_vm2, %v6304_v30, %v6451_v58  ;;  %v3543_v58 = vld [vmem:[%s10166_s1 + $0x160] sm:$0xff] }
0x1247   :  { %v6492_v18 = vsel %vm931_vm2, %v6236_v10, %v6449_v16  ;;  %v3544_v16 = vld [vmem:[%s10166_s1 + $0x168] sm:$0xff] }
0x1249   :  { %v6467_v38 = vpop.permute.xlu1 %6466 }
0x124a   :  { %v6465_v24 = vpop.permute.xlu0 %6464  ;;  %v6497_v35 = vsel %vm1638_vm4, %v6493_v32, %v6467_v38  ;;  %v8175_v38 = vpack.c.bf16 %v3544_v16, %v3543_v58 }
0x124b   :  { %v6496_v52 = vsel %vm1638_vm4, %v6492_v18, %v6465_v24 }
0x124d   :  { %v6483_v23 = vpop.permute.xlu1 %6482 }
0x124e   :  { %v6481_v28 = vpop.permute.xlu0 %6480  ;;  %v6501_v29 = vsel %vm3111_vm5, %v6497_v35, %v6483_v23 }
0x124f   :  { %v6500_v0 = vsel %vm3111_vm5, %v6496_v52, %v6481_v28 }
0x1250   :  { %7858 = vmatprep.mubr.msk.f32.mxu1 %vm170_vm1, %v6500_v0  ;;  %v7271_v0 = vld [vmem:[%s10167_s2 + $0xd] ss:$0 sm:$0xff] }
0x1251   :  { %7859 = vmatmul.mubr.msk.f32.vlgmr.msra.gmra.mrb[34].mxu1 %vm170_vm1, %v6501_v29 }
0x1258   :  { %v6455_v41 = vpop.permute.xlu1 %6454 }
0x1259   :  { %v6453_v53 = vpop.permute.xlu0 %6452  ;;  %v6495_v30 = vsel %vm931_vm2, %v6440_v15, %v6455_v41 }
0x125a   :  { %v6494_v57 = vsel %vm931_vm2, %v6372_v60, %v6453_v53  ;;  %v8171_v60 = vpack.c.bf16 %v3542_v3, %v3541_v51  ;;  %v7273_v51 = vld [vmem:[%s10167_s2 + $0xf] ss:$0 sm:$0xff] }
0x125c   :  { %v6471_v10 = vpop.permute.xlu1 %6470  ;;  %8172 = vmatprep.subr.bf16.mxu0 %v8171_v60 }
0x125d   :  { %v6469_v27 = vpop.permute.xlu0 %6468  ;;  %v6499_v25 = vsel %vm1638_vm4, %v6495_v30, %v6471_v10  ;;  %8174 = vmatpush3.bf16.msra.mxu0 %v8171_v60  ;;  %v7272_v10 = vld [vmem:[%s10167_s2 + $0xe] ss:$0 sm:$0xff] }
0x125e   :  { %v6498_v43 = vsel %vm1638_vm4, %v6494_v57, %v6469_v27  ;;  %8176 = vmatprep.subr.bf16.mxu0 %v8175_v38 }
0x1260   :  { %v6487_v46 = vpop.permute.xlu1 %6486 }
0x1261   :  { %v6485_v48 = vpop.permute.xlu0 %6484  ;;  %v6503_v13 = vsel %vm3111_vm5, %v6499_v25, %v6487_v46  ;;  %8178 = vmatpush3.bf16.msra.mxu0 %v8175_v38 }
0x1262   :  { %v6502_v50 = vsel %vm3111_vm5, %v6498_v43, %v6485_v48 }
0x1263   :  { %7861 = vmatprep.mubr.msk.f32.mxu1 %vm170_vm1, %v6502_v50 }
0x1264   :  { %7862 = vmatmul.mubr.msk.f32.gmra.mrb[36].mxu1 %vm170_vm1, %v6503_v13 }
0x1324   :  { %v7860_v56 = vpop.f32.mrb[34].mxu1 }
0x1325   :  { %v6602_v4 = vadd.f32 %v7860_v56, %v9409_v37  ;;  %v6582_v21 = vpop.f32.mrb[35].mxu1 }
0x1326   :  { %v6601_v1 = vadd.f32 %v6582_v21, %v9411_v11 }
0x1327   :  { %v10013_v26 = vadd.f32 %v7270_v34, %v6602_v4 }
0x1328   :  { %v10015_v36 = vadd.f32 %v7270_v34, %v6601_v1 }
0x1329   :  { %v6616_v55 = vsel %vm170_vm1, %v10013_v26, 0.0 }
0x132a   :  { %6617 = vadd.xlane.f32.xlu1 %v6616_v55  ;;  %v6613_v59 = vsel %vm170_vm1, %v10015_v36, 0.0 }
0x132b   :  { %6614 = vadd.xlane.f32.xlu0 %v6613_v59 }
0x1337   :  { %v7863_v20 = vpop.f32.mrb[36].mxu1 }
0x1338   :  { %v6592_v44 = vpop.f32.mrb[37].mxu1  ;;  %v6604_v31 = vadd.f32 %v7863_v20, %v9419_v12 }
0x1339   :  { %v6603_v37 = vadd.f32 %v6592_v44, %v9421_v40 }
0x133a   :  { %v10025_v11 = vadd.f32 %v7270_v34, %v6604_v31  ;;  %v3546_v31 = vld [vmem:[%s10166_s1 + $0x170] sm:$0xff] }
0x133b   :  { %v10023_v17 = vadd.f32 %v7270_v34, %v6603_v37  ;;  %v3547_v37 = vld [vmem:[%s10166_s1 + $0x178] sm:$0xff] }
0x133c   :  { %v6622_v22 = vsel %vm170_vm1, %v10025_v11, 0.0 }
0x133d   :  { %v6619_v2 = vsel %vm170_vm1, %v10023_v17, 0.0 }
0x133e   :  { %6620 = vadd.xlane.f32.xlu0 %v6619_v2  ;;  %v8179_v2 = vpack.c.bf16 %v3547_v37, %v3546_v31 }
0x1340   :  { %8180 = vmatprep.subr.bf16.mxu1 %v8179_v2 }
0x1341   :  { %8182 = vmatpush3.bf16.msra.mxu1 %v8179_v2 }
0x1342   :  { %6623 = vadd.xlane.f32.xlu0 %v6622_v22  ;;  %v3548_v22 = vld [vmem:[%s10166_s1 + $0x180] sm:$0xff] }
0x13b7   :  { %v6618_v54 = vpop.xlane.xlu1 %6617 }
0x13b8   :  { %v6626_v42 = vmul.f32 0.03125, %v6618_v54  ;;  %v6615_v14 = vpop.xlane.xlu0 %6614  ;;  %v3549_v54 = vld [vmem:[%s10166_s1 + $0x188] sm:$0xff] }
0x13b9   :  { %v6625_v6 = vmul.f32 0.03125, %v6615_v14  ;;  %v3550_v14 = vld [vmem:[%s10166_s1 + $0x190] sm:$0xff] }
0x13ba   :  { %v6630_v12 = vsub.f32 %v10013_v26, %v6626_v42  ;;  %v8183_v42 = vpack.c.bf16 %v3549_v54, %v3548_v22 }
0x13bb   :  { %v6629_v40 = vsub.f32 %v10015_v36, %v6625_v6  ;;  %v3551_v6 = vld [vmem:[%s10166_s1 + $0x198] sm:$0xff] }
0x13bc   :  { %v6634_v9 = vmul.f32 %v6630_v12, %v6630_v12  ;;  %8184 = vmatprep.subr.bf16.mxu1 %v8183_v42 }
0x13bd   :  { %v6633_v45 = vmul.f32 %v6629_v40, %v6629_v40  ;;  %8186 = vmatpush3.bf16.msra.mxu1 %v8183_v42 }
0x13be   :  { %v6640_v8 = vsel %vm170_vm1, %v6634_v9, 0.0  ;;  %v3553_v9 = vld [vmem:[%s10166_s1 + $0x1a8] sm:$0xff] }
0x13bf   :  { %6641 = vadd.xlane.f32.xlu1 %v6640_v8  ;;  %v6637_v19 = vsel %vm170_vm1, %v6633_v45, 0.0  ;;  %v3554_v8 = vld [vmem:[%s10166_s1 + $0x1b0] sm:$0xff] }
0x13c0   :  { %6638 = vadd.xlane.f32.xlu0 %v6637_v19  ;;  %v3555_v19 = vld [vmem:[%s10166_s1 + $0x1b8] sm:$0xff] }
0x13cb   :  { %v6621_v7 = vpop.xlane.xlu0 %6620 }
0x13cc   :  { %v6627_v62 = vmul.f32 0.03125, %v6621_v7  ;;  %v8195_v7 = vpack.c.bf16 %v3555_v19, %v3554_v8 }
0x13ce   :  { %v6631_v49 = vsub.f32 %v10023_v17, %v6627_v62  ;;  %v3556_v62 = vld [vmem:[%s10166_s1 + $0x1c0] sm:$0xff] }
0x13cf   :  { %v6624_v47 = vpop.xlane.xlu0 %6623 }
0x13d0   :  { %v6628_v39 = vmul.f32 0.03125, %v6624_v47  ;;  %v6635_v5 = vmul.f32 %v6631_v49, %v6631_v49 }
0x13d2   :  { %v6632_v61 = vsub.f32 %v10025_v11, %v6628_v39  ;;  %v6643_v63 = vsel %vm170_vm1, %v6635_v5, 0.0  ;;  %v3558_v39 = vld [vmem:[%s10166_s1 + $0x1d0] sm:$0xff]  ;;  %v3559_v5 = vld [vmem:[%s10166_s1 + $0x1d8] sm:$0xff] }
0x13d3   :  { %6644 = vadd.xlane.f32.xlu0 %v6643_v63  ;;  %v3560_v63 = vld [vmem:[%s10166_s1 + $0x1e0] sm:$0xff] }
0x13d4   :  { %v6636_v15 = vmul.f32 %v6632_v61, %v6632_v61 }
0x13d6   :  { %v6646_v33 = vsel %vm170_vm1, %v6636_v15, 0.0  ;;  %v3561_v15 = vld [vmem:[%s10166_s1 + $0x1e8] sm:$0xff] }
0x13d7   :  { %6647 = vadd.xlane.f32.xlu1 %v6646_v33  ;;  %v8207_v33 = vpack.c.bf16 %v3561_v15, %v3560_v63 }
0x144c   :  { %v6642_v24 = vpop.xlane.xlu1 %6641 }
0x144d   :  { %v6650_v18 = vmul.f32 0.03125, %v6642_v24  ;;  %v6639_v23 = vpop.xlane.xlu0 %6638 }
0x144e   :  { %v6649_v32 = vmul.f32 0.03125, %v6639_v23 }
0x144f   :  { %v6654_v52 = vadd.f32 1e-05, %v6650_v18 }
0x1450   :  { %v6653_v28 = vadd.f32 1e-05, %v6649_v32 }
0x1451   :  { %8551 = vrsqrt.f32 %v6654_v52 }
0x1452   :  { %8553 = vrsqrt.f32 %v6653_v28 }
0x145b   :  { %v8552_v35 = vpop.eup %8551 }
0x145c   :  { %v8554_v29 = vpop.eup %8553  ;;  %v6662_v41 = vmul.f32 %v8552_v35, %v6630_v12  ;;  %v8187_v12 = vpack.c.bf16 %v3551_v6, %v3550_v14 }
0x145d   :  { %v6661_v53 = vmul.f32 %v8554_v29, %v6629_v40  ;;  %v3552_v40 = vld [vmem:[%s10166_s1 + $0x1a0] sm:$0xff] }
0x145e   :  { %v6670_v27 = vmul.f32 %v7271_v0, %v6662_v41  ;;  %8188 = vmatprep.subr.bf16.mxu1 %v8187_v12  ;;  %v8191_v45 = vpack.c.bf16 %v3553_v9, %v3552_v40  ;;  %v7278_v40 = vld [vmem:[%s10167_s2 + $0x10] ss:$0 sm:$0xff] }
0x145f   :  { %v6669_v57 = vmul.f32 %v7271_v0, %v6661_v53  ;;  %8190 = vmatpush3.bf16.msra.mxu1 %v8187_v12 }
0x1460   :  { %v6645_v46 = vpop.xlane.xlu0 %6644  ;;  %v6678_v48 = vadd.f32 %v7272_v10, %v6670_v27  ;;  %8192 = vmatprep.subr.bf16.mxu1 %v8191_v45 }
0x1461   :  { %v6651_v30 = vmul.f32 0.03125, %v6645_v46  ;;  %v6677_v43 = vadd.f32 %v7272_v10, %v6669_v57 }
0x1463   :  { %v6655_v25 = vadd.f32 1e-05, %v6651_v30  ;;  %7872 = vmatprep.mubr.msk.f32.mxu0 %vm170_vm1, %v6677_v43  ;;  %8194 = vmatpush3.bf16.msra.mxu1 %v8191_v45 }
0x1464   :  { %v6648_v50 = vpop.xlane.xlu1 %6647  ;;  %7873 = vmatmul.mubr.msk.f32.vlgmr.msra.gmra.mrb[54].mxu0 %vm170_vm1, %v6678_v48  ;;  %8196 = vmatprep.subr.bf16.mxu1 %v8195_v7 }
0x1465   :  { %8555 = vrsqrt.f32 %v6655_v25  ;;  %v6652_v13 = vmul.f32 0.03125, %v6648_v50 }
0x1467   :  { %v6656_v34 = vadd.f32 1e-05, %v6652_v13  ;;  %8198 = vmatpush3.bf16.msra.mxu1 %v8195_v7 }
0x1469   :  { %8557 = vrsqrt.f32 %v6656_v34 }
0x146f   :  { %v8556_v56 = vpop.eup %8555 }
0x1470   :  { %v6663_v4 = vmul.f32 %v8556_v56, %v6631_v49  ;;  %v3557_v49 = vld [vmem:[%s10166_s1 + $0x1c8] sm:$0xff] }
0x1471   :  { %v8199_v47 = vpack.c.bf16 %v3557_v49, %v3556_v62 }
0x1472   :  { %v6671_v21 = vmul.f32 %v7271_v0, %v6663_v4 }
0x1473   :  { %v8558_v1 = vpop.eup %8557  ;;  %8200 = vmatprep.subr.bf16.mxu1 %v8199_v47 }
0x1474   :  { %v6679_v55 = vadd.f32 %v7272_v10, %v6671_v21  ;;  %v6664_v59 = vmul.f32 %v8558_v1, %v6632_v61  ;;  %8202 = vmatpush3.bf16.msra.mxu1 %v8199_v47  ;;  %v8203_v61 = vpack.c.bf16 %v3559_v5, %v3558_v39 }
0x1476   :  { %7875 = vmatprep.mubr.msk.f32.mxu0 %vm170_vm1, %v6679_v55  ;;  %v6672_v20 = vmul.f32 %v7271_v0, %v6664_v59  ;;  %8204 = vmatprep.subr.bf16.mxu1 %v8203_v61 }
0x1478   :  { %v6680_v44 = vadd.f32 %v7272_v10, %v6672_v20  ;;  %8206 = vmatpush3.bf16.msra.mxu1 %v8203_v61 }
0x1479   :  { %8208 = vmatprep.subr.bf16.mxu1 %v8207_v33 }
0x147a   :  { %7876 = vmatmul.mubr.msk.f32.gmra.mrb[56].mxu0 %vm170_vm1, %v6680_v44 }
0x147c   :  { %8210 = vmatpush3.bf16.msra.mxu1 %v8207_v33 }
0x1537   :  { %v7874_v3 = vpop.f32.mrb[54].mxu0 }
0x1538   :  { %v6769_v60 = vadd.f32 %v7874_v3, %v7273_v51  ;;  %v6763_v58 = vpop.f32.mrb[55].mxu0 }
0x1539   :  { %v6764_v16 = vadd.f32 %v7273_v51, %v6763_v58 }
0x153a   :  { %v6783_v38 = vmul.f32 %v6769_v60, %v6769_v60 }
0x153b   :  { %v6782_v24 = vmul.f32 %v6764_v16, %v6764_v16 }
0x153c   :  { %v6787_v18 = vmul.f32 %v6783_v38, %v6769_v60 }
0x153d   :  { %v6786_v23 = vmul.f32 %v6782_v24, %v6764_v16 }
0x153e   :  { %v6791_v32 = vmul.f32 0.044715, %v6787_v18 }
0x153f   :  { %v6790_v52 = vmul.f32 0.044715, %v6786_v23 }
0x1540   :  { %v6795_v28 = vadd.f32 %v6791_v32, %v6769_v60 }
0x1541   :  { %v6794_v35 = vadd.f32 %v6790_v52, %v6764_v16 }
0x1542   :  { %v6799_v0 = vmul.f32 0.7978846, %v6795_v28 }
0x1543   :  { %v6798_v29 = vmul.f32 0.7978846, %v6794_v35 }
0x1544   :  { %8559 = vtanh.f32 %v6799_v0 }
0x1545   :  { %8561 = vtanh.f32 %v6798_v29 }
0x154d   :  { %v7877_v41 = vpop.f32.mrb[56].mxu0 }
0x154e   :  { %v8560_v53 = vpop.eup %8559  ;;  %v6779_v10 = vadd.f32 %v7877_v41, %v7273_v51  ;;  %v6773_v27 = vpop.f32.mrb[57].mxu0 }
0x154f   :  { %v8562_v57 = vpop.eup %8561  ;;  %v6807_v46 = vadd.f32 1.0, %v8560_v53  ;;  %v6774_v30 = vadd.f32 %v7273_v51, %v6773_v27  ;;  %v7006_v27 = vld [vmem:[%s10166_s1 + $0x1f0] sm:$0xff] }
0x1550   :  { %v6785_v43 = vmul.f32 %v6779_v10, %v6779_v10  ;;  %v6806_v48 = vadd.f32 1.0, %v8562_v57  ;;  %v7007_v57 = vld [vmem:[%s10166_s1 + $0x1f8] sm:$0xff] }
0x1551   :  { %v6811_v25 = vmul.f32 0.5, %v6807_v46  ;;  %v6784_v50 = vmul.f32 %v6774_v30, %v6774_v30  ;;  %v7008_v46 = vld [vmem:[%s10166_s1 + $0x200] sm:$0xff] }
0x1552   :  { %v6789_v13 = vmul.f32 %v6785_v43, %v6779_v10  ;;  %v6810_v34 = vmul.f32 0.5, %v6806_v48  ;;  %v8212_v43 = vpack.c.bf16 %v7007_v57, %v7006_v27  ;;  %v7009_v48 = vld [vmem:[%s10166_s1 + $0x208] sm:$0xff] }
0x1553   :  { %v6788_v56 = vmul.f32 %v6784_v50, %v6774_v30  ;;  %v6815_v1 = vmul.f32 %v6811_v25, %v6769_v60  ;;  %v8611_v25 = vmov 0.0   ;;  %v8215_v50 = vpack.c.bf16 %v7009_v48, %v7008_v46 }
0x1554   :  { %v6793_v4 = vmul.f32 0.044715, %v6789_v13  ;;  %v6814_v21 = vmul.f32 %v6810_v34, %v6764_v16  ;;  %7924 = vmatprep.mubr.msk.f32.mxu0 %vm8610_vm6, %v8611_v25 }
0x1555   :  { %v6792_v55 = vmul.f32 0.044715, %v6788_v56 }
0x1556   :  { %v6797_v59 = vadd.f32 %v6793_v4, %v6779_v10  ;;  %7910 = vmatprep.mubr.f32.mxu1 %v6814_v21 }
0x1557   :  { %v6796_v20 = vadd.f32 %v6792_v55, %v6774_v30  ;;  %7911 = vmatmul.mubr.f32.vlgmr.msra.gmra.mrb[38].mxu1 %v6815_v1 }
0x1558   :  { %v6801_v44 = vmul.f32 0.7978846, %v6797_v59 }
0x1559   :  { %v6800_v31 = vmul.f32 0.7978846, %v6796_v20 }
0x155a   :  { %8563 = vtanh.f32 %v6801_v44 }
0x155b   :  { %8565 = vtanh.f32 %v6800_v31  ;;  %v7279_v31 = vld [vmem:[%s10167_s2 + $0x11] ss:$0 sm:$0xff] }
0x1564   :  { %v8564_v37 = vpop.eup %8563 }
0x1565   :  { %v8566_v2 = vpop.eup %8565  ;;  %v6809_v22 = vadd.f32 1.0, %v8564_v37 }
0x1566   :  { %v6808_v54 = vadd.f32 1.0, %v8566_v2 }
0x1567   :  { %v6813_v42 = vmul.f32 0.5, %v6809_v22  ;;  %v7280_v22 = vld [vmem:[%s10167_s2 + $0x12] ss:$0 sm:$0xff] }
0x1568   :  { %v6812_v14 = vmul.f32 0.5, %v6808_v54 }
0x1569   :  { %v6817_v12 = vmul.f32 %v6813_v42, %v6779_v10 }
0x156a   :  { %v6816_v6 = vmul.f32 %v6812_v14, %v6774_v30  ;;  %v8609_v30 = vmov 0.0|0.0  }
0x156b   :  { %8211 = vmatprep.subr.bf16.mxu0 %v8609_v30 }
0x156c   :  { %7913 = vmatprep.mubr.f32.mxu1 %v6816_v6  ;;  %8213 = vmatpush3.bf16.msra.mxu0 %v8212_v43 }
0x156d   :  { %7914 = vmatmul.mubr.f32.gmra.mrb[40].mxu1 %v6817_v12  ;;  %8214 = vmatprep.subr.bf16.mxu0 %v8609_v30 }
0x1570   :  { %8216 = vmatpush3.bf16.msra.mxu0 %v8215_v50 }
0x162a   :  { %v7912_v9 = vpop.f32.mrb[38].mxu1 }
0x162b   :  { %v6904_v45 = vadd.f32 %v7912_v9, %v10013_v26  ;;  %v6884_v8 = vpop.f32.mrb[39].mxu1 }
0x162c   :  { %v6903_v19 = vadd.f32 %v6884_v8, %v10015_v36 }
0x162d   :  { %v6912_v7 = vadd.f32 %v7278_v40, %v6904_v45 }
0x162e   :  { %v6911_v62 = vadd.f32 %v7278_v40, %v6903_v19 }
0x162f   :  { %v6920_v49 = vsel %vm170_vm1, %v6912_v7, 0.0 }
0x1630   :  { %6921 = vadd.xlane.f32.xlu1 %v6920_v49  ;;  %v6917_v47 = vsel %vm170_vm1, %v6911_v62, 0.0 }
0x1631   :  { %6918 = vadd.xlane.f32.xlu0 %v6917_v47 }
0x1640   :  { %v7915_v39 = vpop.f32.mrb[40].mxu1 }
0x1641   :  { %v6906_v5 = vadd.f32 %v7915_v39, %v10025_v11  ;;  %v6894_v61 = vpop.f32.mrb[41].mxu1 }
0x1642   :  { %v6905_v63 = vadd.f32 %v6894_v61, %v10023_v17 }
0x1643   :  { %v6914_v15 = vadd.f32 %v7278_v40, %v6906_v5 }
0x1644   :  { %v6913_v33 = vadd.f32 %v7278_v40, %v6905_v63 }
0x1645   :  { %v6926_v26 = vsel %vm170_vm1, %v6914_v15, 0.0 }
0x1646   :  { %6927 = vadd.xlane.f32.xlu1 %v6926_v26  ;;  %v6923_v36 = vsel %vm170_vm1, %v6913_v33, 0.0 }
0x1647   :  { %6924 = vadd.xlane.f32.xlu0 %v6923_v36 }
0x16bd   :  { %v6922_v51 = vpop.xlane.xlu1 %6921 }
0x16be   :  { %v6930_v3 = vmul.f32 0.03125, %v6922_v51  ;;  %v6919_v60 = vpop.xlane.xlu0 %6918 }
0x16bf   :  { %v6929_v58 = vmul.f32 0.03125, %v6919_v60 }
0x16c0   :  { %v6934_v16 = vsub.f32 %v6912_v7, %v6930_v3 }
0x16c1   :  { %v6933_v38 = vsub.f32 %v6911_v62, %v6929_v58 }
0x16c2   :  { %v6938_v24 = vmul.f32 %v6934_v16, %v6934_v16 }
0x16c3   :  { %v6937_v18 = vmul.f32 %v6933_v38, %v6933_v38 }
0x16c4   :  { %v6944_v11 = vsel %vm170_vm1, %v6938_v24, 0.0 }
0x16c5   :  { %6945 = vadd.xlane.f32.xlu1 %v6944_v11  ;;  %v6941_v17 = vsel %vm170_vm1, %v6937_v18, 0.0 }
0x16c6   :  { %6942 = vadd.xlane.f32.xlu0 %v6941_v17 }
0x16d3   :  { %v6928_v23 = vpop.xlane.xlu1 %6927 }
0x16d4   :  { %v6932_v32 = vmul.f32 0.03125, %v6928_v23  ;;  %v6925_v52 = vpop.xlane.xlu0 %6924 }
0x16d5   :  { %v6931_v28 = vmul.f32 0.03125, %v6925_v52 }
0x16d6   :  { %v6936_v35 = vsub.f32 %v6914_v15, %v6932_v32 }
0x16d7   :  { %v6935_v0 = vsub.f32 %v6913_v33, %v6931_v28 }
0x16d8   :  { %v6940_v29 = vmul.f32 %v6936_v35, %v6936_v35 }
0x16d9   :  { %v6939_v41 = vmul.f32 %v6935_v0, %v6935_v0 }
0x16da   :  { %v6950_v53 = vsel %vm170_vm1, %v6940_v29, 0.0 }
0x16db   :  { %6951 = vadd.xlane.f32.xlu1 %v6950_v53  ;;  %v6947_v10 = vsel %vm170_vm1, %v6939_v41, 0.0 }
0x16dc   :  { %6948 = vadd.xlane.f32.xlu0 %v6947_v10 }
0x1752   :  { %v6946_v13 = vpop.xlane.xlu1 %6945 }
0x1753   :  { %v6954_v34 = vmul.f32 0.03125, %v6946_v13  ;;  %v6943_v56 = vpop.xlane.xlu0 %6942 }
0x1754   :  { %v6953_v4 = vmul.f32 0.03125, %v6943_v56 }
0x1755   :  { %v6958_v21 = vadd.f32 1e-05, %v6954_v34 }
0x1756   :  { %v6957_v1 = vadd.f32 1e-05, %v6953_v4 }
0x1757   :  { %8567 = vrsqrt.f32 %v6958_v21 }
0x1758   :  { %8569 = vrsqrt.f32 %v6957_v1 }
0x1761   :  { %v8568_v55 = vpop.eup %8567 }
0x1762   :  { %v8570_v59 = vpop.eup %8569  ;;  %v6966_v20 = vmul.f32 %v8568_v55, %v6934_v16 }
0x1763   :  { %v6965_v44 = vmul.f32 %v8570_v59, %v6933_v38 }
0x1764   :  { %v6974_v37 = vmul.f32 %v7279_v31, %v6966_v20 }
0x1765   :  { %v6973_v2 = vmul.f32 %v7279_v31, %v6965_v44 }
0x1766   :  { %v6982_v12 = vadd.f32 %v7280_v22, %v6974_v37 }
0x1767   :  { %v6981_v40 = vadd.f32 %v7280_v22, %v6973_v2 }
0x1768   :  { %v6952_v54 = vpop.xlane.xlu1 %6951  ;;  %v6986_v8 = vsel %vm170_vm1, %v6982_v12, 0.0 }
0x1769   :  { %v6956_v42 = vmul.f32 0.03125, %v6952_v54  ;;  %v6949_v14 = vpop.xlane.xlu0 %6948  ;;  %v6985_v19 = vsel %vm170_vm1, %v6981_v40, 0.0 }
0x176a   :  { %v6955_v6 = vmul.f32 0.03125, %v6949_v14  ;;  %v6987_v7 = vadd.f32 %v6986_v8, %v6985_v19 }
0x176b   :  { %v6960_v9 = vadd.f32 1e-05, %v6956_v42 }
0x176c   :  { %v6959_v45 = vadd.f32 1e-05, %v6955_v6  ;;  %v6988_v62 = vrot.slane %v6987_v7, 4 }
0x176d   :  { %8571 = vrsqrt.f32 %v6960_v9 }
0x176e   :  { %8573 = vrsqrt.f32 %v6959_v45  ;;  %v6989_v63 = vadd.f32 %v6988_v62, %v6987_v7 }
0x1770   :  { %v6990_v51 = vrot.slane %v6989_v63, 2 }
0x1772   :  { %v6991_v58 = vadd.f32 %v6990_v51, %v6989_v63 }
0x1774   :  { %v6992_v24 = vrot.slane %v6991_v58, 1 }
0x1776   :  { %v6993_v17 = vadd.f32 %v6992_v24, %v6991_v58 }
0x1777   :  { %v8572_v49 = vpop.eup %8571 }
0x1778   :  { %v8574_v47 = vpop.eup %8573  ;;  %v6968_v39 = vmul.f32 %v8572_v49, %v6936_v35  ;;  %v7004_v52 = vmul.f32 0.0625, %v6993_v17 }
0x1779   :  { %v6967_v5 = vmul.f32 %v8574_v47, %v6935_v0  ;;  %v7281_v0 = vld [vmem:[%s10167_s2 + $0x13] ss:$0 sm:$0xff] }
0x177a   :  { %v6976_v61 = vmul.f32 %v7279_v31, %v6968_v39 }
0x177b   :  { %v6975_v15 = vmul.f32 %v7279_v31, %v6967_v5 }
0x177c   :  { %v6984_v33 = vadd.f32 %v7280_v22, %v6976_v61 }
0x177d   :  { %v6983_v26 = vadd.f32 %v7280_v22, %v6975_v15 }
0x177e   :  { %v6995_v36 = vsel %vm170_vm1, %v6984_v33, 0.0 }
0x177f   :  { %v6994_v3 = vsel %vm170_vm1, %v6983_v26, 0.0 }
0x1780   :  { %v6996_v60 = vadd.f32 %v6995_v36, %v6994_v3 }
0x1782   :  { %v6997_v16 = vrot.slane %v6996_v60, 4 }
0x1784   :  { %v6998_v38 = vadd.f32 %v6997_v16, %v6996_v60 }
0x1786   :  { %v6999_v18 = vrot.slane %v6998_v38, 2 }
0x1788   :  { %v7000_v11 = vadd.f32 %v6999_v18, %v6998_v38 }
0x178a   :  { %v7001_v23 = vrot.slane %v7000_v11, 1 }
0x178c   :  { %v7002_v32 = vadd.f32 %v7001_v23, %v7000_v11 }
0x178e   :  { %v7005_v28 = vmul.f32 0.0625, %v7002_v32 }
0x1790   :  { %v7018_v35 = vsel %vm7017_vm7, %v7005_v28, %v7004_v52 }
0x1791   :  { %7925 = vmatmul.mubr.msk.f32.vlgmr.msra.gmra.mrb[58].mxu0 %vm170_vm1, %v7018_v35 }
0x1864   :  { %v7087_v29 = vpop.f32.mrb[58].mxu0 }
0x1865   :  { %v7088_v41 = vadd.f32 %v7281_v0, %v7087_v29  ;;  %v7926_v53 = vpop.f32.mrb[59].mxu0 }
0x1867   :  { %7091 = vst [vmem:[#allocation2] sm:$0x3] %v7088_v41 }
0x1868   :  { %8586 = shalt.err (!%p8583_p4)
}
0x1869   :  { %s8587_s6 = scalar_lea.hbm %s10168_s3, 32 }
0x186a   :  { %p8588_p5 = scmp.ne.s32.totalorder %s10168_s3, %s8587_s6  ;;  %p8591_p6 = scmp.lt.u32.totalorder %s8587_s6, %s10168_s3 }
0x186c   :  { %p8593_p7 = pnand %p8591_p6, %p8588_p5 }
0x186e   :  { %8596 = shalt.err (!%p8593_p7)
}
0x186f   :  { %7101 = dma.vmem_to_hbm [thread:$0]  %s7099_s29, 32, %s10168_s3, [#allocation3]  }
0x1870   :  { %8597 = dma.done.wait [#allocation3], 32  }
0x1871   :  { %8598 = vsyncadd [#allocation3], 4294967264 }
0x1872   :  { %7105 = vsyncpa [#allocation3], 1 }

</bundles_post_ra>
